<compile_context>
chip_gen: v5e
topology: v5e:2x2
jax: 0.10.0
libtpu: 0.0.40
codegen_flags: <defaults>
</compile_context>

<pallas_src>
import jax
import jax.numpy as jnp
from jax.experimental import pallas as pl
from jax.experimental.pallas import tpu as pltpu


def _cdiv(a, b):
    return (a + b - 1) // b


def _make_conv_kernel(KH, KW, TH, Wp, C, OW, OCp, stride):
    """Builds a kernel closed over the static conv geometry."""

    def kernel(x_ref, w_ref, b_ref, o_ref):
        # x_ref: [KH, TH, Wp, C]   row-shifted input rows for this tile
        # w_ref: [KH*KW, C, OCp]   per-tap weight matrices (grid-resident)
        # b_ref: [1, OCp]
        # o_ref: [TH, OW, OCp]
        acc = jnp.zeros((TH * OW, OCp), jnp.float32)
        for kh in range(KH):
            row = x_ref[kh]                              # [TH, Wp, C]
            for kw in range(KW):
                if stride == 1:
                    win = row[:, kw:kw + OW, :]          # [TH, OW, C]
                else:
                    win = jax.lax.slice(
                        row, (0, kw, 0),
                        (TH, kw + (OW - 1) * stride + 1, C),
                        (1, stride, 1))
                patches = win.reshape(TH * OW, C)
                acc = acc + jnp.dot(
                    patches, w_ref[kh * KW + kw],
                    preferred_element_type=jnp.float32)
        acc = acc + b_ref[...].astype(jnp.float32)       # bias epilogue, once
        o_ref[...] = acc.reshape(TH, OW, OCp).astype(o_ref.dtype)

    return kernel


def conv_layer_forward(x, weight, bias, stride, *, tile_rows=None,
                       compute_dtype=None):
    """Reflection-pad + Conv2d, matching torch ConvLayer.forward semantics.

    x:      [N, C, H, W]
    weight: [OC, C, KH, KW]   (PyTorch Conv2d weight layout)
    bias:   [OC] or None
    """
    N, C, H, W = x.shape
    OC, IC, KH, KW = weight.shape
    assert IC == C, "channel mismatch"
    assert KH == KW, "ConvLayer uses a square kernel"
    pad = KH // 2
    assert H > pad and W > pad, "reflection pad requires pad < spatial dims"

    out_dtype = x.dtype
    if bias is None:
        bias = jnp.zeros((OC,), out_dtype)

    # Single layout change on the raw input (not on a K-expanded buffer).
    xh = jnp.transpose(x, (0, 2, 3, 1))                                # NHWC
    xp = jnp.pad(xh, ((0, 0), (pad, pad), (pad, pad), (0, 0)),
                 mode="reflect")
    Hp, Wp = H + 2 * pad, W + 2 * pad
    OH = (Hp - KH) // stride + 1
    OW = (Wp - KW) // stride + 1
    M_rows = N * OH

    # KH row-shifted (and H-strided) views of the padded input.
    xs = jnp.stack(
        [xp[:, kh:kh + (OH - 1) * stride + 1:stride, :, :]
         for kh in range(KH)],
        axis=0).reshape(KH, M_rows, Wp, C)

    # Per-tap [C, OC] weight matrices; pad OC up to a lane-dense multiple of
    # 128 so output stores are unmasked and MXU lanes are fully used.
    OCp = max(128, _cdiv(OC, 128) * 128)
    w_taps = jnp.transpose(weight, (2, 3, 1, 0)).reshape(KH * KW, C, OC)
    if OCp != OC:
        w_taps = jnp.pad(w_taps, ((0, 0), (0, 0), (0, OCp - OC)))
    b2 = jnp.pad(bias.astype(jnp.float32), (0, OCp - OC)).reshape(1, OCp)

    # Optional bf16 streaming (v6e/v7x); accumulation stays f32 either way.
    if compute_dtype is not None:
        xs = xs.astype(compute_dtype)
        w_taps = w_taps.astype(compute_dtype)
    itm = jnp.dtype(xs.dtype).itemsize

    # Tile rows: ~1k output pixels per step, input block bounded for v7x's
    # 64 MiB VMEM, and at least 2 grid steps for the two v7x TensorCores.
    if tile_rows is None:
        th_pixels = max(1, _cdiv(1024, OW))
        th_vmem = max(1, (8 * 1024 * 1024) // max(1, KH * Wp * C * itm))
        tile_rows = max(1, min(th_pixels, th_vmem, _cdiv(M_rows, 2)))
    TH = tile_rows

    Mp_rows = _cdiv(M_rows, TH) * TH
    if Mp_rows != M_rows:
        xs = jnp.pad(xs, ((0, 0), (0, Mp_rows - M_rows), (0, 0), (0, 0)))

    # VMEM budget: double-buffered blocks + f32 accumulator, with headroom.
    in_blk = KH * TH * Wp * C * itm
    w_blk = KH * KW * C * OCp * itm
    out_blk = TH * OW * OCp * jnp.dtype(out_dtype).itemsize
    acc_blk = TH * OW * OCp * 4
    vmem_est = 2 * (in_blk + w_blk + out_blk) + acc_blk + 2 * 8 * OCp * 4
    vmem_limit = int(min(64 * 2**20, max(32 * 2**20, 2 * vmem_est)))

    kernel = _make_conv_kernel(KH, KW, TH, Wp, C, OW, OCp, stride)

    out = pl.pallas_call(
        kernel,
        out_shape=jax.ShapeDtypeStruct((Mp_rows, OW, OCp), out_dtype),
        grid_spec=pltpu.PrefetchScalarGridSpec(
            num_scalar_prefetch=0,
            grid=(Mp_rows // TH,),
            in_specs=[
                pl.BlockSpec((KH, TH, Wp, C), lambda m: (0, m, 0, 0)),
                pl.BlockSpec((KH * KW, C, OCp), lambda m: (0, 0, 0)),
                pl.BlockSpec((1, OCp), lambda m: (0, 0)),
            ],
            out_specs=pl.BlockSpec((TH, OW, OCp), lambda m: (m, 0, 0)),
        ),
        compiler_params=pltpu.CompilerParams(
            dimension_semantics=("parallel",),
            vmem_limit_bytes=vmem_limit),
    )(xs, w_taps, b2)

    out = out[:M_rows, :, :OC]                                  # drop pads
    out = out.reshape(N, OH, OW, OC).transpose(0, 3, 1, 2)      # back to NCHW
    return out


def _reference_conv(x, weight, bias, stride):
    pad = weight.shape[2] // 2
    xp = jnp.pad(x, ((0, 0), (0, 0), (pad, pad), (pad, pad)), mode="reflect")
    out = jax.lax.conv_general_dilated(
        xp, weight, window_strides=(stride, stride), padding="VALID",
        dimension_numbers=("NCHW", "OIHW", "NCHW"))
    return out + bias.reshape(1, -1, 1, 1)


if __name__ == "__main__":
    key = jax.random.PRNGKey(0)
    k_x, k_w, k_b = jax.random.split(key, 3)

    # ConvLayer(in_channels=4, out_channels=8, kernel_size=3, stride=1, bias=True)
    N, C, H, W = 2, 4, 16, 16
    OC, KH, KW, stride = 8, 3, 3, 1

    x = jax.random.normal(k_x, (N, C, H, W), dtype=jnp.float32)
    fan_in = C * KH * KW
    bound = 1.0 / (fan_in ** 0.5)  # deterministic kaiming-uniform-style init
    weight = jax.random.uniform(k_w, (OC, C, KH, KW), jnp.float32, -bound, bound)
    bias = jax.random.uniform(k_b, (OC,), jnp.float32, -bound, bound)

    out = conv_layer_forward(x, weight, bias, stride)
    out = jax.block_until_ready(out)

    ref = jax.block_until_ready(_reference_conv(x, weight, bias, stride))
    assert out.shape == (N, OC, H, W), out.shape
    assert jnp.allclose(out, ref, atol=1e-3, rtol=1e-3), "mismatch vs reference"

    print("KERNEL_OK")
</pallas_src>

<mosaic_0001>
module attributes {stable_mosaic.version = 11 : i64} {
  func.func @kernel(%arg0: i32, %arg1: memref<3x16x18x4xf32, #tpu.memory_space<vmem>>, %arg2: memref<9x4x128xf32, #tpu.memory_space<vmem>>, %arg3: memref<1x128xf32, #tpu.memory_space<vmem>>, %arg4: memref<16x16x128xf32, #tpu.memory_space<vmem>>) attributes {dimension_semantics = [#tpu.dimension_semantics<parallel>], iteration_bounds = array<i64: 2>, scalar_prefetch = 0 : i64, scratch_operands = 0 : i64, tpu.core_type = #tpu.core_type<tc>, window_params = [{transform_indices = @transform_0, window_bounds = array<i64: 3, 16, 18, 4>}, {pipeline_mode = #tpu.pipeline_mode<synchronous>, transform_indices = @transform_1, window_bounds = array<i64: 9, 4, 128>}, {pipeline_mode = #tpu.pipeline_mode<synchronous>, transform_indices = @transform_2, window_bounds = array<i64: 1, 128>}, {transform_indices = @transform_3, window_bounds = array<i64: 16, 16, 128>}]} {
    %cst = arith.constant 0.000000e+00 : f32
    %0 = vector.broadcast %cst : f32 to vector<256x128xf32>
    %c0 = arith.constant 0 : index
    %c0_0 = arith.constant 0 : index
    %c0_1 = arith.constant 0 : index
    %c0_2 = arith.constant 0 : index
    %1 = vector.load %arg1[%c0, %c0_0, %c0_1, %c0_2] : memref<3x16x18x4xf32, #tpu.memory_space<vmem>>, vector<1x16x18x4xf32>
    %2 = vector.shape_cast %1 : vector<1x16x18x4xf32> to vector<16x18x4xf32>
    %3 = vector.extract_strided_slice %2 {offsets = [0, 0, 0], sizes = [16, 16, 4], strides = [1, 1, 1]} : vector<16x18x4xf32> to vector<16x16x4xf32>
    %4 = vector.shape_cast %3 : vector<16x16x4xf32> to vector<256x4xf32>
    %c0_3 = arith.constant 0 : index
    %c0_4 = arith.constant 0 : index
    %c0_5 = arith.constant 0 : index
    %5 = vector.load %arg2[%c0_3, %c0_4, %c0_5] : memref<9x4x128xf32, #tpu.memory_space<vmem>>, vector<1x4x128xf32>
    %6 = vector.shape_cast %5 : vector<1x4x128xf32> to vector<4x128xf32>
    %cst_6 = arith.constant dense<0.000000e+00> : vector<256x128xf32>
    %7 = tpu.matmul %4, %6, %cst_6 {dimension_numbers = #tpu.dot_dimension_numbers<[1], [0], [0], [1], [0, 0, 1, 1], [], []>} : vector<256x4xf32>, vector<4x128xf32>, vector<256x128xf32> -> vector<256x128xf32>
    %8 = arith.addf %0, %7 : vector<256x128xf32>
    %9 = vector.extract_strided_slice %2 {offsets = [0, 1, 0], sizes = [16, 16, 4], strides = [1, 1, 1]} : vector<16x18x4xf32> to vector<16x16x4xf32>
    %10 = vector.shape_cast %9 : vector<16x16x4xf32> to vector<256x4xf32>
    %c1 = arith.constant 1 : index
    %c0_7 = arith.constant 0 : index
    %c0_8 = arith.constant 0 : index
    %11 = vector.load %arg2[%c1, %c0_7, %c0_8] : memref<9x4x128xf32, #tpu.memory_space<vmem>>, vector<1x4x128xf32>
    %12 = vector.shape_cast %11 : vector<1x4x128xf32> to vector<4x128xf32>
    %cst_9 = arith.constant dense<0.000000e+00> : vector<256x128xf32>
    %13 = tpu.matmul %10, %12, %cst_9 {dimension_numbers = #tpu.dot_dimension_numbers<[1], [0], [0], [1], [0, 0, 1, 1], [], []>} : vector<256x4xf32>, vector<4x128xf32>, vector<256x128xf32> -> vector<256x128xf32>
    %14 = arith.addf %8, %13 : vector<256x128xf32>
    %15 = vector.extract_strided_slice %2 {offsets = [0, 2, 0], sizes = [16, 16, 4], strides = [1, 1, 1]} : vector<16x18x4xf32> to vector<16x16x4xf32>
    %16 = vector.shape_cast %15 : vector<16x16x4xf32> to vector<256x4xf32>
    %c2 = arith.constant 2 : index
    %c0_10 = arith.constant 0 : index
    %c0_11 = arith.constant 0 : index
    %17 = vector.load %arg2[%c2, %c0_10, %c0_11] : memref<9x4x128xf32, #tpu.memory_space<vmem>>, vector<1x4x128xf32>
    %18 = vector.shape_cast %17 : vector<1x4x128xf32> to vector<4x128xf32>
    %cst_12 = arith.constant dense<0.000000e+00> : vector<256x128xf32>
    %19 = tpu.matmul %16, %18, %cst_12 {dimension_numbers = #tpu.dot_dimension_numbers<[1], [0], [0], [1], [0, 0, 1, 1], [], []>} : vector<256x4xf32>, vector<4x128xf32>, vector<256x128xf32> -> vector<256x128xf32>
    %20 = arith.addf %14, %19 : vector<256x128xf32>
    %c1_13 = arith.constant 1 : index
    %c0_14 = arith.constant 0 : index
    %c0_15 = arith.constant 0 : index
    %c0_16 = arith.constant 0 : index
    %21 = vector.load %arg1[%c1_13, %c0_14, %c0_15, %c0_16] : memref<3x16x18x4xf32, #tpu.memory_space<vmem>>, vector<1x16x18x4xf32>
    %22 = vector.shape_cast %21 : vector<1x16x18x4xf32> to vector<16x18x4xf32>
    %23 = vector.extract_strided_slice %22 {offsets = [0, 0, 0], sizes = [16, 16, 4], strides = [1, 1, 1]} : vector<16x18x4xf32> to vector<16x16x4xf32>
    %24 = vector.shape_cast %23 : vector<16x16x4xf32> to vector<256x4xf32>
    %c3 = arith.constant 3 : index
    %c0_17 = arith.constant 0 : index
    %c0_18 = arith.constant 0 : index
    %25 = vector.load %arg2[%c3, %c0_17, %c0_18] : memref<9x4x128xf32, #tpu.memory_space<vmem>>, vector<1x4x128xf32>
    %26 = vector.shape_cast %25 : vector<1x4x128xf32> to vector<4x128xf32>
    %cst_19 = arith.constant dense<0.000000e+00> : vector<256x128xf32>
    %27 = tpu.matmul %24, %26, %cst_19 {dimension_numbers = #tpu.dot_dimension_numbers<[1], [0], [0], [1], [0, 0, 1, 1], [], []>} : vector<256x4xf32>, vector<4x128xf32>, vector<256x128xf32> -> vector<256x128xf32>
    %28 = arith.addf %20, %27 : vector<256x128xf32>
    %29 = vector.extract_strided_slice %22 {offsets = [0, 1, 0], sizes = [16, 16, 4], strides = [1, 1, 1]} : vector<16x18x4xf32> to vector<16x16x4xf32>
    %30 = vector.shape_cast %29 : vector<16x16x4xf32> to vector<256x4xf32>
    %c4 = arith.constant 4 : index
    %c0_20 = arith.constant 0 : index
    %c0_21 = arith.constant 0 : index
    %31 = vector.load %arg2[%c4, %c0_20, %c0_21] : memref<9x4x128xf32, #tpu.memory_space<vmem>>, vector<1x4x128xf32>
    %32 = vector.shape_cast %31 : vector<1x4x128xf32> to vector<4x128xf32>
    %cst_22 = arith.constant dense<0.000000e+00> : vector<256x128xf32>
    %33 = tpu.matmul %30, %32, %cst_22 {dimension_numbers = #tpu.dot_dimension_numbers<[1], [0], [0], [1], [0, 0, 1, 1], [], []>} : vector<256x4xf32>, vector<4x128xf32>, vector<256x128xf32> -> vector<256x128xf32>
    %34 = arith.addf %28, %33 : vector<256x128xf32>
    %35 = vector.extract_strided_slice %22 {offsets = [0, 2, 0], sizes = [16, 16, 4], strides = [1, 1, 1]} : vector<16x18x4xf32> to vector<16x16x4xf32>
    %36 = vector.shape_cast %35 : vector<16x16x4xf32> to vector<256x4xf32>
    %c5 = arith.constant 5 : index
    %c0_23 = arith.constant 0 : index
    %c0_24 = arith.constant 0 : index
    %37 = vector.load %arg2[%c5, %c0_23, %c0_24] : memref<9x4x128xf32, #tpu.memory_space<vmem>>, vector<1x4x128xf32>
    %38 = vector.shape_cast %37 : vector<1x4x128xf32> to vector<4x128xf32>
    %cst_25 = arith.constant dense<0.000000e+00> : vector<256x128xf32>
    %39 = tpu.matmul %36, %38, %cst_25 {dimension_numbers = #tpu.dot_dimension_numbers<[1], [0], [0], [1], [0, 0, 1, 1], [], []>} : vector<256x4xf32>, vector<4x128xf32>, vector<256x128xf32> -> vector<256x128xf32>
    %40 = arith.addf %34, %39 : vector<256x128xf32>
    %c2_26 = arith.constant 2 : index
    %c0_27 = arith.constant 0 : index
    %c0_28 = arith.constant 0 : index
    %c0_29 = arith.constant 0 : index
    %41 = vector.load %arg1[%c2_26, %c0_27, %c0_28, %c0_29] : memref<3x16x18x4xf32, #tpu.memory_space<vmem>>, vector<1x16x18x4xf32>
    %42 = vector.shape_cast %41 : vector<1x16x18x4xf32> to vector<16x18x4xf32>
    %43 = vector.extract_strided_slice %42 {offsets = [0, 0, 0], sizes = [16, 16, 4], strides = [1, 1, 1]} : vector<16x18x4xf32> to vector<16x16x4xf32>
    %44 = vector.shape_cast %43 : vector<16x16x4xf32> to vector<256x4xf32>
    %c6 = arith.constant 6 : index
    %c0_30 = arith.constant 0 : index
    %c0_31 = arith.constant 0 : index
    %45 = vector.load %arg2[%c6, %c0_30, %c0_31] : memref<9x4x128xf32, #tpu.memory_space<vmem>>, vector<1x4x128xf32>
    %46 = vector.shape_cast %45 : vector<1x4x128xf32> to vector<4x128xf32>
    %cst_32 = arith.constant dense<0.000000e+00> : vector<256x128xf32>
    %47 = tpu.matmul %44, %46, %cst_32 {dimension_numbers = #tpu.dot_dimension_numbers<[1], [0], [0], [1], [0, 0, 1, 1], [], []>} : vector<256x4xf32>, vector<4x128xf32>, vector<256x128xf32> -> vector<256x128xf32>
    %48 = arith.addf %40, %47 : vector<256x128xf32>
    %49 = vector.extract_strided_slice %42 {offsets = [0, 1, 0], sizes = [16, 16, 4], strides = [1, 1, 1]} : vector<16x18x4xf32> to vector<16x16x4xf32>
    %50 = vector.shape_cast %49 : vector<16x16x4xf32> to vector<256x4xf32>
    %c7 = arith.constant 7 : index
    %c0_33 = arith.constant 0 : index
    %c0_34 = arith.constant 0 : index
    %51 = vector.load %arg2[%c7, %c0_33, %c0_34] : memref<9x4x128xf32, #tpu.memory_space<vmem>>, vector<1x4x128xf32>
    %52 = vector.shape_cast %51 : vector<1x4x128xf32> to vector<4x128xf32>
    %cst_35 = arith.constant dense<0.000000e+00> : vector<256x128xf32>
    %53 = tpu.matmul %50, %52, %cst_35 {dimension_numbers = #tpu.dot_dimension_numbers<[1], [0], [0], [1], [0, 0, 1, 1], [], []>} : vector<256x4xf32>, vector<4x128xf32>, vector<256x128xf32> -> vector<256x128xf32>
    %54 = arith.addf %48, %53 : vector<256x128xf32>
    %55 = vector.extract_strided_slice %42 {offsets = [0, 2, 0], sizes = [16, 16, 4], strides = [1, 1, 1]} : vector<16x18x4xf32> to vector<16x16x4xf32>
    %56 = vector.shape_cast %55 : vector<16x16x4xf32> to vector<256x4xf32>
    %c8 = arith.constant 8 : index
    %c0_36 = arith.constant 0 : index
    %c0_37 = arith.constant 0 : index
    %57 = vector.load %arg2[%c8, %c0_36, %c0_37] : memref<9x4x128xf32, #tpu.memory_space<vmem>>, vector<1x4x128xf32>
    %58 = vector.shape_cast %57 : vector<1x4x128xf32> to vector<4x128xf32>
    %cst_38 = arith.constant dense<0.000000e+00> : vector<256x128xf32>
    %59 = tpu.matmul %56, %58, %cst_38 {dimension_numbers = #tpu.dot_dimension_numbers<[1], [0], [0], [1], [0, 0, 1, 1], [], []>} : vector<256x4xf32>, vector<4x128xf32>, vector<256x128xf32> -> vector<256x128xf32>
    %60 = arith.addf %54, %59 : vector<256x128xf32>
    %c0_39 = arith.constant 0 : index
    %c0_40 = arith.constant 0 : index
    %61 = vector.load %arg3[%c0_39, %c0_40] : memref<1x128xf32, #tpu.memory_space<vmem>>, vector<1x128xf32>
    %62 = vector.broadcast %61 : vector<1x128xf32> to vector<256x128xf32>
    %63 = arith.addf %60, %62 : vector<256x128xf32>
    %64 = vector.shape_cast %63 : vector<256x128xf32> to vector<16x16x128xf32>
    %c0_41 = arith.constant 0 : index
    %c0_42 = arith.constant 0 : index
    %c0_43 = arith.constant 0 : index
    %65 = vector.load %arg4[%c0_41, %c0_42, %c0_43] : memref<16x16x128xf32, #tpu.memory_space<vmem>>, vector<16x16x128xf32>
    tpu.vector_store %arg4[%c0_41, %c0_42, %c0_43], %64 {strides = array<i32>} : memref<16x16x128xf32, #tpu.memory_space<vmem>>, vector<16x16x128xf32>,
    return
  }
  func.func @transform_0(%arg0: i32) -> (i32, i32, i32, i32) {
    %c0_i32 = arith.constant 0 : i32
    %c0_i32_0 = arith.constant 0 : i32
    %c0_i32_1 = arith.constant 0 : i32
    %c0_i32_2 = arith.constant 0 : i32
    return %c0_i32, %arg0, %c0_i32_0, %c0_i32_1 : i32, i32, i32, i32
  }
  func.func @transform_1(%arg0: i32) -> (i32, i32, i32) {
    %c0_i32 = arith.constant 0 : i32
    %c0_i32_0 = arith.constant 0 : i32
    %c0_i32_1 = arith.constant 0 : i32
    %c0_i32_2 = arith.constant 0 : i32
    return %c0_i32, %c0_i32_0, %c0_i32_1 : i32, i32, i32
  }
  func.func @transform_2(%arg0: i32) -> (i32, i32) {
    %c0_i32 = arith.constant 0 : i32
    %c0_i32_0 = arith.constant 0 : i32
    %c0_i32_1 = arith.constant 0 : i32
    return %c0_i32, %c0_i32_0 : i32, i32
  }
  func.func @transform_3(%arg0: i32) -> (i32, i32, i32) {
    %c0_i32 = arith.constant 0 : i32
    %c0_i32_0 = arith.constant 0 : i32
    %c0_i32_1 = arith.constant 0 : i32
    return %arg0, %c0_i32, %c0_i32_0 : i32, i32, i32
  }
}

</mosaic_0001>

<bundles_post_ra>
// kernel: tpu_custom_call.1
= control target key start
LH: loop header
LB: loop body
LE: loop exit
PB: predicated region body
PF: predicated region fallthrough
CT: control target
= control target key end

     0   :  { %8 = vsyncpa [#allocation4], 0  ;;  %s5940_s0 = inlined_call_operand.vmem [shape: f32[3,32,18,4], index: 0, kind: input, shape index: {}]   ;;  %s5941_s1 = inlined_call_operand.vmem [shape: f32[9,4,128], index: 1, kind: input, shape index: {}]   ;;  %s5942_s2 = inlined_call_operand.vmem [shape: f32[1,128], index: 2, kind: input, shape index: {}]   ;;  %s5943_s3 = inlined_call_operand.hbm [shape: f32[32,16,128], index: 3, kind: output, shape index: {}]  }
   0x1   :  { %10 = vsyncpa [#allocation4 + $0x1], 0  ;;  %s4164_s12 = smov 0   ;;  %s4166_s13 = smov 0  }
   0x2   :  { %s4168_s14 = smov 0   ;;  %s4170_s15 = smov 0  }
   0x3 LB: > { %s3567_s16 = sadd.s32 4294967295, %s4140_s15   ;;  %s3568_s17 = sadd.s32 4294967294, %s4140_s15   ;;  %s4140_s15 = sphi %s4170_s15, %s5995_s15   ;;  %s4136_s14 = sphi %s4168_s14, %s5994_s14   ;;  %s4132_s13 = sphi %s4166_s13, %s5993_s13   ;;  %s4128_s12 = sphi %s4164_s12, %s5992_s12  }
   0x4   : > { %s4187_s18 = sadd.s32 1, %s4140_s15   ;;  %s23_s19 = sadd.s32 1, %s4136_s14 }
   0x5   : > { %s20_s20 = ssub.s32 %s4140_s15, %s4187_s18  ;;  %p30_p0 = scmp.ne.s32.totalorder %s4136_s14, %s4132_s13 }
   0x6   : > { %p21_p1 = scmp.eq.s32.totalorder %s20_s20, 0  ;;  %p31_p2 = scmp.eq.s32.totalorder %s4140_s15, 0 }
   0x7   : > { %p102_p3 = scmp.eq.s32.totalorder %s3567_s16, 1  ;;  %p107_p4 = scmp.ne.s32.totalorder %s4132_s13, %s4128_s12 }
   0x8   : > { %s4200_s21 = scalar_select %p21_p1, %s4136_s14, %s23_s19  }
   0x9   : > { %p32_p5 = por %p31_p2, %p30_p0  ;;  %p4202_p6 = por %p102_p3, %p30_p0 }
   0xa   : > { %p108_p7 = scmp.eq.s32.totalorder %s3568_s17, 1  ;;  %p3570_p9 = scmp.ge.s32.totalorder %s4140_s15, 2 }
   0xc   : > { %p4206_p8 = por %p108_p7, %p107_p4  ;;  %130 = sbr.rel (%p3570_p9) target bundleno = 166 (0xa6), region = 24 }
  0x11   : > { %133 = sbr.rel (!%p32_p5) target bundleno = 166 (0xa6), region = 28  ;;  %s135_s24 = sand.u32 (%p32_p5), 1, %s4136_s14  }
  0x12   : > { %s3989_s25 = smul.u32 (%p32_p5), 384, %s4140_s15 }
  0x13   : > { %s3988_s26 = smul.u32 (%p32_p5), 1152, %s135_s24 }
  0x14   : > { %s4218_s29 = scalar_lea.vmem (%p32_p5), %s5940_s0, %s3989_s25 }
  0x15   : > { %v456_v0 = vld [vmem:[%s4218_s29] sm:$0xff] (%p32_p5)  ;;  %v458_v1 = vld [vmem:[%s4218_s29 + $0x8] sm:$0xff] (%p32_p5)  ;;  %v460_v2 = vld [vmem:[%s4218_s29 + $0x10] sm:$0xff] (%p32_p5)  ;;  %s4223_s30 = scalar_lea.vmem (%p32_p5), [#allocation2], %s3988_s26 }
  0x16   : > { %457 = vst [vmem:[%s4223_s30] sm:$0xff] %v456_v0  ;;  %v462_v3 = vld [vmem:[%s4218_s29 + $0x18] sm:$0xff]  ;;  %v464_v4 = vld [vmem:[%s4218_s29 + $0x20] sm:$0xff]  ;;  %v466_v5 = vld [vmem:[%s4218_s29 + $0x28] sm:$0xff] }
  0x17   : > { %459 = vst [vmem:[%s4223_s30 + $0x8] sm:$0xff] %v458_v1  ;;  %v468_v6 = vld [vmem:[%s4218_s29 + $0x30] sm:$0xff]  ;;  %v470_v7 = vld [vmem:[%s4218_s29 + $0x38] sm:$0xff]  ;;  %v472_v8 = vld [vmem:[%s4218_s29 + $0x40] sm:$0xff] }
  0x18   : > { %461 = vst [vmem:[%s4223_s30 + $0x10] sm:$0xff] %v460_v2  ;;  %v474_v9 = vld [vmem:[%s4218_s29 + $0x48] sm:$0xff]  ;;  %v476_v10 = vld [vmem:[%s4218_s29 + $0x50] sm:$0xff]  ;;  %v478_v11 = vld [vmem:[%s4218_s29 + $0x58] sm:$0xff] }
  0x19   : > { %463 = vst [vmem:[%s4223_s30 + $0x18] sm:$0xff] %v462_v3  ;;  %v480_v12 = vld [vmem:[%s4218_s29 + $0x60] sm:$0xff]  ;;  %v482_v13 = vld [vmem:[%s4218_s29 + $0x68] sm:$0xff]  ;;  %v484_v14 = vld [vmem:[%s4218_s29 + $0x70] sm:$0xff] }
  0x1a   : > { %465 = vst [vmem:[%s4223_s30 + $0x20] sm:$0xff] %v464_v4  ;;  %v486_v15 = vld [vmem:[%s4218_s29 + $0x78] sm:$0xff]  ;;  %v488_v16 = vld [vmem:[%s4218_s29 + $0x80] sm:$0xff]  ;;  %v490_v17 = vld [vmem:[%s4218_s29 + $0x88] sm:$0xff] }
  0x1b   : > { %467 = vst [vmem:[%s4223_s30 + $0x28] sm:$0xff] %v466_v5  ;;  %v492_v18 = vld [vmem:[%s4218_s29 + $0x90] sm:$0xff]  ;;  %v494_v19 = vld [vmem:[%s4218_s29 + $0x98] sm:$0xff]  ;;  %v496_v20 = vld [vmem:[%s4218_s29 + $0xa0] sm:$0xff] }
  0x1c   : > { %469 = vst [vmem:[%s4223_s30 + $0x30] sm:$0xff] %v468_v6  ;;  %v498_v21 = vld [vmem:[%s4218_s29 + $0xa8] sm:$0xff]  ;;  %v500_v22 = vld [vmem:[%s4218_s29 + $0xb0] sm:$0xff]  ;;  %v502_v23 = vld [vmem:[%s4218_s29 + $0xb8] sm:$0xff] }
  0x1d   : > { %471 = vst [vmem:[%s4223_s30 + $0x38] sm:$0xff] %v470_v7  ;;  %v504_v24 = vld [vmem:[%s4218_s29 + $0xc0] sm:$0xff]  ;;  %v506_v25 = vld [vmem:[%s4218_s29 + $0xc8] sm:$0xff]  ;;  %v508_v26 = vld [vmem:[%s4218_s29 + $0xd0] sm:$0xff] }
  0x1e   : > { %473 = vst [vmem:[%s4223_s30 + $0x40] sm:$0xff] %v472_v8  ;;  %v510_v27 = vld [vmem:[%s4218_s29 + $0xd8] sm:$0xff]  ;;  %v512_v28 = vld [vmem:[%s4218_s29 + $0xe0] sm:$0xff]  ;;  %v514_v29 = vld [vmem:[%s4218_s29 + $0xe8] sm:$0xff] }
  0x1f   : > { %475 = vst [vmem:[%s4223_s30 + $0x48] sm:$0xff] %v474_v9  ;;  %v516_v30 = vld [vmem:[%s4218_s29 + $0xf0] sm:$0xff]  ;;  %v518_v31 = vld [vmem:[%s4218_s29 + $0xf8] sm:$0xff]  ;;  %v520_v32 = vld [vmem:[%s4218_s29 + $0x100] sm:$0xff] }
  0x20   : > { %477 = vst [vmem:[%s4223_s30 + $0x50] sm:$0xff] %v476_v10  ;;  %v522_v33 = vld [vmem:[%s4218_s29 + $0x108] sm:$0xff]  ;;  %v524_v34 = vld [vmem:[%s4218_s29 + $0x110] sm:$0xff]  ;;  %v526_v35 = vld [vmem:[%s4218_s29 + $0x118] sm:$0xff] }
  0x21   : > { %479 = vst [vmem:[%s4223_s30 + $0x58] sm:$0xff] %v478_v11  ;;  %v528_v36 = vld [vmem:[%s4218_s29 + $0x120] sm:$0xff]  ;;  %v530_v37 = vld [vmem:[%s4218_s29 + $0x128] sm:$0xff]  ;;  %v532_v38 = vld [vmem:[%s4218_s29 + $0x130] sm:$0xff] }
  0x22   : > { %481 = vst [vmem:[%s4223_s30 + $0x60] sm:$0xff] %v480_v12  ;;  %v534_v39 = vld [vmem:[%s4218_s29 + $0x138] sm:$0xff]  ;;  %v536_v40 = vld [vmem:[%s4218_s29 + $0x140] sm:$0xff]  ;;  %v538_v41 = vld [vmem:[%s4218_s29 + $0x148] sm:$0xff] }
  0x23   : > { %483 = vst [vmem:[%s4223_s30 + $0x68] sm:$0xff] %v482_v13  ;;  %v540_v42 = vld [vmem:[%s4218_s29 + $0x150] sm:$0xff]  ;;  %v542_v43 = vld [vmem:[%s4218_s29 + $0x158] sm:$0xff]  ;;  %v544_v44 = vld [vmem:[%s4218_s29 + $0x160] sm:$0xff] }
  0x24   : > { %485 = vst [vmem:[%s4223_s30 + $0x70] sm:$0xff] %v484_v14  ;;  %v546_v45 = vld [vmem:[%s4218_s29 + $0x168] sm:$0xff]  ;;  %v548_v46 = vld [vmem:[%s4218_s29 + $0x170] sm:$0xff]  ;;  %v550_v47 = vld [vmem:[%s4218_s29 + $0x178] sm:$0xff] }
  0x25   : > { %487 = vst [vmem:[%s4223_s30 + $0x78] sm:$0xff] %v486_v15  ;;  %v552_v48 = vld [vmem:[%s4218_s29 + $0x300] sm:$0xff]  ;;  %v554_v49 = vld [vmem:[%s4218_s29 + $0x308] sm:$0xff]  ;;  %v556_v50 = vld [vmem:[%s4218_s29 + $0x310] sm:$0xff] }
  0x26   : > { %489 = vst [vmem:[%s4223_s30 + $0x80] sm:$0xff] %v488_v16  ;;  %v558_v51 = vld [vmem:[%s4218_s29 + $0x318] sm:$0xff]  ;;  %v560_v52 = vld [vmem:[%s4218_s29 + $0x320] sm:$0xff]  ;;  %v562_v53 = vld [vmem:[%s4218_s29 + $0x328] sm:$0xff] }
  0x27   : > { %491 = vst [vmem:[%s4223_s30 + $0x88] sm:$0xff] %v490_v17  ;;  %v564_v54 = vld [vmem:[%s4218_s29 + $0x330] sm:$0xff]  ;;  %v566_v55 = vld [vmem:[%s4218_s29 + $0x338] sm:$0xff]  ;;  %v568_v56 = vld [vmem:[%s4218_s29 + $0x340] sm:$0xff] }
  0x28   : > { %493 = vst [vmem:[%s4223_s30 + $0x90] sm:$0xff] %v492_v18  ;;  %v570_v57 = vld [vmem:[%s4218_s29 + $0x348] sm:$0xff]  ;;  %v572_v58 = vld [vmem:[%s4218_s29 + $0x350] sm:$0xff]  ;;  %v574_v59 = vld [vmem:[%s4218_s29 + $0x358] sm:$0xff] }
  0x29   : > { %495 = vst [vmem:[%s4223_s30 + $0x98] sm:$0xff] %v494_v19  ;;  %v576_v60 = vld [vmem:[%s4218_s29 + $0x360] sm:$0xff]  ;;  %v578_v61 = vld [vmem:[%s4218_s29 + $0x368] sm:$0xff]  ;;  %v580_v62 = vld [vmem:[%s4218_s29 + $0x370] sm:$0xff] }
  0x2a   : > { %497 = vst [vmem:[%s4223_s30 + $0xa0] sm:$0xff] %v496_v20  ;;  %v582_v63 = vld [vmem:[%s4218_s29 + $0x378] sm:$0xff]  ;;  %v584_v0 = vld [vmem:[%s4218_s29 + $0x380] sm:$0xff]  ;;  %v586_v1 = vld [vmem:[%s4218_s29 + $0x388] sm:$0xff] }
  0x2b   : > { %499 = vst [vmem:[%s4223_s30 + $0xa8] sm:$0xff] %v498_v21  ;;  %v588_v2 = vld [vmem:[%s4218_s29 + $0x390] sm:$0xff]  ;;  %v590_v3 = vld [vmem:[%s4218_s29 + $0x398] sm:$0xff]  ;;  %v592_v4 = vld [vmem:[%s4218_s29 + $0x3a0] sm:$0xff] }
  0x2c   : > { %501 = vst [vmem:[%s4223_s30 + $0xb0] sm:$0xff] %v500_v22  ;;  %v594_v5 = vld [vmem:[%s4218_s29 + $0x3a8] sm:$0xff]  ;;  %v596_v6 = vld [vmem:[%s4218_s29 + $0x3b0] sm:$0xff]  ;;  %v598_v7 = vld [vmem:[%s4218_s29 + $0x3b8] sm:$0xff] }
  0x2d   : > { %503 = vst [vmem:[%s4223_s30 + $0xb8] sm:$0xff] %v502_v23  ;;  %v600_v8 = vld [vmem:[%s4218_s29 + $0x3c0] sm:$0xff]  ;;  %v602_v9 = vld [vmem:[%s4218_s29 + $0x3c8] sm:$0xff]  ;;  %v604_v10 = vld [vmem:[%s4218_s29 + $0x3d0] sm:$0xff] }
  0x2e   : > { %505 = vst [vmem:[%s4223_s30 + $0xc0] sm:$0xff] %v504_v24  ;;  %v606_v11 = vld [vmem:[%s4218_s29 + $0x3d8] sm:$0xff]  ;;  %v608_v12 = vld [vmem:[%s4218_s29 + $0x3e0] sm:$0xff]  ;;  %v610_v13 = vld [vmem:[%s4218_s29 + $0x3e8] sm:$0xff] }
  0x2f   : > { %507 = vst [vmem:[%s4223_s30 + $0xc8] sm:$0xff] %v506_v25  ;;  %v612_v14 = vld [vmem:[%s4218_s29 + $0x3f0] sm:$0xff]  ;;  %v614_v15 = vld [vmem:[%s4218_s29 + $0x3f8] sm:$0xff]  ;;  %v616_v16 = vld [vmem:[%s4218_s29 + $0x400] sm:$0xff] }
  0x30   : > { %509 = vst [vmem:[%s4223_s30 + $0xd0] sm:$0xff] %v508_v26  ;;  %v618_v17 = vld [vmem:[%s4218_s29 + $0x408] sm:$0xff]  ;;  %v620_v18 = vld [vmem:[%s4218_s29 + $0x410] sm:$0xff]  ;;  %v622_v19 = vld [vmem:[%s4218_s29 + $0x418] sm:$0xff] }
  0x31   : > { %511 = vst [vmem:[%s4223_s30 + $0xd8] sm:$0xff] %v510_v27  ;;  %v624_v20 = vld [vmem:[%s4218_s29 + $0x420] sm:$0xff]  ;;  %v626_v21 = vld [vmem:[%s4218_s29 + $0x428] sm:$0xff]  ;;  %v628_v22 = vld [vmem:[%s4218_s29 + $0x430] sm:$0xff] }
  0x32   : > { %513 = vst [vmem:[%s4223_s30 + $0xe0] sm:$0xff] %v512_v28  ;;  %v630_v23 = vld [vmem:[%s4218_s29 + $0x438] sm:$0xff]  ;;  %v632_v24 = vld [vmem:[%s4218_s29 + $0x440] sm:$0xff]  ;;  %v634_v25 = vld [vmem:[%s4218_s29 + $0x448] sm:$0xff] }
  0x33   : > { %515 = vst [vmem:[%s4223_s30 + $0xe8] sm:$0xff] %v514_v29  ;;  %v636_v26 = vld [vmem:[%s4218_s29 + $0x450] sm:$0xff]  ;;  %v638_v27 = vld [vmem:[%s4218_s29 + $0x458] sm:$0xff]  ;;  %v640_v28 = vld [vmem:[%s4218_s29 + $0x460] sm:$0xff] }
  0x34   : > { %517 = vst [vmem:[%s4223_s30 + $0xf0] sm:$0xff] %v516_v30  ;;  %v642_v29 = vld [vmem:[%s4218_s29 + $0x468] sm:$0xff]  ;;  %v644_v30 = vld [vmem:[%s4218_s29 + $0x470] sm:$0xff] }
  0x35   : > { %519 = vst [vmem:[%s4223_s30 + $0xf8] sm:$0xff] %v518_v31  ;;  %v646_v31 = vld [vmem:[%s4218_s29 + $0x478] sm:$0xff] }
  0x36   : > { %521 = vst [vmem:[%s4223_s30 + $0x100] sm:$0xff] %v520_v32  ;;  %v648_v32 = vld [vmem:[%s4218_s29 + $0x600] sm:$0xff] }
  0x37   : > { %523 = vst [vmem:[%s4223_s30 + $0x108] sm:$0xff] %v522_v33  ;;  %v650_v33 = vld [vmem:[%s4218_s29 + $0x608] sm:$0xff] }
  0x38   : > { %525 = vst [vmem:[%s4223_s30 + $0x110] sm:$0xff] %v524_v34  ;;  %v652_v34 = vld [vmem:[%s4218_s29 + $0x610] sm:$0xff] }
  0x39   : > { %527 = vst [vmem:[%s4223_s30 + $0x118] sm:$0xff] %v526_v35  ;;  %v654_v35 = vld [vmem:[%s4218_s29 + $0x618] sm:$0xff] }
  0x3a   : > { %529 = vst [vmem:[%s4223_s30 + $0x120] sm:$0xff] %v528_v36  ;;  %v656_v36 = vld [vmem:[%s4218_s29 + $0x620] sm:$0xff] }
  0x3b   : > { %531 = vst [vmem:[%s4223_s30 + $0x128] sm:$0xff] %v530_v37  ;;  %v658_v37 = vld [vmem:[%s4218_s29 + $0x628] sm:$0xff] }
  0x3c   : > { %533 = vst [vmem:[%s4223_s30 + $0x130] sm:$0xff] %v532_v38  ;;  %v660_v38 = vld [vmem:[%s4218_s29 + $0x630] sm:$0xff] }
  0x3d   : > { %535 = vst [vmem:[%s4223_s30 + $0x138] sm:$0xff] %v534_v39  ;;  %v662_v39 = vld [vmem:[%s4218_s29 + $0x638] sm:$0xff] }
  0x3e   : > { %537 = vst [vmem:[%s4223_s30 + $0x140] sm:$0xff] %v536_v40  ;;  %v664_v40 = vld [vmem:[%s4218_s29 + $0x640] sm:$0xff] }
  0x3f   : > { %539 = vst [vmem:[%s4223_s30 + $0x148] sm:$0xff] %v538_v41  ;;  %v666_v41 = vld [vmem:[%s4218_s29 + $0x648] sm:$0xff] }
  0x40   : > { %541 = vst [vmem:[%s4223_s30 + $0x150] sm:$0xff] %v540_v42  ;;  %v668_v42 = vld [vmem:[%s4218_s29 + $0x650] sm:$0xff] }
  0x41   : > { %543 = vst [vmem:[%s4223_s30 + $0x158] sm:$0xff] %v542_v43  ;;  %v670_v43 = vld [vmem:[%s4218_s29 + $0x658] sm:$0xff] }
  0x42   : > { %545 = vst [vmem:[%s4223_s30 + $0x160] sm:$0xff] %v544_v44  ;;  %v672_v44 = vld [vmem:[%s4218_s29 + $0x660] sm:$0xff] }
  0x43   : > { %547 = vst [vmem:[%s4223_s30 + $0x168] sm:$0xff] %v546_v45  ;;  %v674_v45 = vld [vmem:[%s4218_s29 + $0x668] sm:$0xff] }
  0x44   : > { %549 = vst [vmem:[%s4223_s30 + $0x170] sm:$0xff] %v548_v46  ;;  %v676_v46 = vld [vmem:[%s4218_s29 + $0x670] sm:$0xff] }
  0x45   : > { %551 = vst [vmem:[%s4223_s30 + $0x178] sm:$0xff] %v550_v47  ;;  %v678_v47 = vld [vmem:[%s4218_s29 + $0x678] sm:$0xff] }
  0x46   : > { %553 = vst [vmem:[%s4223_s30 + $0x180] sm:$0xff] %v552_v48  ;;  %v680_v48 = vld [vmem:[%s4218_s29 + $0x680] sm:$0xff] }
  0x47   : > { %555 = vst [vmem:[%s4223_s30 + $0x188] sm:$0xff] %v554_v49  ;;  %v682_v49 = vld [vmem:[%s4218_s29 + $0x688] sm:$0xff] }
  0x48   : > { %557 = vst [vmem:[%s4223_s30 + $0x190] sm:$0xff] %v556_v50  ;;  %v684_v50 = vld [vmem:[%s4218_s29 + $0x690] sm:$0xff] }
  0x49   : > { %559 = vst [vmem:[%s4223_s30 + $0x198] sm:$0xff] %v558_v51  ;;  %v686_v51 = vld [vmem:[%s4218_s29 + $0x698] sm:$0xff] }
  0x4a   : > { %561 = vst [vmem:[%s4223_s30 + $0x1a0] sm:$0xff] %v560_v52  ;;  %v688_v52 = vld [vmem:[%s4218_s29 + $0x6a0] sm:$0xff] }
  0x4b   : > { %563 = vst [vmem:[%s4223_s30 + $0x1a8] sm:$0xff] %v562_v53  ;;  %v690_v53 = vld [vmem:[%s4218_s29 + $0x6a8] sm:$0xff] }
  0x4c   : > { %565 = vst [vmem:[%s4223_s30 + $0x1b0] sm:$0xff] %v564_v54  ;;  %v692_v54 = vld [vmem:[%s4218_s29 + $0x6b0] sm:$0xff] }
  0x4d   : > { %567 = vst [vmem:[%s4223_s30 + $0x1b8] sm:$0xff] %v566_v55  ;;  %v694_v55 = vld [vmem:[%s4218_s29 + $0x6b8] sm:$0xff] }
  0x4e   : > { %569 = vst [vmem:[%s4223_s30 + $0x1c0] sm:$0xff] %v568_v56  ;;  %v696_v56 = vld [vmem:[%s4218_s29 + $0x6c0] sm:$0xff] }
  0x4f   : > { %571 = vst [vmem:[%s4223_s30 + $0x1c8] sm:$0xff] %v570_v57  ;;  %v698_v57 = vld [vmem:[%s4218_s29 + $0x6c8] sm:$0xff] }
  0x50   : > { %573 = vst [vmem:[%s4223_s30 + $0x1d0] sm:$0xff] %v572_v58  ;;  %v700_v58 = vld [vmem:[%s4218_s29 + $0x6d0] sm:$0xff] }
  0x51   : > { %575 = vst [vmem:[%s4223_s30 + $0x1d8] sm:$0xff] %v574_v59  ;;  %v702_v59 = vld [vmem:[%s4218_s29 + $0x6d8] sm:$0xff] }
  0x52   : > { %577 = vst [vmem:[%s4223_s30 + $0x1e0] sm:$0xff] %v576_v60  ;;  %v704_v60 = vld [vmem:[%s4218_s29 + $0x6e0] sm:$0xff] }
  0x53   : > { %579 = vst [vmem:[%s4223_s30 + $0x1e8] sm:$0xff] %v578_v61  ;;  %v706_v61 = vld [vmem:[%s4218_s29 + $0x6e8] sm:$0xff] }
  0x54   : > { %581 = vst [vmem:[%s4223_s30 + $0x1f0] sm:$0xff] %v580_v62  ;;  %v708_v62 = vld [vmem:[%s4218_s29 + $0x6f0] sm:$0xff] }
  0x55   : > { %583 = vst [vmem:[%s4223_s30 + $0x1f8] sm:$0xff] %v582_v63  ;;  %v710_v63 = vld [vmem:[%s4218_s29 + $0x6f8] sm:$0xff] }
  0x56   : > { %585 = vst [vmem:[%s4223_s30 + $0x200] sm:$0xff] %v584_v0  ;;  %v712_v0 = vld [vmem:[%s4218_s29 + $0x700] sm:$0xff] }
  0x57   : > { %587 = vst [vmem:[%s4223_s30 + $0x208] sm:$0xff] %v586_v1  ;;  %v714_v1 = vld [vmem:[%s4218_s29 + $0x708] sm:$0xff] }
  0x58   : > { %589 = vst [vmem:[%s4223_s30 + $0x210] sm:$0xff] %v588_v2  ;;  %v716_v2 = vld [vmem:[%s4218_s29 + $0x710] sm:$0xff] }
  0x59   : > { %591 = vst [vmem:[%s4223_s30 + $0x218] sm:$0xff] %v590_v3  ;;  %v718_v3 = vld [vmem:[%s4218_s29 + $0x718] sm:$0xff] }
  0x5a   : > { %593 = vst [vmem:[%s4223_s30 + $0x220] sm:$0xff] %v592_v4  ;;  %v720_v4 = vld [vmem:[%s4218_s29 + $0x720] sm:$0xff] }
  0x5b   : > { %595 = vst [vmem:[%s4223_s30 + $0x228] sm:$0xff] %v594_v5  ;;  %v722_v5 = vld [vmem:[%s4218_s29 + $0x728] sm:$0xff] }
  0x5c   : > { %597 = vst [vmem:[%s4223_s30 + $0x230] sm:$0xff] %v596_v6  ;;  %v724_v6 = vld [vmem:[%s4218_s29 + $0x730] sm:$0xff] }
  0x5d   : > { %599 = vst [vmem:[%s4223_s30 + $0x238] sm:$0xff] %v598_v7  ;;  %v726_v7 = vld [vmem:[%s4218_s29 + $0x738] sm:$0xff] }
  0x5e   : > { %601 = vst [vmem:[%s4223_s30 + $0x240] sm:$0xff] %v600_v8  ;;  %v728_v8 = vld [vmem:[%s4218_s29 + $0x740] sm:$0xff] }
  0x5f   : > { %603 = vst [vmem:[%s4223_s30 + $0x248] sm:$0xff] %v602_v9  ;;  %v730_v9 = vld [vmem:[%s4218_s29 + $0x748] sm:$0xff] }
  0x60   : > { %605 = vst [vmem:[%s4223_s30 + $0x250] sm:$0xff] %v604_v10  ;;  %v732_v10 = vld [vmem:[%s4218_s29 + $0x750] sm:$0xff] }
  0x61   : > { %607 = vst [vmem:[%s4223_s30 + $0x258] sm:$0xff] %v606_v11  ;;  %v734_v11 = vld [vmem:[%s4218_s29 + $0x758] sm:$0xff] }
  0x62   : > { %609 = vst [vmem:[%s4223_s30 + $0x260] sm:$0xff] %v608_v12  ;;  %v736_v12 = vld [vmem:[%s4218_s29 + $0x760] sm:$0xff] }
  0x63   : > { %611 = vst [vmem:[%s4223_s30 + $0x268] sm:$0xff] %v610_v13  ;;  %v738_v13 = vld [vmem:[%s4218_s29 + $0x768] sm:$0xff] }
  0x64   : > { %613 = vst [vmem:[%s4223_s30 + $0x270] sm:$0xff] %v612_v14  ;;  %v740_v14 = vld [vmem:[%s4218_s29 + $0x770] sm:$0xff] }
  0x65   : > { %615 = vst [vmem:[%s4223_s30 + $0x278] sm:$0xff] %v614_v15  ;;  %v742_v15 = vld [vmem:[%s4218_s29 + $0x778] sm:$0xff] }
  0x66   : > { %617 = vst [vmem:[%s4223_s30 + $0x280] sm:$0xff] %v616_v16 }
  0x67   : > { %619 = vst [vmem:[%s4223_s30 + $0x288] sm:$0xff] %v618_v17 }
  0x68   : > { %621 = vst [vmem:[%s4223_s30 + $0x290] sm:$0xff] %v620_v18 }
  0x69   : > { %623 = vst [vmem:[%s4223_s30 + $0x298] sm:$0xff] %v622_v19 }
  0x6a   : > { %625 = vst [vmem:[%s4223_s30 + $0x2a0] sm:$0xff] %v624_v20 }
  0x6b   : > { %627 = vst [vmem:[%s4223_s30 + $0x2a8] sm:$0xff] %v626_v21 }
  0x6c   : > { %629 = vst [vmem:[%s4223_s30 + $0x2b0] sm:$0xff] %v628_v22 }
  0x6d   : > { %631 = vst [vmem:[%s4223_s30 + $0x2b8] sm:$0xff] %v630_v23 }
  0x6e   : > { %633 = vst [vmem:[%s4223_s30 + $0x2c0] sm:$0xff] %v632_v24 }
  0x6f   : > { %635 = vst [vmem:[%s4223_s30 + $0x2c8] sm:$0xff] %v634_v25 }
  0x70   : > { %637 = vst [vmem:[%s4223_s30 + $0x2d0] sm:$0xff] %v636_v26 }
  0x71   : > { %639 = vst [vmem:[%s4223_s30 + $0x2d8] sm:$0xff] %v638_v27 }
  0x72   : > { %641 = vst [vmem:[%s4223_s30 + $0x2e0] sm:$0xff] %v640_v28 }
  0x73   : > { %643 = vst [vmem:[%s4223_s30 + $0x2e8] sm:$0xff] %v642_v29 }
  0x74   : > { %645 = vst [vmem:[%s4223_s30 + $0x2f0] sm:$0xff] %v644_v30 }
  0x75   : > { %647 = vst [vmem:[%s4223_s30 + $0x2f8] sm:$0xff] %v646_v31 }
  0x76   : > { %649 = vst [vmem:[%s4223_s30 + $0x300] sm:$0xff] %v648_v32 }
  0x77   : > { %651 = vst [vmem:[%s4223_s30 + $0x308] sm:$0xff] %v650_v33 }
  0x78   : > { %653 = vst [vmem:[%s4223_s30 + $0x310] sm:$0xff] %v652_v34 }
  0x79   : > { %655 = vst [vmem:[%s4223_s30 + $0x318] sm:$0xff] %v654_v35 }
  0x7a   : > { %657 = vst [vmem:[%s4223_s30 + $0x320] sm:$0xff] %v656_v36 }
  0x7b   : > { %659 = vst [vmem:[%s4223_s30 + $0x328] sm:$0xff] %v658_v37 }
  0x7c   : > { %661 = vst [vmem:[%s4223_s30 + $0x330] sm:$0xff] %v660_v38 }
  0x7d   : > { %663 = vst [vmem:[%s4223_s30 + $0x338] sm:$0xff] %v662_v39 }
  0x7e   : > { %665 = vst [vmem:[%s4223_s30 + $0x340] sm:$0xff] %v664_v40 }
  0x7f   : > { %667 = vst [vmem:[%s4223_s30 + $0x348] sm:$0xff] %v666_v41 }
  0x80   : > { %669 = vst [vmem:[%s4223_s30 + $0x350] sm:$0xff] %v668_v42 }
  0x81   : > { %671 = vst [vmem:[%s4223_s30 + $0x358] sm:$0xff] %v670_v43 }
  0x82   : > { %673 = vst [vmem:[%s4223_s30 + $0x360] sm:$0xff] %v672_v44 }
  0x83   : > { %675 = vst [vmem:[%s4223_s30 + $0x368] sm:$0xff] %v674_v45 }
  0x84   : > { %677 = vst [vmem:[%s4223_s30 + $0x370] sm:$0xff] %v676_v46 }
  0x85   : > { %679 = vst [vmem:[%s4223_s30 + $0x378] sm:$0xff] %v678_v47 }
  0x86   : > { %681 = vst [vmem:[%s4223_s30 + $0x380] sm:$0xff] %v680_v48 }
  0x87   : > { %683 = vst [vmem:[%s4223_s30 + $0x388] sm:$0xff] %v682_v49 }
  0x88   : > { %685 = vst [vmem:[%s4223_s30 + $0x390] sm:$0xff] %v684_v50 }
  0x89   : > { %687 = vst [vmem:[%s4223_s30 + $0x398] sm:$0xff] %v686_v51 }
  0x8a   : > { %689 = vst [vmem:[%s4223_s30 + $0x3a0] sm:$0xff] %v688_v52 }
  0x8b   : > { %691 = vst [vmem:[%s4223_s30 + $0x3a8] sm:$0xff] %v690_v53 }
  0x8c   : > { %693 = vst [vmem:[%s4223_s30 + $0x3b0] sm:$0xff] %v692_v54 }
  0x8d   : > { %695 = vst [vmem:[%s4223_s30 + $0x3b8] sm:$0xff] %v694_v55 }
  0x8e   : > { %697 = vst [vmem:[%s4223_s30 + $0x3c0] sm:$0xff] %v696_v56 }
  0x8f   : > { %699 = vst [vmem:[%s4223_s30 + $0x3c8] sm:$0xff] %v698_v57 }
  0x90   : > { %701 = vst [vmem:[%s4223_s30 + $0x3d0] sm:$0xff] %v700_v58 }
  0x91   : > { %703 = vst [vmem:[%s4223_s30 + $0x3d8] sm:$0xff] %v702_v59 }
  0x92   : > { %705 = vst [vmem:[%s4223_s30 + $0x3e0] sm:$0xff] %v704_v60 }
  0x93   : > { %707 = vst [vmem:[%s4223_s30 + $0x3e8] sm:$0xff] %v706_v61 }
  0x94   : > { %709 = vst [vmem:[%s4223_s30 + $0x3f0] sm:$0xff] %v708_v62 }
  0x95   : > { %711 = vst [vmem:[%s4223_s30 + $0x3f8] sm:$0xff] %v710_v63 }
  0x96   : > { %713 = vst [vmem:[%s4223_s30 + $0x400] sm:$0xff] %v712_v0 }
  0x97   : > { %715 = vst [vmem:[%s4223_s30 + $0x408] sm:$0xff] %v714_v1 }
  0x98   : > { %717 = vst [vmem:[%s4223_s30 + $0x410] sm:$0xff] %v716_v2 }
  0x99   : > { %719 = vst [vmem:[%s4223_s30 + $0x418] sm:$0xff] %v718_v3 }
  0x9a   : > { %721 = vst [vmem:[%s4223_s30 + $0x420] sm:$0xff] %v720_v4 }
  0x9b   : > { %723 = vst [vmem:[%s4223_s30 + $0x428] sm:$0xff] %v722_v5 }
  0x9c   : > { %725 = vst [vmem:[%s4223_s30 + $0x430] sm:$0xff] %v724_v6 }
  0x9d   : > { %727 = vst [vmem:[%s4223_s30 + $0x438] sm:$0xff] %v726_v7 }
  0x9e   : > { %729 = vst [vmem:[%s4223_s30 + $0x440] sm:$0xff] %v728_v8 }
  0x9f   : > { %731 = vst [vmem:[%s4223_s30 + $0x448] sm:$0xff] %v730_v9 }
  0xa0   : > { %733 = vst [vmem:[%s4223_s30 + $0x450] sm:$0xff] %v732_v10 }
  0xa1   : > { %735 = vst [vmem:[%s4223_s30 + $0x458] sm:$0xff] %v734_v11 }
  0xa2   : > { %737 = vst [vmem:[%s4223_s30 + $0x460] sm:$0xff] %v736_v12 }
  0xa3   : > { %739 = vst [vmem:[%s4223_s30 + $0x468] sm:$0xff] %v738_v13 }
  0xa4   : > { %741 = vst [vmem:[%s4223_s30 + $0x470] sm:$0xff] %v740_v14 }
  0xa5   : > { %743 = vst [vmem:[%s4223_s30 + $0x478] sm:$0xff] %v742_v15 }
  0xa6 PF: > { %p3574_p10 = scmp.ge.s32.totalorder %s4140_s15, 1  ;;  %p748_p11 = scmp.lt.s32.totalorder %s4140_s15, 3 }
  0xa8   : > { %p749_p12 = pnand %p3574_p10, %p748_p11 }
  0xaa   : > { %752 = sbr.rel (%p749_p12) target bundleno = 896 (0x380), region = 66 }
  0xaf   : > { %v3576_v16 = vld [vmem:[%s5941_s1 + $0x4] sm:$0xf]  ;;  %vm1025_vm0 = vcmask 1043456   ;;  %s4516_s6 = sand.u32 1, %s4132_s13   ;;  %v3643_v17 = vld [vmem:[%s5941_s1 + $0x8] sm:$0xf] }
  0xb0   : > { %3985 = vmatpush.msk.msra.mxu1 %vm1025_vm0, %v3576_v16  ;;  %3986 = vmatpush.msk.msra.mxu2 %vm1025_vm0, %v3576_v16  ;;  %s3990_s7 = smul.u32 1152, %s4516_s6  ;;  %v3725_v18 = vld [vmem:[%s5941_s1 + $0xc] sm:$0xf]  ;;  %v828_v19 = vld [vmem:[%s5941_s1] sm:$0xf]  ;;  %vm877_vm1 = vcmask 1046528  }
  0xb1   : > { %3987 = vmatpush.msk.msra.mxu3 %vm1025_vm0, %v3576_v16  ;;  %v3759_v20 = vld [vmem:[%s5941_s1 + $0x10] sm:$0xf]  ;;  %vm960_vm2 = vcmask 31744   ;;  %3577 = vmatpush.msk.msra.mxu0 %vm1025_vm0, %v3576_v16  ;;  %vm1322_vm3 = vcmask 1045504   ;;  %s3575_s8 = sshll.u32 %s4516_s6, 8  ;;  %s3984_s17 = sshll.u32 %s3567_s16, 8 }
  0xb2   : > { %3644 = vmatpush.msk.msrb.mxu2 %vm1025_vm0, %v3643_v17  ;;  %3610 = vmatpush.msk.msrb.mxu1 %vm1025_vm0, %v828_v19  ;;  %s4537_s25 = scalar_lea.vmem [#allocation2], %s3990_s7  ;;  %s5627_s11 = scalar_lea.vmem [#allocation3], %s3575_s8 }
  0xb3   : > { %3726 = vmatpush.msk.msrb.mxu3 %vm1025_vm0, %v3725_v18  ;;  %v4540_v21 = vld [vmem:[%s4537_s25 + $0x60] sm:$0xff]  ;;  %v4543_v22 = vld [vmem:[%s4537_s25 + $0x68] sm:$0xff]  ;;  %3760 = vmatpush.msk.msrb.mxu0 %vm1025_vm0, %v3759_v20  ;;  %v4566_v33 = vld [vmem:[%s4537_s25 + $0x70] sm:$0x3]  ;;  %s3496_s24 = scalar_lea.hbm %s5943_s3, %s3984_s17  ;;  %s3484_s16 = scalar_lea.sflag [#allocation4], %s4516_s6 }
  0xb4   : > { %v4546_v23 = vld [vmem:[%s4537_s25 + $0xc0] sm:$0xff]  ;;  %v898_v24 = vrot.slane %v4540_v21, 1  ;;  %v899_v25 = vrot.slane %v4543_v22, 1  ;;  %v4552_v26 = vld [vmem:[%s4537_s25 + $0xc8] sm:$0xff]  ;;  %v4573_v36 = vld [vmem:[%s4537_s25 + $0xd0] sm:$0x3] }
  0xb5   : > { %v918_v27 = vrot.slane %v4546_v23, 1  ;;  %v4556_v28 = vld [vmem:[%s4537_s25 + $0x120] sm:$0xff]  ;;  %v4559_v29 = vld [vmem:[%s4537_s25 + $0x128] sm:$0xff]  ;;  %v919_v30 = vrot.slane %v4552_v26, 1  ;;  %v4584_v42 = vld [vmem:[%s4537_s25 + $0x130] sm:$0x3] }
  0xb6   : > { %v938_v31 = vrot.slane %v4556_v28, 1  ;;  %v939_v32 = vrot.slane %v4559_v29, 1  ;;  %v4569_v34 = vld [vmem:[%s4537_s25] sm:$0xff]  ;;  %v900_v35 = vsel %vm877_vm1, %v898_v24, %v899_v25  ;;  %v4576_v37 = vld [vmem:[%s4537_s25 + $0x8] sm:$0xff]  ;;  %v901_v43 = vrot.slane %v4566_v33, 1  ;;  %v4601_v52 = vld [vmem:[%s4537_s25 + $0x78] sm:$0xff] }
  0xb7   : > { %v878_v38 = vrot.slane %v4569_v34, 1  ;;  %3586 = vmatmul.msk.f32.vlgmr.msra.gmra.mxu1 %vm960_vm2, %v900_v35  ;;  %v920_v39 = vsel %vm877_vm1, %v918_v27, %v919_v30  ;;  %v879_v41 = vrot.slane %v4576_v37, 1  ;;  %v4590_v44 = vld [vmem:[%s4537_s25 + $0x10] sm:$0x3]  ;;  %v921_v45 = vrot.slane %v4573_v36, 1  ;;  %v4604_v53 = vld [vmem:[%s4537_s25 + $0x80] sm:$0xff] }
  0xb8   : > { %v940_v40 = vsel %vm877_vm1, %v938_v31, %v939_v32  ;;  %3594 = vmatmul.msk.f32.vlgmr.msra.gmra.mxu2 %vm960_vm2, %v920_v39  ;;  %v941_v47 = vrot.slane %v4584_v42, 1  ;;  %v881_v48 = vrot.slane %v4590_v44, 1  ;;  %v902_v49 = vsel %vm877_vm1, %v899_v25, %v901_v43  ;;  %v4607_v54 = vld [vmem:[%s4537_s25 + $0xd8] sm:$0xff]  ;;  %v4610_v55 = vld [vmem:[%s4537_s25 + $0xe0] sm:$0xff]  ;;  %v4641_v8 = vld [vmem:[%s4537_s25 + $0x88] sm:$0x3] }
  0xb9   : > { %3602 = vmatmul.msk.f32.vlgmr.msra.gmra.mxu3 %vm960_vm2, %v940_v40  ;;  %v880_v46 = vsel %vm877_vm1, %v878_v38, %v879_v41  ;;  %v922_v50 = vsel %vm877_vm1, %v919_v30, %v921_v45  ;;  %v4613_v56 = vld [vmem:[%s4537_s25 + $0x138] sm:$0xff]  ;;  %v4616_v57 = vld [vmem:[%s4537_s25 + $0x140] sm:$0xff]  ;;  %v903_v59 = vrot.slane %v4601_v52, 1  ;;  %v904_v60 = vrot.slane %v4604_v53, 1  ;;  %v4644_v9 = vld [vmem:[%s4537_s25 + $0xe8] sm:$0x3] }
  0xba   : > { %3578 = vmatmul.msk.f32.vlgmr.msra.gmra.mxu0 %vm960_vm2, %v880_v46  ;;  %v942_v51 = vsel %vm877_vm1, %v939_v32, %v941_v47  ;;  %v882_v58 = vsel %vm877_vm1, %v879_v41, %v881_v48  ;;  %v4625_v61 = vld [vmem:[%s4537_s25 + $0x18] sm:$0xff]  ;;  %v4628_v62 = vld [vmem:[%s4537_s25 + $0x20] sm:$0xff]  ;;  %v923_v63 = vrot.slane %v4607_v54, 1  ;;  %v924_v0 = vrot.slane %v4610_v55, 1  ;;  %v4647_v10 = vld [vmem:[%s4537_s25 + $0x148] sm:$0x3] }
  0xbb   : > { %v943_v1 = vrot.slane %v4613_v56, 1  ;;  %v944_v2 = vrot.slane %v4616_v57, 1  ;;  %v883_v3 = vrot.slane %v4625_v61, 1  ;;  %v884_v4 = vrot.slane %v4628_v62, 1  ;;  %v4655_v13 = vld [vmem:[%s4537_s25 + $0x28] sm:$0x3] }
  0xbc   : > { %v905_v5 = vsel %vm877_vm1, %v903_v59, %v904_v60  ;;  %v925_v6 = vsel %vm877_vm1, %v923_v63, %v924_v0  ;;  %v906_v12 = vrot.slane %v4641_v8, 1  ;;  %v926_v14 = vrot.slane %v4644_v9, 1  ;;  %v4665_v20 = vld [vmem:[%s4537_s25 + $0x90] sm:$0xff]  ;;  %v4668_v24 = vld [vmem:[%s4537_s25 + $0x98] sm:$0xff]  ;;  %v4708_v59 = vld [vmem:[%s4537_s25 + $0x100] sm:$0x3] }
  0xbd   : > { %v945_v7 = vsel %vm877_vm1, %v943_v1, %v944_v2  ;;  %v885_v11 = vsel %vm877_vm1, %v883_v3, %v884_v4  ;;  %v946_v15 = vrot.slane %v4647_v10, 1  ;;  %v886_v16 = vrot.slane %v4655_v13, 1  ;;  %v4671_v25 = vld [vmem:[%s4537_s25 + $0xf0] sm:$0xff]  ;;  %v4674_v27 = vld [vmem:[%s4537_s25 + $0xf8] sm:$0xff]  ;;  %v4719_v1 = vld [vmem:[%s4537_s25 + $0x40] sm:$0x3] }
  0xbe   : > { %v907_v17 = vsel %vm877_vm1, %v904_v60, %v906_v12  ;;  %v927_v18 = vsel %vm877_vm1, %v924_v0, %v926_v14  ;;  %v4677_v30 = vld [vmem:[%s4537_s25 + $0x150] sm:$0xff]  ;;  %v4680_v31 = vld [vmem:[%s4537_s25 + $0x158] sm:$0xff]  ;;  %v908_v35 = vrot.slane %v4665_v20, 1  ;;  %v909_v38 = vrot.slane %v4668_v24, 1  ;;  %v4711_v60 = vld [vmem:[%s4537_s25 + $0x160] sm:$0x3] }
  0xbf   : > { %3587 = vmatmul.msk.f32.gmra.mxu1 %vm960_vm2, %v902_v49  ;;  %v947_v19 = vsel %vm877_vm1, %v944_v2, %v946_v15  ;;  %v887_v32 = vsel %vm877_vm1, %v884_v4, %v886_v16  ;;  %v4689_v39 = vld [vmem:[%s4537_s25 + $0x30] sm:$0xff]  ;;  %v4692_v40 = vld [vmem:[%s4537_s25 + $0x38] sm:$0xff]  ;;  %v928_v41 = vrot.slane %v4671_v25, 1  ;;  %v929_v43 = vrot.slane %v4674_v27, 1  ;;  %v4741_v15 = vld [vmem:[%s4537_s25 + $0xa8] sm:$0xff]  ;;  %s3499_s26 = sshll.u32 %s3496_s24, 4  ;;  %s3500_s26 = int_to_ptr.hbm [resolvable:$true] %s3499_s26 }
  0xc0   : > { %3595 = vmatmul.msk.f32.gmra.mxu2 %vm960_vm2, %v922_v50  ;;  %v948_v45 = vrot.slane %v4677_v30, 1  ;;  %v949_v46 = vrot.slane %v4680_v31, 1  ;;  %v888_v47 = vrot.slane %v4689_v39, 1  ;;  %v889_v48 = vrot.slane %v4692_v40, 1  ;;  %v4703_v50 = vld [vmem:[%s4537_s25 + $0xa0] sm:$0x3] }
  0xc1   : > { %3603 = vmatmul.msk.f32.gmra.mxu3 %vm960_vm2, %v942_v51  ;;  %v910_v49 = vsel %vm877_vm1, %v908_v35, %v909_v38  ;;  %v930_v51 = vsel %vm877_vm1, %v928_v41, %v929_v43  ;;  %v911_v63 = vrot.slane %v4703_v50, 1  ;;  %v3875_v2 = vld [vmem:[%s5941_s1 + $0x18] sm:$0xf]  ;;  %v3909_v3 = vld [vmem:[%s5941_s1 + $0x1c] sm:$0xf]  ;;  %v931_v4 = vrot.slane %v4708_v59, 1 }
  0xc2   : > { %3579 = vmatmul.msk.f32.gmra.mxu0 %vm960_vm2, %v882_v58  ;;  %v950_v58 = vsel %vm877_vm1, %v948_v45, %v949_v46  ;;  %v890_v0 = vsel %vm877_vm1, %v888_v47, %v889_v48  ;;  %3876 = vmatpush.msk.msra.mxu2 %vm1025_vm0, %v3875_v2  ;;  %v4744_v16 = vld [vmem:[%s4537_s25 + $0xb0] sm:$0xff]  ;;  %s4092_s27 = sshra.s32 %s3500_s26, 4  ;;  %s4098_s4 = scalar_lea.hbm %s5943_s3, 512  ;;  %s4093_s27 = int_to_ptr.hbm [resolvable:$true] %s4092_s27 }
  0xc3   : > { %3910 = vmatpush.msk.msra.mxu3 %vm1025_vm0, %v3909_v3  ;;  %v932_v12 = vsel %vm877_vm1, %v929_v43, %v931_v4  ;;  %v914_v41 = vrot.slane %v4744_v16, 1  ;;  %v4765_v43 = vld [vmem:[%s4537_s25 + $0x48] sm:$0xff]  ;;  %v4768_v45 = vld [vmem:[%s4537_s25 + $0x50] sm:$0xff]  ;;  %v4785_v4 = vld [vmem:[%s4537_s25 + $0xb8] sm:$0x3]  ;;  %s4094_s28 = scalar_lea.hbm %s4093_s27, 256  ;;  %p4099_p2 = scmp.lt.s32.totalorder %s4093_s27, %s5943_s3 }
  0xc4   : > { %p4095_p13 = scmp.ne.s32.totalorder %s4093_s27, %s4094_s28  ;;  %p4100_p3 = scmp.lt.s32.totalorder %s4098_s4, %s4094_s28 }
  0xc6   : > { %p4096_p0 = pnand %p4095_p13, %p4202_p6  ;;  %p4101_p4 = por %p4100_p3, %p4099_p2 }
  0xc7   : > { %3588 = vmatmul.msk.f32.gmra.mxu1 %vm960_vm2, %v905_v5  ;;  %v951_v5 = vrot.slane %v4711_v60, 1 }
  0xc8   : > { %3596 = vmatmul.msk.f32.gmra.mxu2 %vm960_vm2, %v925_v6  ;;  %v3793_v6 = vld [vmem:[%s5941_s1 + $0x14] sm:$0xf]  ;;  %p4097_p1 = pneg %p4096_p0 }
  0xc9   : > { %3604 = vmatmul.msk.f32.gmra.mxu3 %vm960_vm2, %v945_v7  ;;  %3794 = vmatpush.msk.msra.mxu1 %vm1025_vm0, %v3793_v6  ;;  %v891_v7 = vrot.slane %v4719_v1, 1  ;;  %v952_v14 = vsel %vm877_vm1, %v949_v46, %v951_v5  ;;  %v3943_v46 = vld [vmem:[%s5941_s1 + $0x20] sm:$0xf]  ;;  %v4788_v5 = vld [vmem:[%s4537_s25 + $0x118] sm:$0x3] }
  0xca   : > { %3580 = vmatmul.msk.f32.gmra.mxu0 %vm960_vm2, %v885_v11  ;;  %v912_v11 = vsel %vm877_vm1, %v909_v38, %v911_v63  ;;  %v913_v38 = vrot.slane %v4741_v15, 1  ;;  %v894_v63 = vrot.slane %v4768_v45, 1  ;;  %v4791_v6 = vld [vmem:[%s4537_s25 + $0x178] sm:$0x3]  ;;  %p4102_p5 = pnand %p4101_p4, %p4097_p1 }
  0xcb   : > { %v892_v35 = vsel %vm877_vm1, %v889_v48, %v891_v7  ;;  %3944 = vmatpush.msk.msra.mxu0 %vm1025_vm0, %v3943_v46 }
  0xcf   : > { %3589 = vmatmul.msk.f32.gmra.mxu1 %vm960_vm2, %v907_v17  ;;  %v4747_v17 = vld [vmem:[%s4537_s25 + $0x108] sm:$0xff] }
  0xd0   : > { %3597 = vmatmul.msk.f32.gmra.mxu2 %vm960_vm2, %v927_v18  ;;  %v4750_v18 = vld [vmem:[%s4537_s25 + $0x110] sm:$0xff]  ;;  %v933_v47 = vrot.slane %v4747_v17, 1 }
  0xd1   : > { %3605 = vmatmul.msk.f32.gmra.mxu3 %vm960_vm2, %v947_v19  ;;  %v4753_v19 = vld [vmem:[%s4537_s25 + $0x168] sm:$0xff]  ;;  %v934_v48 = vrot.slane %v4750_v18, 1 }
  0xd2   : > { %3581 = vmatmul.msk.f32.gmra.mxu0 %vm960_vm2, %v887_v32  ;;  %v4756_v32 = vld [vmem:[%s4537_s25 + $0x170] sm:$0xff] }
  0xd3   : > { %v935_v2 = vsel %vm877_vm1, %v933_v47, %v934_v48 }
  0xd7   : > { %3590 = vmatmul.msk.f32.gmra.mxu1 %vm960_vm2, %v910_v49  ;;  %v953_v49 = vrot.slane %v4753_v19, 1 }
  0xd8   : > { %3598 = vmatmul.msk.f32.gmra.mxu2 %vm960_vm2, %v930_v51  ;;  %v954_v51 = vrot.slane %v4756_v32, 1 }
  0xd9   : > { %3606 = vmatmul.msk.f32.gmra.mxu3 %vm960_vm2, %v950_v58  ;;  %v893_v58 = vrot.slane %v4765_v43, 1 }
  0xda   : > { %3582 = vmatmul.msk.f32.gmra.mxu0 %vm960_vm2, %v890_v0  ;;  %v915_v0 = vsel %vm877_vm1, %v913_v38, %v914_v41  ;;  %v955_v3 = vsel %vm877_vm1, %v953_v49, %v954_v51 }
  0xdb   : > { %v895_v7 = vsel %vm877_vm1, %v893_v58, %v894_v63 }
  0xdf   : > { %3591 = vmatmul.msk.f32.gmra.mxu1 %vm960_vm2, %v912_v11  ;;  %v916_v11 = vrot.slane %v4785_v4, 1 }
  0xe0   : > { %3599 = vmatmul.msk.f32.gmra.mxu2 %vm960_vm2, %v932_v12  ;;  %v4799_v12 = vld [vmem:[%s4537_s25 + $0x58] sm:$0x3] }
  0xe1   : > { %3607 = vmatmul.msk.f32.gmra.mxu3 %vm960_vm2, %v952_v14  ;;  %v936_v14 = vrot.slane %v4788_v5, 1  ;;  %v896_v38 = vrot.slane %v4799_v12, 1  ;;  %v917_v46 = vsel %vm877_vm1, %v914_v41, %v916_v11  ;;  %v4819_v41 = vld [vmem:[%s4537_s25 + $0x180] sm:$0xff]  ;;  %v4831_v11 = vld [vmem:[%s4537_s25 + $0x190] sm:$0x3] }
  0xe2   : > { %3583 = vmatmul.msk.f32.gmra.mxu0 %vm960_vm2, %v892_v35  ;;  %v956_v35 = vrot.slane %v4791_v6, 1 }
  0xe3   : > { %v937_v47 = vsel %vm877_vm1, %v934_v48, %v936_v14  ;;  %v897_v58 = vsel %vm877_vm1, %v894_v63, %v896_v38  ;;  %v1928_v48 = vrot.slane %v4819_v41, 1  ;;  %v1326_v14 = vrot.slane %v4590_v44, 2 }
  0xe4   : > { %v957_v49 = vsel %vm877_vm1, %v954_v51, %v956_v35  ;;  %v1931_v35 = vrot.slane %v4831_v11, 1  ;;  %v1328_v44 = vrot.slane %v4625_v61, 2 }
  0xe7   : > { %3592 = vmatmul.msk.f32.gmra.mxu1 %vm960_vm2, %v915_v0  ;;  %v4813_v0 = vld [vmem:[%s4537_s25 + $0x188] sm:$0xff] }
  0xe8   : > { %3600 = vmatmul.msk.f32.gmra.mxu2 %vm960_vm2, %v935_v2  ;;  %v1323_v2 = vrot.slane %v4569_v34, 2  ;;  %v1929_v51 = vrot.slane %v4813_v0, 1 }
  0xe9   : > { %3608 = vmatmul.msk.f32.gmra.mxu3 %vm960_vm2, %v955_v3  ;;  %v1324_v3 = vrot.slane %v4576_v37, 2 }
  0xea   : > { %3584 = vmatmul.msk.f32.gmra.mxu0 %vm960_vm2, %v895_v7  ;;  %v1930_v7 = vsel %vm877_vm1, %v1928_v48, %v1929_v51  ;;  %v3682_v48 = vld [vmem:[%s4537_s25 + $0x1a8] sm:$0x3] }
  0xeb   : > { %v1325_v63 = vsel %vm1322_vm3, %v1323_v2, %v1324_v3  ;;  %v1327_v38 = vsel %vm1322_vm3, %v1324_v3, %v1326_v14  ;;  %v4872_v14 = vld [vmem:[%s4537_s25 + $0x1b8] sm:$0xff] }
  0xef   : > { %3593 = vmatmul.msk.f32.gmra.mxu1 %vm960_vm2, %v917_v46  ;;  %v4844_v46 = vld [vmem:[%s4537_s25 + $0x1a0] sm:$0xff] }
  0xf0   : > { %3601 = vmatmul.msk.f32.gmra.mxu2 %vm960_vm2, %v937_v47  ;;  %v1329_v47 = vrot.slane %v4628_v62, 2 }
  0xf1   : > { %3609 = vmatmul.msk.f32.gmra.mxu3 %vm960_vm2, %v957_v49  ;;  %v4849_v49 = vld [vmem:[%s4537_s25 + $0x198] sm:$0xff] }
  0xf2   : > { %3585 = vmatmul.msk.f32.gmra.mxu0 %vm960_vm2, %v897_v58  ;;  %v1934_v58 = vrot.slane %v4844_v46, 1  ;;  %v1330_v2 = vsel %vm1322_vm3, %v1328_v44, %v1329_v47 }
  0xf7   : > { %3611 = vmatmul.msk.f32.vlgmr.msrb.gmra.mxu1 %vm960_vm2, %v4569_v34  ;;  %v1932_v34 = vsel %vm877_vm1, %v1929_v51, %v1931_v35  ;;  %v1331_v51 = vrot.slane %v4655_v13, 2  ;;  %v1333_v13 = vrot.slane %v4689_v39, 2  ;;  %v1334_v35 = vrot.slane %v4692_v40, 2 }
  0xf8   : > { %3645 = vmatmul.msk.f32.vlgmr.msrb.gmra.mxu2 %vm960_vm2, %v1325_v63  ;;  %v1936_v63 = vrot.slane %v3682_v48, 1  ;;  %v4900_v48 = vld [vmem:[%s4537_s25 + $0x1d0] sm:$0xff] }
  0xf9   : > { %3727 = vmatmul.msk.f32.vlgmr.msrb.gmra.mxu3 %vm960_vm2, %v4819_v41  ;;  %v1335_v44 = vsel %vm1322_vm3, %v1333_v13, %v1334_v35  ;;  %5952 = vst [vmem:[#allocation6_spill] sm:$0xff] %v4900_v48 }
  0xfa   : > { %3761 = vmatmul.msk.f32.vlgmr.msrb.gmra.mxu0 %vm960_vm2, %v1930_v7  ;;  %v1332_v7 = vsel %vm1322_vm3, %v1329_v47, %v1331_v51  ;;  %v1339_v51 = vrot.slane %v4768_v45, 2 }
  0xff   : > { %3612 = vmatmul.msk.f32.gmra.mxu1 %vm960_vm2, %v4576_v37  ;;  %v1933_v37 = vrot.slane %v4849_v49, 1 }
 0x100   : > { %3646 = vmatmul.msk.f32.gmra.mxu2 %vm960_vm2, %v1327_v38  ;;  %v4877_v38 = vld [vmem:[%s4537_s25 + $0x1b0] sm:$0xff] }
 0x101   : > { %3728 = vmatmul.msk.f32.gmra.mxu3 %vm960_vm2, %v4813_v0  ;;  %v1935_v3 = vsel %vm877_vm1, %v1933_v37, %v1934_v58  ;;  %v3685_v37 = vld [vmem:[%s4537_s25 + $0x1c0] sm:$0x3] }
 0x102   : > { %3762 = vmatmul.msk.f32.gmra.mxu0 %vm960_vm2, %v1932_v34  ;;  %v1939_v34 = vrot.slane %v4872_v14, 1 }
 0x107   : > { %3613 = vmatmul.msk.f32.gmra.mxu1 %vm960_vm2, %v4625_v61  ;;  %v1937_v61 = vsel %vm877_vm1, %v1934_v58, %v1936_v63  ;;  %v1336_v58 = vrot.slane %v4719_v1, 2  ;;  %v1338_v1 = vrot.slane %v4765_v43, 2  ;;  %v4905_v63 = vld [vmem:[%s4537_s25 + $0x1c8] sm:$0xff] }
 0x108   : > { %3647 = vmatmul.msk.f32.gmra.mxu2 %vm960_vm2, %v1330_v2  ;;  %v1941_v2 = vrot.slane %v3685_v37, 1  ;;  %5953 = vst [vmem:[#allocation7_spill] sm:$0xff] %v4905_v63  ;;  %v1344_v37 = vrot.slane %v4543_v22, 2 }
 0x109   : > { %3729 = vmatmul.msk.f32.gmra.mxu3 %vm960_vm2, %v4849_v49 }
 0x10a   : > { %3763 = vmatmul.msk.f32.gmra.mxu0 %vm960_vm2, %v1935_v3  ;;  %v1337_v3 = vsel %vm1322_vm3, %v1334_v35, %v1336_v58  ;;  %v3688_v35 = vld [vmem:[%s4537_s25 + $0x1d8] sm:$0x3]  ;;  %v4933_v58 = vld [vmem:[%s4537_s25 + $0x1e0] sm:$0xff] }
 0x10b   : > { %5955 = vst [vmem:[#allocation9_spill] sm:$0xff] %v4933_v58 }
 0x10f   : > { %3614 = vmatmul.msk.f32.gmra.mxu1 %vm960_vm2, %v4628_v62  ;;  %v1938_v62 = vrot.slane %v4877_v38, 1 }
 0x110   : > { %3648 = vmatmul.msk.f32.gmra.mxu2 %vm960_vm2, %v1332_v7  ;;  %v1944_v7 = vrot.slane %v4900_v48, 1 }
 0x111   : > { %3730 = vmatmul.msk.f32.gmra.mxu3 %vm960_vm2, %v4844_v46  ;;  %v1940_v47 = vsel %vm877_vm1, %v1938_v62, %v1939_v34  ;;  %v1341_v62 = vrot.slane %v4799_v12, 2  ;;  %v1343_v12 = vrot.slane %v4540_v21, 2 }
 0x112   : > { %3764 = vmatmul.msk.f32.gmra.mxu0 %vm960_vm2, %v1937_v61  ;;  %v1340_v61 = vsel %vm1322_vm3, %v1338_v1, %v1339_v51 }
 0x117   : > { %3615 = vmatmul.msk.f32.gmra.mxu1 %vm960_vm2, %v4689_v39  ;;  %v1942_v39 = vsel %vm877_vm1, %v1939_v34, %v1941_v2  ;;  %v1946_v34 = vrot.slane %v3688_v35, 1 }
 0x118   : > { %3649 = vmatmul.msk.f32.gmra.mxu2 %vm960_vm2, %v1335_v44  ;;  %v1342_v44 = vsel %vm1322_vm3, %v1339_v51, %v1341_v62 }
 0x119   : > { %3731 = vmatmul.msk.f32.gmra.mxu3 %vm960_vm2, %v4877_v38 }
 0x11a   : > { %3765 = vmatmul.msk.f32.gmra.mxu0 %vm960_vm2, %v1940_v47  ;;  %v4928_v47 = vld [vmem:[%s4537_s25 + $0x1e8] sm:$0xff] }
 0x11b   : > { %5954 = vst [vmem:[#allocation8_spill] sm:$0xff] %v4928_v47  ;;  %v1949_v2 = vrot.slane %v4928_v47, 1 }
 0x11f   : > { %3616 = vmatmul.msk.f32.gmra.mxu1 %vm960_vm2, %v4692_v40  ;;  %v1943_v40 = vrot.slane %v4905_v63, 1 }
 0x120   : > { %3650 = vmatmul.msk.f32.gmra.mxu2 %vm960_vm2, %v1337_v3 }
 0x121   : > { %3732 = vmatmul.msk.f32.gmra.mxu3 %vm960_vm2, %v4872_v14  ;;  %v1945_v13 = vsel %vm877_vm1, %v1943_v40, %v1944_v7  ;;  %v3691_v40 = vld [vmem:[%s4537_s25 + $0x1f0] sm:$0x3] }
 0x122   : > { %3766 = vmatmul.msk.f32.gmra.mxu0 %vm960_vm2, %v1942_v39  ;;  %v1345_v39 = vsel %vm1322_vm3, %v1343_v12, %v1344_v37  ;;  %v1349_v12 = vrot.slane %v4604_v53, 2 }
 0x127   : > { %3617 = vmatmul.msk.f32.gmra.mxu1 %vm960_vm2, %v4765_v43  ;;  %v1947_v43 = vsel %vm877_vm1, %v1944_v7, %v1946_v34  ;;  %v1346_v7 = vrot.slane %v4566_v33, 2  ;;  %v3693_v33 = vld [vmem:[%s4537_s25 + $0x200] sm:$0xff] }
 0x128   : > { %3651 = vmatmul.msk.f32.gmra.mxu2 %vm960_vm2, %v1340_v61 }
 0x129   : > { %3733 = vmatmul.msk.f32.gmra.mxu3 %vm960_vm2, %v4905_v63  ;;  %v1347_v62 = vsel %vm1322_vm3, %v1344_v37, %v1346_v7 }
 0x12a   : > { %3767 = vmatmul.msk.f32.gmra.mxu0 %vm960_vm2, %v1945_v13 }
 0x12f   : > { %3618 = vmatmul.msk.f32.gmra.mxu1 %vm960_vm2, %v4768_v45  ;;  %v1948_v45 = vrot.slane %v4933_v58, 1 }
 0x130   : > { %3652 = vmatmul.msk.f32.gmra.mxu2 %vm960_vm2, %v1342_v44 }
 0x131   : > { %3734 = vmatmul.msk.f32.gmra.mxu3 %vm960_vm2, %v4900_v48  ;;  %v1950_v51 = vsel %vm877_vm1, %v1948_v45, %v1949_v2  ;;  %v3692_v45 = vld [vmem:[%s4537_s25 + $0x1f8] sm:$0xff] }
 0x132   : > { %3768 = vmatmul.msk.f32.gmra.mxu0 %vm960_vm2, %v1947_v43  ;;  %v1348_v43 = vrot.slane %v4601_v52, 2 }
 0x134   : > { %v4938_v3 = vpop.f32.mrf.mxu1 }
 0x137   : > { %3619 = vmatmul.msk.f32.gmra.mxu1 %vm960_vm2, %v4540_v21  ;;  %v4943_v1 = vpop.f32.mrf.mxu0  ;;  %v1951_v21 = vrot.slane %v3691_v40, 1  ;;  %v1350_v40 = vsel %vm1322_vm3, %v1348_v43, %v1349_v12 }
 0x138   : > { %3653 = vmatmul.msk.f32.gmra.mxu2 %vm960_vm2, %v1345_v39  ;;  %v1953_v39 = vrot.slane %v3692_v45, 1 }
 0x139   : > { %3735 = vmatmul.msk.f32.gmra.mxu3 %vm960_vm2, %v4933_v58  ;;  %v1952_v44 = vsel %vm877_vm1, %v1949_v2, %v1951_v21  ;;  %v1954_v2 = vrot.slane %v3693_v33, 1 }
 0x13a   : > { %3769 = vmatmul.msk.f32.gmra.mxu0 %vm960_vm2, %v1950_v51 }
 0x13b   : > { %v4952_v61 = vpop.f32.mrf.mxu2  ;;  %v1955_v21 = vsel %vm877_vm1, %v1953_v39, %v1954_v2 }
 0x13c   : > { %5956 = vst [vmem:[#allocation10_spill] sm:$0xff] %v4952_v61  ;;  %v4954_v13 = vpop.f32.mrf.mxu3  ;;  %v4956_v35 = vpop.f32.mrf.mxu1 }
 0x13d   : > { %5957 = vst [vmem:[#allocation11_spill] sm:$0xff] %v4954_v13 }
 0x13f   : > { %3620 = vmatmul.msk.f32.gmra.mxu1 %vm960_vm2, %v4543_v22  ;;  %v4961_v34 = vpop.f32.mrf.mxu0 }
 0x140   : > { %3654 = vmatmul.msk.f32.gmra.mxu2 %vm960_vm2, %v1347_v62  ;;  %v3694_v62 = vld [vmem:[%s4537_s25 + $0x208] sm:$0x3] }
 0x141   : > { %3736 = vmatmul.msk.f32.gmra.mxu3 %vm960_vm2, %v4928_v47 }
 0x142   : > { %3770 = vmatmul.msk.f32.gmra.mxu0 %vm960_vm2, %v1952_v44  ;;  %v1351_v44 = vrot.slane %v4641_v8, 2  ;;  %v3696_v8 = vld [vmem:[%s4537_s25 + $0x218] sm:$0xff] }
 0x143   : > { %v4972_v37 = vpop.f32.mrf.mxu2  ;;  %v1959_v47 = vrot.slane %v3696_v8, 1 }
 0x144   : > { %5958 = vst [vmem:[#allocation12_spill] sm:$0xff] %v4972_v37  ;;  %v4974_v22 = vpop.f32.mrf.mxu3  ;;  %v4976_v51 = vpop.f32.mrf.mxu1  ;;  %v1352_v39 = vsel %vm1322_vm3, %v1349_v12, %v1351_v44 }
 0x145   : > { %5959 = vst [vmem:[#allocation13_spill] sm:$0xff] %v4974_v22 }
 0x147   : > { %3621 = vmatmul.msk.f32.gmra.mxu1 %vm960_vm2, %v4601_v52  ;;  %v4981_v7 = vpop.f32.mrf.mxu0  ;;  %v1956_v52 = vrot.slane %v3694_v62, 1  ;;  %v1354_v62 = vrot.slane %v4668_v24, 2 }
 0x148   : > { %3655 = vmatmul.msk.f32.gmra.mxu2 %vm960_vm2, %v1350_v40 }
 0x149   : > { %3737 = vmatmul.msk.f32.gmra.mxu3 %vm960_vm2, %v3692_v45  ;;  %v1957_v45 = vsel %vm877_vm1, %v1954_v2, %v1956_v52 }
 0x14a   : > { %3771 = vmatmul.msk.f32.gmra.mxu0 %vm960_vm2, %v1955_v21  ;;  %v1353_v21 = vrot.slane %v4665_v20, 2 }
 0x14b   : > { %v4989_v22 = vpop.f32.mrf.mxu2 }
 0x14c   : > { %5960 = vst [vmem:[#allocation14_spill] sm:$0xff] %v4989_v22  ;;  %v4991_v43 = vpop.f32.mrf.mxu3  ;;  %v4993_v13 = vpop.f32.mrf.mxu1  ;;  %v1355_v52 = vsel %vm1322_vm3, %v1353_v21, %v1354_v62 }
 0x14d   : > { %5961 = vst [vmem:[#allocation15_spill] sm:$0xff] %v4991_v43  ;;  %v3695_v43 = vld [vmem:[%s4537_s25 + $0x210] sm:$0xff] }
 0x14e   : > { %v1958_v44 = vrot.slane %v3695_v43, 1 }
 0x14f   : > { %3622 = vmatmul.msk.f32.gmra.mxu1 %vm960_vm2, %v4604_v53  ;;  %v4998_v40 = vpop.f32.mrf.mxu0 }
 0x150   : > { %3656 = vmatmul.msk.f32.gmra.mxu2 %vm960_vm2, %v1352_v39  ;;  %v1960_v39 = vsel %vm877_vm1, %v1958_v44, %v1959_v47 }
 0x151   : > { %3738 = vmatmul.msk.f32.gmra.mxu3 %vm960_vm2, %v3693_v33 }
 0x152   : > { %3772 = vmatmul.msk.f32.gmra.mxu0 %vm960_vm2, %v1957_v45  ;;  %v3697_v45 = vld [vmem:[%s4537_s25 + $0x220] sm:$0x3] }
 0x153   : > { %v5008_v12 = vpop.f32.mrf.mxu2 }
 0x154   : > { %5962 = vst [vmem:[#allocation16_spill] sm:$0xff] %v5008_v12  ;;  %v5010_v53 = vpop.f32.mrf.mxu3  ;;  %v5012_v2 = vpop.f32.mrf.mxu1 }
 0x155   : > { %5963 = vst [vmem:[#allocation17_spill] sm:$0xff] %v5010_v53  ;;  %v1356_v53 = vrot.slane %v4703_v50, 2  ;;  %v3699_v50 = vld [vmem:[%s4537_s25 + $0x230] sm:$0xff] }
 0x157   : > { %3623 = vmatmul.msk.f32.gmra.mxu1 %vm960_vm2, %v4665_v20  ;;  %v5017_v33 = vpop.f32.mrf.mxu0  ;;  %v1961_v20 = vrot.slane %v3697_v45, 1  ;;  %v1357_v44 = vsel %vm1322_vm3, %v1354_v62, %v1356_v53  ;;  %v1359_v45 = vrot.slane %v4744_v16, 2 }
 0x158   : > { %3657 = vmatmul.msk.f32.gmra.mxu2 %vm960_vm2, %v1355_v52 }
 0x159   : > { %3739 = vmatmul.msk.f32.gmra.mxu3 %vm960_vm2, %v3695_v43  ;;  %v1962_v43 = vsel %vm877_vm1, %v1959_v47, %v1961_v20 }
 0x15a   : > { %3773 = vmatmul.msk.f32.gmra.mxu0 %vm960_vm2, %v1960_v39  ;;  %v1358_v39 = vrot.slane %v4741_v15, 2 }
 0x15b   : > { %v5025_v58 = vpop.f32.mrf.mxu2 }
 0x15c   : > { %5964 = vst [vmem:[#allocation18_spill] sm:$0xff] %v5025_v58  ;;  %v5027_v21 = vpop.f32.mrf.mxu3  ;;  %v5029_v12 = vpop.f32.mrf.mxu1  ;;  %v1964_v58 = vrot.slane %v3699_v50, 1  ;;  %v1360_v20 = vsel %vm1322_vm3, %v1358_v39, %v1359_v45 }
 0x15d   : > { %5965 = vst [vmem:[#allocation19_spill] sm:$0xff] %v5027_v21  ;;  %v3698_v21 = vld [vmem:[%s4537_s25 + $0x228] sm:$0xff] }
 0x15e   : > { %v1963_v53 = vrot.slane %v3698_v21, 1 }
 0x15f   : > { %3624 = vmatmul.msk.f32.gmra.mxu1 %vm960_vm2, %v4668_v24  ;;  %v5034_v52 = vpop.f32.mrf.mxu0 }
 0x160   : > { %3658 = vmatmul.msk.f32.gmra.mxu2 %vm960_vm2, %v1357_v44  ;;  %v1965_v44 = vsel %vm877_vm1, %v1963_v53, %v1964_v58 }
 0x161   : > { %3740 = vmatmul.msk.f32.gmra.mxu3 %vm960_vm2, %v3696_v8 }
 0x162   : > { %3774 = vmatmul.msk.f32.gmra.mxu0 %vm960_vm2, %v1962_v43  ;;  %v3700_v43 = vld [vmem:[%s4537_s25 + $0x238] sm:$0x3] }
 0x163   : > { %v5044_v62 = vpop.f32.mrf.mxu2 }
 0x164   : > { %5966 = vst [vmem:[#allocation20_spill] sm:$0xff] %v5044_v62  ;;  %v5046_v24 = vpop.f32.mrf.mxu3  ;;  %v5048_v47 = vpop.f32.mrf.mxu1 }
 0x165   : > { %5967 = vst [vmem:[#allocation21_spill] sm:$0xff] %v5046_v24  ;;  %v1361_v24 = vrot.slane %v4785_v4, 2  ;;  %v3702_v4 = vld [vmem:[%s4537_s25 + $0x248] sm:$0xff] }
 0x167   : > { %3625 = vmatmul.msk.f32.gmra.mxu1 %vm960_vm2, %v4741_v15  ;;  %v5053_v8 = vpop.f32.mrf.mxu0  ;;  %v1966_v15 = vrot.slane %v3700_v43, 1  ;;  %v1362_v53 = vsel %vm1322_vm3, %v1359_v45, %v1361_v24  ;;  %v1364_v43 = vrot.slane %v4552_v26, 2 }
 0x168   : > { %3659 = vmatmul.msk.f32.gmra.mxu2 %vm960_vm2, %v1360_v20 }
 0x169   : > { %3741 = vmatmul.msk.f32.gmra.mxu3 %vm960_vm2, %v3698_v21  ;;  %v1967_v21 = vsel %vm877_vm1, %v1964_v58, %v1966_v15 }
 0x16a   : > { %3775 = vmatmul.msk.f32.gmra.mxu0 %vm960_vm2, %v1965_v44  ;;  %v1363_v44 = vrot.slane %v4546_v23, 2 }
 0x16b   : > { %v5061_v62 = vpop.f32.mrf.mxu2 }
 0x16c   : > { %5968 = vst [vmem:[#allocation22_spill] sm:$0xff] %v5061_v62  ;;  %v5063_v39 = vpop.f32.mrf.mxu3  ;;  %v5065_v22 = vpop.f32.mrf.mxu1  ;;  %v1969_v62 = vrot.slane %v3702_v4, 1  ;;  %v1365_v15 = vsel %vm1322_vm3, %v1363_v44, %v1364_v43 }
 0x16d   : > { %5969 = vst [vmem:[#allocation23_spill] sm:$0xff] %v5063_v39  ;;  %v3701_v39 = vld [vmem:[%s4537_s25 + $0x240] sm:$0xff] }
 0x16e   : > { %v1968_v24 = vrot.slane %v3701_v39, 1 }
 0x16f   : > { %3626 = vmatmul.msk.f32.gmra.mxu1 %vm960_vm2, %v4744_v16  ;;  %v5070_v20 = vpop.f32.mrf.mxu0 }
 0x170   : > { %3660 = vmatmul.msk.f32.gmra.mxu2 %vm960_vm2, %v1362_v53  ;;  %v1970_v53 = vsel %vm877_vm1, %v1968_v24, %v1969_v62 }
 0x171   : > { %3742 = vmatmul.msk.f32.gmra.mxu3 %vm960_vm2, %v3699_v50 }
 0x172   : > { %3776 = vmatmul.msk.f32.gmra.mxu0 %vm960_vm2, %v1967_v21  ;;  %v3703_v21 = vld [vmem:[%s4537_s25 + $0x250] sm:$0x3] }
 0x173   : > { %v5080_v45 = vpop.f32.mrf.mxu2  ;;  %v1971_v63 = vrot.slane %v3703_v21, 1 }
 0x174   : > { %5970 = vst [vmem:[#allocation24_spill] sm:$0xff] %v5080_v45  ;;  %v5082_v16 = vpop.f32.mrf.mxu3  ;;  %v1226_v58 = vpop.f32.mrf.mxu1  ;;  %v1366_v45 = vrot.slane %v4573_v36, 2 }
 0x175   : > { %5971 = vst [vmem:[#allocation25_spill] sm:$0xff] %v5082_v16  ;;  %v1227_v16 = vadd.f32 %v1226_v58, %v4943_v1  ;;  %v1972_v36 = vsel %vm877_vm1, %v1969_v62, %v1971_v63  ;;  %v3705_v1 = vld [vmem:[%s4537_s25 + $0x260] sm:$0xff]  ;;  %v1368_v58 = vrot.slane %v4607_v54, 2 }
 0x176   : > { %v1367_v24 = vsel %vm1322_vm3, %v1364_v43, %v1366_v45  ;;  %v3704_v45 = vld [vmem:[%s4537_s25 + $0x258] sm:$0xff] }
 0x177   : > { %3627 = vmatmul.msk.f32.gmra.mxu1 %vm960_vm2, %v4546_v23  ;;  %v2094_v50 = vpop.f32.mrf.mxu0  ;;  %v1973_v63 = vrot.slane %v3704_v45, 1 }
 0x178   : > { %3661 = vmatmul.msk.f32.gmra.mxu2 %vm960_vm2, %v1365_v15 }
 0x179   : > { %3743 = vmatmul.msk.f32.gmra.mxu3 %vm960_vm2, %v3701_v39 }
 0x17a   : > { %3777 = vmatmul.msk.f32.gmra.mxu0 %vm960_vm2, %v1970_v53 }
 0x17b   : > { %v1489_v48 = vpop.f32.mrf.mxu2 }
 0x17c   : > { %v1784_v44 = vpop.f32.mrf.mxu3  ;;  %v1585_v23 = vadd.f32 %v1489_v48, %v1227_v16  ;;  %v1229_v37 = vpop.f32.mrf.mxu1  ;;  %v1369_v48 = vrot.slane %v4610_v55, 2 }
 0x17d   : > { %v1230_v43 = vadd.f32 %v1229_v37, %v4961_v34  ;;  %v3706_v37 = vld [vmem:[%s4537_s25 + $0x268] sm:$0x3] }
 0x17e   : > { %v1880_v61 = vadd.f32 %v1784_v44, %v1585_v23  ;;  %v1370_v53 = vsel %vm1322_vm3, %v1368_v58, %v1369_v48  ;;  %v1371_v23 = vrot.slane %v4644_v9, 2 }
 0x17f   : > { %3628 = vmatmul.msk.f32.gmra.mxu1 %vm960_vm2, %v4552_v26  ;;  %v2097_v39 = vpop.f32.mrf.mxu0 }
 0x180   : > { %v5098_v15 = vadd.f32 %v2094_v50, %v1880_v61  ;;  %3662 = vmatmul.msk.f32.gmra.mxu2 %vm960_vm2, %v1367_v24  ;;  %v1974_v61 = vrot.slane %v3705_v1, 1 }
 0x181   : > { %3744 = vmatmul.msk.f32.gmra.mxu3 %vm960_vm2, %v3702_v4 }
 0x182   : > { %3778 = vmatmul.msk.f32.gmra.mxu0 %vm960_vm2, %v1972_v36  ;;  %v1975_v44 = vsel %vm877_vm1, %v1973_v63, %v1974_v61 }
 0x183   : > { %v1492_v26 = vpop.f32.mrf.mxu2 }
 0x184   : > { %v1787_v16 = vpop.f32.mrf.mxu3  ;;  %v1586_v62 = vadd.f32 %v1492_v26, %v1230_v43  ;;  %v1232_v50 = vpop.f32.mrf.mxu1 }
 0x185   : > { %v1233_v24 = vadd.f32 %v1232_v50, %v4981_v7  ;;  %v3708_v7 = vld [vmem:[%s4537_s25 + $0x278] sm:$0xff]  ;;  %v1374_v50 = vrot.slane %v4674_v27, 2 }
 0x186   : > { %v1881_v4 = vadd.f32 %v1787_v16, %v1586_v62  ;;  %v1373_v62 = vrot.slane %v4671_v25, 2 }
 0x187   : > { %3629 = vmatmul.msk.f32.gmra.mxu1 %vm960_vm2, %v4607_v54  ;;  %v2100_v21 = vpop.f32.mrf.mxu0  ;;  %v1976_v54 = vrot.slane %v3706_v37, 1 }
 0x188   : > { %v5112_v34 = vadd.f32 %v2097_v39, %v1881_v4  ;;  %3663 = vmatmul.msk.f32.gmra.mxu2 %vm960_vm2, %v1370_v53  ;;  %v1372_v39 = vsel %vm1322_vm3, %v1369_v48, %v1371_v23  ;;  %v3707_v53 = vld [vmem:[%s4537_s25 + $0x270] sm:$0xff]  ;;  %v1375_v23 = vsel %vm1322_vm3, %v1373_v62, %v1374_v50 }
 0x189   : > { %3745 = vmatmul.msk.f32.gmra.mxu3 %vm960_vm2, %v3704_v45  ;;  %v1977_v9 = vsel %vm877_vm1, %v1974_v61, %v1976_v54  ;;  %v1978_v61 = vrot.slane %v3707_v53, 1  ;;  %v1376_v54 = vrot.slane %v4708_v59, 2 }
 0x18a   : > { %3779 = vmatmul.msk.f32.gmra.mxu0 %vm960_vm2, %v1975_v44 }
 0x18b   : > { %v1495_v36 = vpop.f32.mrf.mxu2 }
 0x18c   : > { %v1790_v58 = vpop.f32.mrf.mxu3  ;;  %v1587_v43 = vadd.f32 %v1495_v36, %v1233_v24  ;;  %v1235_v26 = vpop.f32.mrf.mxu1 }
 0x18d   : > { %v1236_v48 = vadd.f32 %v1235_v26, %v4998_v40 }
 0x18e   : > { %v1882_v16 = vadd.f32 %v1790_v58, %v1587_v43  ;;  %v3709_v58 = vld [vmem:[%s4537_s25 + $0x280] sm:$0x3] }
 0x18f   : > { %3630 = vmatmul.msk.f32.gmra.mxu1 %vm960_vm2, %v4610_v55  ;;  %v2103_v45 = vpop.f32.mrf.mxu0 }
 0x190   : > { %v5124_v63 = vadd.f32 %v2100_v21, %v1882_v16  ;;  %3664 = vmatmul.msk.f32.gmra.mxu2 %vm960_vm2, %v1372_v39  ;;  %v1979_v21 = vrot.slane %v3708_v7, 1 }
 0x191   : > { %3746 = vmatmul.msk.f32.gmra.mxu3 %vm960_vm2, %v3705_v1 }
 0x192   : > { %3780 = vmatmul.msk.f32.gmra.mxu0 %vm960_vm2, %v1977_v9  ;;  %v1980_v36 = vsel %vm877_vm1, %v1978_v61, %v1979_v21  ;;  %v3710_v61 = vld [vmem:[%s4537_s25 + $0x288] sm:$0xff] }
 0x193   : > { %v1498_v55 = vpop.f32.mrf.mxu2 }
 0x194   : > { %v1793_v4 = vpop.f32.mrf.mxu3  ;;  %v1588_v44 = vadd.f32 %v1498_v55, %v1236_v48  ;;  %v1238_v37 = vpop.f32.mrf.mxu1  ;;  %v1378_v55 = vrot.slane %v4747_v17, 2 }
 0x195   : > { %v1239_v43 = vadd.f32 %v1238_v37, %v5017_v33  ;;  %v3711_v33 = vld [vmem:[%s4537_s25 + $0x290] sm:$0xff] }
 0x196   : > { %v1883_v1 = vadd.f32 %v1793_v4, %v1588_v44  ;;  %v1379_v4 = vrot.slane %v4750_v18, 2  ;;  %v1984_v37 = vrot.slane %v3711_v33, 1 }
 0x197   : > { %3631 = vmatmul.msk.f32.gmra.mxu1 %vm960_vm2, %v4671_v25  ;;  %v2106_v24 = vpop.f32.mrf.mxu0  ;;  %v1981_v25 = vrot.slane %v3709_v58, 1 }
 0x198   : > { %v5138_v40 = vadd.f32 %v2103_v45, %v1883_v1  ;;  %3665 = vmatmul.msk.f32.gmra.mxu2 %vm960_vm2, %v1375_v23  ;;  %v1377_v45 = vsel %vm1322_vm3, %v1374_v50, %v1376_v54  ;;  %v3712_v54 = vld [vmem:[%s4537_s25 + $0x298] sm:$0x3] }
 0x199   : > { %3747 = vmatmul.msk.f32.gmra.mxu3 %vm960_vm2, %v3707_v53  ;;  %v1982_v59 = vsel %vm877_vm1, %v1979_v21, %v1981_v25  ;;  %v1983_v21 = vrot.slane %v3710_v61, 1 }
 0x19a   : > { %3781 = vmatmul.msk.f32.gmra.mxu0 %vm960_vm2, %v1980_v36 }
 0x19b   : > { %v1501_v26 = vpop.f32.mrf.mxu2  ;;  %v1985_v58 = vsel %vm877_vm1, %v1983_v21, %v1984_v37 }
 0x19c   : > { %v1796_v39 = vpop.f32.mrf.mxu3  ;;  %v1589_v16 = vadd.f32 %v1501_v26, %v1239_v43  ;;  %v1241_v9 = vpop.f32.mrf.mxu1  ;;  %v1381_v43 = vrot.slane %v4788_v5, 2 }
 0x19d   : > { %v1242_v50 = vadd.f32 %v1241_v9, %v5034_v52 }
 0x19e   : > { %v1884_v62 = vadd.f32 %v1796_v39, %v1589_v16 }
 0x19f   : > { %3632 = vmatmul.msk.f32.gmra.mxu1 %vm960_vm2, %v4674_v27  ;;  %v2109_v48 = vpop.f32.mrf.mxu0 }
 0x1a0   : > { %v5150_v53 = vadd.f32 %v2106_v24, %v1884_v62  ;;  %3666 = vmatmul.msk.f32.gmra.mxu2 %vm960_vm2, %v1377_v45  ;;  %v1380_v24 = vsel %vm1322_vm3, %v1378_v55, %v1379_v4  ;;  %v1382_v45 = vsel %vm1322_vm3, %v1379_v4, %v1381_v43  ;;  %v1383_v55 = vrot.slane %v4556_v28, 2 }
 0x1a1   : > { %3748 = vmatmul.msk.f32.gmra.mxu3 %vm960_vm2, %v3708_v7 }
 0x1a2   : > { %3782 = vmatmul.msk.f32.gmra.mxu0 %vm960_vm2, %v1982_v59 }
 0x1a3   : > { %v1504_v27 = vpop.f32.mrf.mxu2 }
 0x1a4   : > { %v1799_v44 = vpop.f32.mrf.mxu3  ;;  %v1590_v23 = vadd.f32 %v1504_v27, %v1242_v50  ;;  %v1244_v1 = vpop.f32.mrf.mxu1  ;;  %v1384_v50 = vrot.slane %v4559_v29, 2 }
 0x1a5   : > { %v1245_v26 = vadd.f32 %v1244_v1, %v5053_v8  ;;  %v3714_v8 = vld [vmem:[%s4537_s25 + $0x2a8] sm:$0xff] }
 0x1a6   : > { %v1885_v7 = vadd.f32 %v1799_v44, %v1590_v23  ;;  %v1989_v21 = vrot.slane %v3714_v8, 1  ;;  %v1385_v1 = vsel %vm1322_vm3, %v1383_v55, %v1384_v50 }
 0x1a7   : > { %3633 = vmatmul.msk.f32.gmra.mxu1 %vm960_vm2, %v4747_v17  ;;  %v2112_v36 = vpop.f32.mrf.mxu0  ;;  %v1986_v17 = vrot.slane %v3712_v54, 1 }
 0x1a8   : > { %v5164_v52 = vadd.f32 %v2109_v48, %v1885_v7  ;;  %3667 = vmatmul.msk.f32.gmra.mxu2 %vm960_vm2, %v1380_v24  ;;  %v4033_v24 = vld [vmem:[%s4537_s25 + $0x120] sm:$0xff]  ;;  %v3715_v7 = vld [vmem:[%s4537_s25 + $0x2b0] sm:$0x3] }
 0x1a9   : > { %3749 = vmatmul.msk.f32.gmra.mxu3 %vm960_vm2, %v3710_v61  ;;  %v1987_v5 = vsel %vm877_vm1, %v1984_v37, %v1986_v17  ;;  %v3713_v61 = vld [vmem:[%s4537_s25 + $0x2a0] sm:$0xff] }
 0x1aa   : > { %3783 = vmatmul.msk.f32.gmra.mxu0 %vm960_vm2, %v1985_v58  ;;  %v1988_v44 = vrot.slane %v3713_v61, 1 }
 0x1ab   : > { %v1507_v39 = vpop.f32.mrf.mxu2 }
 0x1ac   : > { %v1802_v25 = vpop.f32.mrf.mxu3  ;;  %v1591_v16 = vadd.f32 %v1507_v39, %v1245_v26  ;;  %v1247_v9 = vpop.f32.mrf.mxu1  ;;  %v1990_v29 = vsel %vm877_vm1, %v1988_v44, %v1989_v21  ;;  %v1991_v26 = vrot.slane %v3715_v7, 1 }
 0x1ad   : > { %v1248_v4 = vadd.f32 %v1247_v9, %v5070_v20  ;;  %v4034_v9 = vld [vmem:[%s4537_s25 + $0x128] sm:$0xff] }
 0x1ae   : > { %v1886_v62 = vadd.f32 %v1802_v25, %v1591_v16 }
 0x1af   : > { %3634 = vmatmul.msk.f32.gmra.mxu1 %vm960_vm2, %v4750_v18  ;;  %v2115_v48 = vpop.f32.mrf.mxu0 }
 0x1b0   : > { %v5176_v59 = vadd.f32 %v2112_v36, %v1886_v62  ;;  %3668 = vmatmul.msk.f32.gmra.mxu2 %vm960_vm2, %v1382_v45  ;;  %v1386_v36 = vrot.slane %v4584_v42, 2  ;;  %v1992_v42 = vsel %vm877_vm1, %v1989_v21, %v1991_v26  ;;  %v4036_v26 = vld [vmem:[%s4537_s25 + $0x140] sm:$0xff] }
 0x1b1   : > { %3750 = vmatmul.msk.f32.gmra.mxu3 %vm960_vm2, %v3711_v33 }
 0x1b2   : > { %3784 = vmatmul.msk.f32.gmra.mxu0 %vm960_vm2, %v1987_v5  ;;  %v1387_v17 = vsel %vm1322_vm3, %v1384_v50, %v1386_v36  ;;  %v1389_v5 = vrot.slane %v4616_v57, 2  ;;  %v3716_v50 = vld [vmem:[%s4537_s25 + $0x2b8] sm:$0xff] }
 0x1b3   : > { %v1510_v18 = vpop.f32.mrf.mxu2 }
 0x1b4   : > { %v1805_v27 = vpop.f32.mrf.mxu3  ;;  %v1592_v37 = vadd.f32 %v1510_v18, %v1248_v4  ;;  %v1250_v23 = vpop.f32.mrf.mxu1  ;;  %v1993_v18 = vrot.slane %v3716_v50, 1 }
 0x1b5   : > { %v1251_v58 = vadd.f32 %v1250_v23, %v4938_v3  ;;  %v3717_v3 = vld [vmem:[%s4537_s25 + $0x2c0] sm:$0xff]  ;;  %v4035_v23 = vld [vmem:[%s4537_s25 + $0x138] sm:$0xff] }
 0x1b6   : > { %v1887_v33 = vadd.f32 %v1805_v27, %v1592_v37  ;;  %v1994_v27 = vrot.slane %v3717_v3, 1 }
 0x1b7   : > { %3635 = vmatmul.msk.f32.gmra.mxu1 %vm960_vm2, %v4033_v24  ;;  %v2118_v28 = vpop.f32.mrf.mxu0 }
 0x1b8   : > { %v5190_v20 = vadd.f32 %v2115_v48, %v1887_v33  ;;  %3669 = vmatmul.msk.f32.gmra.mxu2 %vm960_vm2, %v1385_v1  ;;  %v1388_v48 = vrot.slane %v4613_v56, 2  ;;  %v1995_v57 = vsel %vm877_vm1, %v1993_v18, %v1994_v27  ;;  %v3718_v1 = vld [vmem:[%s4537_s25 + $0x2c8] sm:$0x3]  ;;  %v1391_v33 = vrot.slane %v4647_v10, 2 }
 0x1b9   : > { %3751 = vmatmul.msk.f32.gmra.mxu3 %vm960_vm2, %v3713_v61  ;;  %v1996_v7 = vrot.slane %v3718_v1, 1 }
 0x1ba   : > { %3785 = vmatmul.msk.f32.gmra.mxu0 %vm960_vm2, %v1990_v29  ;;  %v1390_v37 = vsel %vm1322_vm3, %v1388_v48, %v1389_v5  ;;  %v2223_v48 = vrot.slane %v4813_v0, 2 }
 0x1bb   : > { %v1513_v54 = vpop.f32.mrf.mxu2  ;;  %v1997_v10 = vsel %vm877_vm1, %v1994_v27, %v1996_v7 }
 0x1bc   : > { %v1808_v43 = vpop.f32.mrf.mxu3  ;;  %v1593_v39 = vadd.f32 %v1513_v54, %v1251_v58  ;;  %v1253_v25 = vpop.f32.mrf.mxu1  ;;  %v1392_v54 = vsel %vm1322_vm3, %v1389_v5, %v1391_v33 }
 0x1bd   : > { %v1254_v55 = vadd.f32 %v1253_v25, %v4956_v35 }
 0x1be   : > { %v1888_v16 = vadd.f32 %v1808_v43, %v1593_v39 }
 0x1bf   : > { %3636 = vmatmul.msk.f32.gmra.mxu1 %vm960_vm2, %v4034_v9  ;;  %v2121_v45 = vpop.f32.mrf.mxu0 }
 0x1c0   : > { %v5202_v62 = vadd.f32 %v2118_v28, %v1888_v16  ;;  %3670 = vmatmul.msk.f32.gmra.mxu2 %vm960_vm2, %v1387_v17  ;;  %v1393_v17 = vrot.slane %v4677_v30, 2  ;;  %v1394_v16 = vrot.slane %v4680_v31, 2  ;;  %v4037_v31 = vld [vmem:[%s4537_s25 + $0x150] sm:$0xff] }
 0x1c1   : > { %3752 = vmatmul.msk.f32.gmra.mxu3 %vm960_vm2, %v3714_v8 }
 0x1c2   : > { %3786 = vmatmul.msk.f32.gmra.mxu0 %vm960_vm2, %v1992_v42  ;;  %v2222_v42 = vrot.slane %v4819_v41, 2  ;;  %v1395_v30 = vsel %vm1322_vm3, %v1393_v17, %v1394_v16 }
 0x1c3   : > { %v1516_v4 = vpop.f32.mrf.mxu2 }
 0x1c4   : > { %v1811_v61 = vpop.f32.mrf.mxu3  ;;  %v1594_v44 = vadd.f32 %v1516_v4, %v1254_v55  ;;  %v1256_v21 = vpop.f32.mrf.mxu1  ;;  %v5247_v41 = vsel %vm1322_vm3, %v2222_v42, %v2223_v48 }
 0x1c5   : > { %v1257_v24 = vadd.f32 %v1256_v21, %v4976_v51  ;;  %v3720_v51 = vld [vmem:[%s4537_s25 + $0x2d8] sm:$0xff]  ;;  %v3721_v21 = vld [vmem:[%s4537_s25 + $0x2e0] sm:$0x3] }
 0x1c6   : > { %v1889_v8 = vadd.f32 %v1811_v61, %v1594_v44 }
 0x1c7   : > { %3637 = vmatmul.msk.f32.gmra.mxu1 %vm960_vm2, %v4035_v23  ;;  %v2124_v56 = vpop.f32.mrf.mxu0 }
 0x1c8   : > { %v5216_v35 = vadd.f32 %v2121_v45, %v1889_v8  ;;  %3671 = vmatmul.msk.f32.gmra.mxu2 %vm960_vm2, %v1390_v37  ;;  %v3719_v45 = vld [vmem:[%s4537_s25 + $0x2d0] sm:$0xff]  ;;  %v1396_v37 = vrot.slane %v4711_v60, 2 }
 0x1c9   : > { %3753 = vmatmul.msk.f32.gmra.mxu3 %vm960_vm2, %v3716_v50  ;;  %v1998_v50 = vrot.slane %v3719_v45, 1 }
 0x1ca   : > { %3787 = vmatmul.msk.f32.gmra.mxu0 %vm960_vm2, %v1995_v57  ;;  %v2001_v57 = vrot.slane %v3721_v21, 1 }
 0x1cb   : > { %v1519_v28 = vpop.f32.mrf.mxu2 }
 0x1cc   : > { %v1814_v29 = vpop.f32.mrf.mxu3  ;;  %v1595_v36 = vadd.f32 %v1519_v28, %v1257_v24  ;;  %v1259_v58 = vpop.f32.mrf.mxu1  ;;  %v1397_v24 = vsel %vm1322_vm3, %v1394_v16, %v1396_v37 }
 0x1cd   : > { %v1260_v9 = vadd.f32 %v1259_v58, %v4993_v13  ;;  %v1398_v58 = vrot.slane %v4753_v19, 2 }
 0x1ce   : > { %v1890_v43 = vadd.f32 %v1814_v29, %v1595_v36  ;;  %v4038_v29 = vld [vmem:[%s4537_s25 + $0x158] sm:$0xff] }
 0x1cf   : > { %3638 = vmatmul.msk.f32.gmra.mxu1 %vm960_vm2, %v4036_v26  ;;  %v2127_v39 = vpop.f32.mrf.mxu0  ;;  %v3722_v26 = vld [vmem:[%s4537_s25 + $0x2e8] sm:$0xff] }
 0x1d0   : > { %v5228_v25 = vadd.f32 %v2124_v56, %v1890_v43  ;;  %3672 = vmatmul.msk.f32.gmra.mxu2 %vm960_vm2, %v1392_v54  ;;  %v1399_v54 = vrot.slane %v4756_v32, 2  ;;  %v4039_v32 = vld [vmem:[%s4537_s25 + $0x168] sm:$0xff] }
 0x1d1   : > { %3754 = vmatmul.msk.f32.gmra.mxu3 %vm960_vm2, %v3717_v3  ;;  %v1999_v3 = vrot.slane %v3720_v51, 1 }
 0x1d2   : > { %3788 = vmatmul.msk.f32.gmra.mxu0 %vm960_vm2, %v1997_v10  ;;  %v2228_v10 = vrot.slane %v4844_v46, 2  ;;  %v1400_v19 = vsel %vm1322_vm3, %v1398_v58, %v1399_v54 }
 0x1d3   : > { %v1522_v5 = vpop.f32.mrf.mxu2  ;;  %v2000_v27 = vsel %vm877_vm1, %v1998_v50, %v1999_v3  ;;  %v2002_v60 = vsel %vm877_vm1, %v1999_v3, %v2001_v57  ;;  %v3724_v3 = vld [vmem:[%s4537_s25 + $0x2f8] sm:$0x3] }
 0x1d4   : > { %v1817_v55 = vpop.f32.mrf.mxu3  ;;  %v1596_v4 = vadd.f32 %v1522_v5, %v1260_v9  ;;  %v1262_v61 = vpop.f32.mrf.mxu1  ;;  %v2003_v9 = vrot.slane %v3722_v26, 1 }
 0x1d5   : > { %v1263_v8 = vadd.f32 %v1262_v61, %v5012_v2  ;;  %v3723_v2 = vld [vmem:[%s4537_s25 + $0x2f0] sm:$0xff] }
 0x1d6   : > { %v1891_v18 = vadd.f32 %v1817_v55, %v1596_v4  ;;  %v1401_v4 = vrot.slane %v4791_v6, 2 }
 0x1d7   : > { %3639 = vmatmul.msk.f32.gmra.mxu1 %vm960_vm2, %v4037_v31  ;;  %v2130_v13 = vpop.f32.mrf.mxu0  ;;  %v2006_v31 = vrot.slane %v3724_v3, 1 }
 0x1d8   : > { %v5249_v44 = vadd.f32 %v2127_v39, %v1891_v18  ;;  %3673 = vmatmul.msk.f32.gmra.mxu2 %vm960_vm2, %v1395_v30  ;;  %v2227_v39 = vrot.slane %v4849_v49, 2  ;;  %v1402_v21 = vsel %vm1322_vm3, %v1399_v54, %v1401_v4 }
 0x1d9   : > { %3755 = vmatmul.msk.f32.gmra.mxu3 %vm960_vm2, %v3719_v45 }
 0x1da   : > { %3789 = vmatmul.msk.f32.gmra.mxu0 %vm960_vm2, %v2000_v27  ;;  %v5280_v49 = vsel %vm1322_vm3, %v2227_v39, %v2228_v10 }
 0x1db   : > { %v1525_v23 = vpop.f32.mrf.mxu2 }
 0x1dc   : > { %v1820_v56 = vpop.f32.mrf.mxu3  ;;  %v1597_v1 = vadd.f32 %v1525_v23, %v1263_v8  ;;  %v1265_v33 = vpop.f32.mrf.mxu1  ;;  %v3827_v8 = vld [vmem:[%s4537_s25 + $0x300] sm:$0xff]  ;;  %v3828_v23 = vld [vmem:[%s4537_s25 + $0x308] sm:$0xff] }
 0x1dd   : > { %v1266_v43 = vadd.f32 %v1265_v33, %v5029_v12  ;;  %v2828_v33 = vrot.slane %v3828_v23, 1  ;;  %v3121_v58 = vrot.slane %v3827_v8, 2  ;;  %v3122_v54 = vrot.slane %v3828_v23, 2 }
 0x1de   : > { %v1892_v28 = vadd.f32 %v1820_v56, %v1597_v1  ;;  %v4040_v56 = vld [vmem:[%s4537_s25 + $0x170] sm:$0xff] }
 0x1df   : > { %3640 = vmatmul.msk.f32.gmra.mxu1 %vm960_vm2, %v4038_v29  ;;  %v2133_v7 = vpop.f32.mrf.mxu0  ;;  %v2233_v29 = vrot.slane %v4872_v14, 2 }
 0x1e0   : > { %v5261_v36 = vadd.f32 %v2130_v13, %v1892_v28  ;;  %3674 = vmatmul.msk.f32.gmra.mxu2 %vm960_vm2, %v1397_v24  ;;  %v2232_v28 = vrot.slane %v4877_v38, 2 }
 0x1e1   : > { %3756 = vmatmul.msk.f32.gmra.mxu3 %vm960_vm2, %v3720_v51  ;;  %v2004_v51 = vrot.slane %v3723_v2, 1 }
 0x1e2   : > { %3790 = vmatmul.msk.f32.gmra.mxu0 %vm960_vm2, %v2002_v60  ;;  %v5312_v38 = vsel %vm1322_vm3, %v2232_v28, %v2233_v29 }
 0x1e3   : > { %v1528_v17 = vpop.f32.mrf.mxu2  ;;  %v2005_v55 = vsel %vm877_vm1, %v2003_v9, %v2004_v51  ;;  %v2007_v6 = vsel %vm877_vm1, %v2004_v51, %v2006_v31  ;;  %v2225_v51 = vrot.slane %v4831_v11, 2 }
 0x1e4   : > { %v1823_v16 = vpop.f32.mrf.mxu3  ;;  %v1598_v45 = vadd.f32 %v1528_v17, %v1266_v43  ;;  %v1268_v42 = vpop.f32.mrf.mxu1 }
 0x1e5   : > { %v1269_v61 = vadd.f32 %v1268_v42, %v5048_v47  ;;  %v2827_v47 = vrot.slane %v3827_v8, 1  ;;  %v2226_v3 = vsel %vm1322_vm3, %v2223_v48, %v2225_v51  ;;  %v5973_v48 = vld [vmem:[#allocation12_spill] sm:$0xff] }
 0x1e6   : > { %v1893_v5 = vadd.f32 %v1823_v16, %v1598_v45  ;;  %v3123_v16 = vsel %vm1322_vm3, %v3121_v58, %v3122_v54  ;;  %v3832_v58 = vld [vmem:[%s4537_s25 + $0x328] sm:$0x3] }
 0x1e7   : > { %3641 = vmatmul.msk.f32.gmra.mxu1 %vm960_vm2, %v4039_v32  ;;  %v2136_v12 = vpop.f32.mrf.mxu0  ;;  %v2829_v39 = vsel %vm877_vm1, %v2827_v47, %v2828_v33 }
 0x1e8   : > { %v5282_v50 = vadd.f32 %v2133_v7, %v1893_v5  ;;  %3675 = vmatmul.msk.f32.gmra.mxu2 %vm960_vm2, %v1400_v19 }
 0x1e9   : > { %3757 = vmatmul.msk.f32.gmra.mxu3 %vm960_vm2, %v3722_v26 }
 0x1ea   : > { %3791 = vmatmul.msk.f32.gmra.mxu0 %vm960_vm2, %v2005_v55 }
 0x1eb   : > { %v1531_v30 = vpop.f32.mrf.mxu2 }
 0x1ec   : > { %v1826_v18 = vpop.f32.mrf.mxu3  ;;  %v1599_v13 = vadd.f32 %v1531_v30, %v1269_v61  ;;  %v1271_v27 = vpop.f32.mrf.mxu1  ;;  %v3830_v30 = vld [vmem:[%s4537_s25 + $0x318] sm:$0xff] }
 0x1ed   : > { %v1272_v24 = vadd.f32 %v1271_v27, %v5065_v22  ;;  %v2832_v0 = vrot.slane %v3830_v30, 1 }
 0x1ee   : > { %v1894_v37 = vadd.f32 %v1826_v18, %v1599_v13  ;;  %v3831_v18 = vld [vmem:[%s4537_s25 + $0x320] sm:$0xff] }
 0x1ef   : > { %3642 = vmatmul.msk.f32.gmra.mxu1 %vm960_vm2, %v4040_v56  ;;  %v2139_v57 = vpop.f32.mrf.mxu0  ;;  %v2833_v27 = vrot.slane %v3831_v18, 1  ;;  %v5975_v56 = vld [vmem:[#allocation6_spill] sm:$0xff] }
 0x1f0   : > { %v5296_v1 = vadd.f32 %v2136_v12, %v1894_v37  ;;  %3676 = vmatmul.msk.f32.gmra.mxu2 %vm960_vm2, %v1402_v21  ;;  %v5974_v37 = vld [vmem:[#allocation7_spill] sm:$0xff] }
 0x1f1   : > { %3758 = vmatmul.msk.f32.gmra.mxu3 %vm960_vm2, %v3723_v2  ;;  %v3829_v2 = vld [vmem:[%s4537_s25 + $0x310] sm:$0x3] }
 0x1f2   : > { %3792 = vmatmul.msk.f32.gmra.mxu0 %vm960_vm2, %v2007_v6  ;;  %v2830_v45 = vrot.slane %v3829_v2, 1  ;;  %v3124_v32 = vrot.slane %v3829_v2, 2 }
 0x1f3   : > { %v1534_v7 = vpop.f32.mrf.mxu2 }
 0x1f4   : > { %v1829_v60 = vpop.f32.mrf.mxu3  ;;  %v1600_v43 = vadd.f32 %v1534_v7, %v1272_v24  ;;  %v1274_v26 = vpop.f32.mrf.mxu1  ;;  %v2831_v4 = vsel %vm877_vm1, %v2828_v33, %v2830_v45  ;;  %v3125_v31 = vsel %vm1322_vm3, %v3122_v54, %v3124_v32  ;;  %v3126_v33 = vrot.slane %v3830_v30, 2 }
 0x1f5   : > { %v3127_v24 = vrot.slane %v3831_v18, 2  ;;  %v2834_v7 = vsel %vm877_vm1, %v2832_v0, %v2833_v27  ;;  %v5978_v0 = vld [vmem:[#allocation9_spill] sm:$0xff] }
 0x1f6   : > { %v1895_v17 = vadd.f32 %v1829_v60, %v1600_v43 }
 0x1f7   : > { %3795 = vmatmul.msk.f32.vlgmr.msra.gmra.mxu1 %vm960_vm2, %v5247_v41  ;;  %v2142_v22 = vpop.f32.mrf.mxu0  ;;  %v5972_v41 = vld [vmem:[#allocation10_spill] sm:$0xff]  ;;  %v3128_v43 = vsel %vm1322_vm3, %v3126_v33, %v3127_v24 }
 0x1f8   : > { %v5314_v9 = vadd.f32 %v2139_v57, %v1895_v17  ;;  %3877 = vmatmul.msk.f32.vlgmr.msra.gmra.mxu2 %vm960_vm2, %v3827_v8  ;;  %v1275_v42 = vadd.f32 %v1274_v26, %v5972_v41  ;;  %v2237_v8 = vrot.slane %v5974_v37, 2  ;;  %v2238_v57 = vrot.slane %v5975_v56, 2  ;;  %v4041_v17 = vld [vmem:[%s4537_s25 + $0x1a8] sm:$0x3] }
 0x1f9   : > { %3911 = vmatmul.msk.f32.vlgmr.msra.gmra.mxu3 %vm960_vm2, %v2829_v39  ;;  %v2230_v2 = vrot.slane %v4041_v17, 2  ;;  %v3129_v41 = vrot.slane %v3832_v58, 2 }
 0x1fa   : > { %3945 = vmatmul.msk.f32.vlgmr.msra.gmra.mxu0 %vm960_vm2, %v3123_v16  ;;  %v5345_v26 = vsel %vm1322_vm3, %v2237_v8, %v2238_v57 }
 0x1fb   : > { %v1537_v19 = vpop.f32.mrf.mxu2 }
 0x1fc   : > { %v1832_v5 = vpop.f32.mrf.mxu3  ;;  %v1601_v12 = vadd.f32 %v1537_v19, %v1275_v42  ;;  %v1277_v55 = vpop.f32.mrf.mxu1 }
 0x1fd   : > { %v1278_v21 = vadd.f32 %v1277_v55, %v5973_v48  ;;  %v3833_v55 = vld [vmem:[%s4537_s25 + $0x330] sm:$0xff] }
 0x1fe   : > { %v1896_v61 = vadd.f32 %v1832_v5, %v1601_v12  ;;  %v2231_v5 = vsel %vm1322_vm3, %v2228_v10, %v2230_v2  ;;  %v2837_v46 = vrot.slane %v3833_v55, 1  ;;  %v5977_v10 = vld [vmem:[#allocation16_spill] sm:$0xff] }
 0x1ff   : > { %3796 = vmatmul.msk.f32.gmra.mxu1 %vm960_vm2, %v2226_v3  ;;  %v2145_v11 = vpop.f32.mrf.mxu0  ;;  %v3834_v3 = vld [vmem:[%s4537_s25 + $0x338] sm:$0xff]  ;;  %v5979_v48 = vld [vmem:[#allocation8_spill] sm:$0xff] }
 0x200   : > { %v5329_v13 = vadd.f32 %v2142_v22, %v1896_v61  ;;  %3878 = vmatmul.msk.f32.gmra.mxu2 %vm960_vm2, %v3828_v23  ;;  %v2835_v22 = vrot.slane %v3832_v58, 1  ;;  %v3130_v61 = vsel %vm1322_vm3, %v3127_v24, %v3129_v41 }
 0x201   : > { %3912 = vmatmul.msk.f32.gmra.mxu3 %vm960_vm2, %v2831_v4 }
 0x202   : > { %3946 = vmatmul.msk.f32.gmra.mxu0 %vm960_vm2, %v3125_v31  ;;  %v2836_v32 = vsel %vm877_vm1, %v2833_v27, %v2835_v22  ;;  %v2242_v27 = vrot.slane %v5978_v0, 2  ;;  %v5403_v0 = vld [vmem:[%s4537_s25 + $0x200] sm:$0xff] }
 0x203   : > { %v1540_v6 = vpop.f32.mrf.mxu2 }
 0x204   : > { %v1835_v47 = vpop.f32.mrf.mxu3  ;;  %v1602_v28 = vadd.f32 %v1540_v6, %v1278_v21  ;;  %v1280_v23 = vpop.f32.mrf.mxu1  ;;  %v2243_v21 = vrot.slane %v5979_v48, 2  ;;  %v3131_v6 = vrot.slane %v3833_v55, 2 }
 0x206   : > { %v1897_v60 = vadd.f32 %v1835_v47, %v1602_v28  ;;  %v3132_v47 = vrot.slane %v3834_v3, 2  ;;  %v5378_v58 = vsel %vm1322_vm3, %v2242_v27, %v2243_v21  ;;  %v2248_v27 = vrot.slane %v5403_v0, 2 }
 0x207   : > { %3797 = vmatmul.msk.f32.gmra.mxu1 %vm960_vm2, %v5280_v49  ;;  %v2148_v54 = vpop.f32.mrf.mxu0  ;;  %v5976_v49 = vld [vmem:[#allocation14_spill] sm:$0xff] }
 0x208   : > { %v5347_v39 = vadd.f32 %v2145_v11, %v1897_v60  ;;  %3879 = vmatmul.msk.f32.gmra.mxu2 %vm960_vm2, %v3830_v30  ;;  %v1281_v16 = vadd.f32 %v1280_v23, %v5976_v49  ;;  %v2838_v11 = vrot.slane %v3834_v3, 1  ;;  %v3835_v23 = vld [vmem:[%s4537_s25 + $0x340] sm:$0x3]  ;;  %v3133_v60 = vsel %vm1322_vm3, %v3131_v6, %v3132_v47 }
 0x209   : > { %3913 = vmatmul.msk.f32.gmra.mxu3 %vm960_vm2, %v2834_v7  ;;  %v2840_v2 = vrot.slane %v3835_v23, 1 }
 0x20a   : > { %3947 = vmatmul.msk.f32.gmra.mxu0 %vm960_vm2, %v3128_v43  ;;  %v2839_v24 = vsel %vm877_vm1, %v2837_v46, %v2838_v11  ;;  %v4042_v43 = vld [vmem:[%s4537_s25 + $0x1c0] sm:$0x3]  ;;  %v5981_v46 = vld [vmem:[#allocation20_spill] sm:$0xff] }
 0x20b   : > { %v1543_v51 = vpop.f32.mrf.mxu2  ;;  %v2235_v17 = vrot.slane %v4042_v43, 2 }
 0x20c   : > { %v1838_v45 = vpop.f32.mrf.mxu3  ;;  %v1603_v42 = vadd.f32 %v1543_v51, %v1281_v16  ;;  %v1283_v19 = vpop.f32.mrf.mxu1  ;;  %v3134_v51 = vrot.slane %v3835_v23, 2 }
 0x20d   : > { %v1284_v31 = vadd.f32 %v1283_v19, %v5977_v10  ;;  %v2841_v19 = vsel %vm877_vm1, %v2838_v11, %v2840_v2  ;;  %v4043_v10 = vld [vmem:[%s4537_s25 + $0x1f8] sm:$0xff] }
 0x20e   : > { %v1898_v12 = vadd.f32 %v1838_v45, %v1603_v42  ;;  %v2236_v42 = vsel %vm1322_vm3, %v2233_v29, %v2235_v17  ;;  %v4045_v17 = vld [vmem:[%s4537_s25 + $0x1d8] sm:$0x3] }
 0x20f   : > { %3798 = vmatmul.msk.f32.gmra.mxu1 %vm960_vm2, %v2231_v5  ;;  %v2151_v4 = vpop.f32.mrf.mxu0  ;;  %v2240_v2 = vrot.slane %v4045_v17, 2 }
 0x210   : > { %v5362_v30 = vadd.f32 %v2148_v54, %v1898_v12  ;;  %3880 = vmatmul.msk.f32.gmra.mxu2 %vm960_vm2, %v3831_v18  ;;  %v3837_v12 = vld [vmem:[%s4537_s25 + $0x350] sm:$0xff] }
 0x211   : > { %3914 = vmatmul.msk.f32.gmra.mxu3 %vm960_vm2, %v2836_v32  ;;  %v3836_v32 = vld [vmem:[%s4537_s25 + $0x348] sm:$0xff]  ;;  %v2843_v29 = vrot.slane %v3837_v12, 1 }
 0x212   : > { %3948 = vmatmul.msk.f32.gmra.mxu0 %vm960_vm2, %v3130_v61  ;;  %v2842_v14 = vrot.slane %v3836_v32, 1  ;;  %v3136_v6 = vrot.slane %v3836_v32, 2 }
 0x213   : > { %v1546_v37 = vpop.f32.mrf.mxu2 }
 0x214   : > { %v1841_v8 = vpop.f32.mrf.mxu3  ;;  %v1604_v33 = vadd.f32 %v1546_v37, %v1284_v31  ;;  %v1286_v18 = vpop.f32.mrf.mxu1  ;;  %v2247_v31 = vrot.slane %v4043_v10, 2  ;;  %v4046_v10 = vld [vmem:[%s4537_s25 + $0x210] sm:$0xff] }
 0x216   : > { %v1899_v28 = vadd.f32 %v1841_v8, %v1604_v33 }
 0x217   : > { %3799 = vmatmul.msk.f32.gmra.mxu1 %vm960_vm2, %v5312_v38  ;;  %v2154_v7 = vpop.f32.mrf.mxu0  ;;  %v5980_v38 = vld [vmem:[#allocation18_spill] sm:$0xff] }
 0x218   : > { %v5380_v54 = vadd.f32 %v2151_v4, %v1899_v28  ;;  %3881 = vmatmul.msk.f32.gmra.mxu2 %vm960_vm2, %v3833_v55  ;;  %v1287_v22 = vadd.f32 %v1286_v18, %v5980_v38  ;;  %v3135_v4 = vsel %vm1322_vm3, %v3132_v47, %v3134_v51  ;;  %v2844_v18 = vsel %vm877_vm1, %v2842_v14, %v2843_v29  ;;  %v3838_v28 = vld [vmem:[%s4537_s25 + $0x358] sm:$0x3] }
 0x219   : > { %3915 = vmatmul.msk.f32.gmra.mxu3 %vm960_vm2, %v2839_v24  ;;  %v2845_v38 = vrot.slane %v3838_v28, 1  ;;  %v3139_v51 = vrot.slane %v3838_v28, 2 }
 0x21a   : > { %3949 = vmatmul.msk.f32.gmra.mxu0 %vm960_vm2, %v3133_v60  ;;  %v5414_v60 = vsel %vm1322_vm3, %v2247_v31, %v2248_v27  ;;  %v2252_v31 = vrot.slane %v4046_v10, 2 }
 0x21b   : > { %v1549_v49 = vpop.f32.mrf.mxu2 }
 0x21c   : > { %v1844_v16 = vpop.f32.mrf.mxu3  ;;  %v1605_v45 = vadd.f32 %v1549_v49, %v1287_v22  ;;  %v1289_v41 = vpop.f32.mrf.mxu1 }
 0x21d   : > { %v1290_v11 = vadd.f32 %v1289_v41, %v5981_v46 }
 0x21e   : > { %v1900_v5 = vadd.f32 %v1844_v16, %v1605_v45 }
 0x21f   : > { %3800 = vmatmul.msk.f32.gmra.mxu1 %vm960_vm2, %v2236_v42  ;;  %v2157_v55 = vpop.f32.mrf.mxu0  ;;  %v2241_v42 = vsel %vm1322_vm3, %v2238_v57, %v2240_v2 }
 0x220   : > { %v5395_v61 = vadd.f32 %v2154_v7, %v1900_v5  ;;  %3882 = vmatmul.msk.f32.gmra.mxu2 %vm960_vm2, %v3834_v3  ;;  %v3137_v3 = vrot.slane %v3837_v12, 2 }
 0x221   : > { %3916 = vmatmul.msk.f32.gmra.mxu3 %vm960_vm2, %v2841_v19  ;;  %v2846_v19 = vsel %vm877_vm1, %v2843_v29, %v2845_v38 }
 0x222   : > { %3950 = vmatmul.msk.f32.gmra.mxu0 %vm960_vm2, %v3135_v4  ;;  %v3138_v7 = vsel %vm1322_vm3, %v3136_v6, %v3137_v3  ;;  %v3140_v14 = vsel %vm1322_vm3, %v3137_v3, %v3139_v51 }
 0x223   : > { %v1552_v37 = vpop.f32.mrf.mxu2 }
 0x224   : > { %v1847_v8 = vpop.f32.mrf.mxu3  ;;  %v1606_v47 = vadd.f32 %v1552_v37, %v1290_v11  ;;  %v1292_v33 = vpop.f32.mrf.mxu1  ;;  %v5983_v11 = vld [vmem:[#allocation24_spill] sm:$0xff]  ;;  %v5439_v37 = vld [vmem:[%s4537_s25 + $0x218] sm:$0xff] }
 0x226   : > { %v1901_v24 = vadd.f32 %v1847_v8, %v1606_v47  ;;  %v2253_v8 = vrot.slane %v5439_v37, 2 }
 0x227   : > { %3801 = vmatmul.msk.f32.gmra.mxu1 %vm960_vm2, %v5345_v26  ;;  %v2160_v23 = vpop.f32.mrf.mxu0  ;;  %v5982_v26 = vld [vmem:[#allocation22_spill] sm:$0xff] }
 0x228   : > { %v5416_v43 = vadd.f32 %v2157_v55, %v1901_v24  ;;  %3883 = vmatmul.msk.f32.gmra.mxu2 %vm960_vm2, %v3836_v32  ;;  %v1293_v22 = vadd.f32 %v1292_v33, %v5982_v26  ;;  %v3839_v32 = vld [vmem:[%s4537_s25 + $0x360] sm:$0xff]  ;;  %v3840_v55 = vld [vmem:[%s4537_s25 + $0x368] sm:$0xff]  ;;  %v5450_v2 = vsel %vm1322_vm3, %v2252_v31, %v2253_v8  ;;  %v4048_v26 = vld [vmem:[%s4537_s25 + $0x1f0] sm:$0x3] }
 0x229   : > { %3917 = vmatmul.msk.f32.gmra.mxu3 %vm960_vm2, %v2844_v18  ;;  %v2847_v56 = vrot.slane %v3839_v32, 1  ;;  %v2848_v57 = vrot.slane %v3840_v55, 1  ;;  %v3141_v47 = vrot.slane %v3839_v32, 2  ;;  %v5985_v31 = vld [vmem:[#allocation13_spill] sm:$0xff] }
 0x22a   : > { %3951 = vmatmul.msk.f32.gmra.mxu0 %vm960_vm2, %v3138_v7 }
 0x22b   : > { %v1555_v49 = vpop.f32.mrf.mxu2  ;;  %v2849_v24 = vsel %vm877_vm1, %v2847_v56, %v2848_v57  ;;  %v3843_v56 = vld [vmem:[%s4537_s25 + $0x380] sm:$0xff] }
 0x22c   : > { %v1850_v16 = vpop.f32.mrf.mxu3  ;;  %v1607_v45 = vadd.f32 %v1555_v49, %v1293_v22  ;;  %v1295_v41 = vpop.f32.mrf.mxu1  ;;  %v2245_v22 = vrot.slane %v4048_v26, 2  ;;  %v3844_v26 = vld [vmem:[%s4537_s25 + $0x388] sm:$0x3] }
 0x22d   : > { %v1296_v29 = vadd.f32 %v1295_v41, %v5983_v11 }
 0x22e   : > { %v1902_v5 = vadd.f32 %v1850_v16, %v1607_v45 }
 0x22f   : > { %3802 = vmatmul.msk.f32.gmra.mxu1 %vm960_vm2, %v2241_v42  ;;  %v2163_v4 = vpop.f32.mrf.mxu0 }
 0x230   : > { %v5431_v46 = vadd.f32 %v2160_v23, %v1902_v5  ;;  %3884 = vmatmul.msk.f32.gmra.mxu2 %vm960_vm2, %v3837_v12  ;;  %v3142_v12 = vrot.slane %v3840_v55, 2  ;;  %v3841_v23 = vld [vmem:[%s4537_s25 + $0x370] sm:$0x3]  ;;  %v2246_v5 = vsel %vm1322_vm3, %v2243_v21, %v2245_v22  ;;  %v2853_v21 = vrot.slane %v3843_v56, 1 }
 0x231   : > { %3918 = vmatmul.msk.f32.gmra.mxu3 %vm960_vm2, %v2846_v19  ;;  %v2850_v49 = vrot.slane %v3841_v23, 1  ;;  %v3144_v41 = vrot.slane %v3841_v23, 2 }
 0x232   : > { %3952 = vmatmul.msk.f32.gmra.mxu0 %vm960_vm2, %v3140_v14  ;;  %v3143_v17 = vsel %vm1322_vm3, %v3141_v47, %v3142_v12  ;;  %v3842_v14 = vld [vmem:[%s4537_s25 + $0x378] sm:$0xff]  ;;  %v5475_v47 = vld [vmem:[%s4537_s25 + $0x230] sm:$0xff] }
 0x233   : > { %v1558_v6 = vpop.f32.mrf.mxu2  ;;  %v2852_v48 = vrot.slane %v3842_v14, 1 }
 0x234   : > { %v1853_v3 = vpop.f32.mrf.mxu3  ;;  %v1608_v33 = vadd.f32 %v1558_v6, %v1296_v29  ;;  %v1298_v18 = vpop.f32.mrf.mxu1  ;;  %v3145_v29 = vsel %vm1322_vm3, %v3142_v12, %v3144_v41  ;;  %v4049_v6 = vld [vmem:[%s4537_s25 + $0x228] sm:$0xff]  ;;  %v2855_v41 = vrot.slane %v3844_v26, 1 }
 0x236   : > { %v1903_v28 = vadd.f32 %v1853_v3, %v1608_v33  ;;  %v2257_v3 = vrot.slane %v4049_v6, 2  ;;  %v2258_v33 = vrot.slane %v5475_v47, 2 }
 0x237   : > { %3803 = vmatmul.msk.f32.gmra.mxu1 %vm960_vm2, %v5378_v58  ;;  %v2166_v7 = vpop.f32.mrf.mxu0  ;;  %v5984_v58 = vld [vmem:[#allocation11_spill] sm:$0xff] }
 0x238   : > { %v5452_v38 = vadd.f32 %v2163_v4, %v1903_v28  ;;  %3885 = vmatmul.msk.f32.gmra.mxu2 %vm960_vm2, %v3839_v32  ;;  %v1299_v16 = vadd.f32 %v1298_v18, %v5984_v58  ;;  %v2851_v32 = vsel %vm877_vm1, %v2848_v57, %v2850_v49  ;;  %v5486_v58 = vsel %vm1322_vm3, %v2257_v3, %v2258_v33 }
 0x239   : > { %3919 = vmatmul.msk.f32.gmra.mxu3 %vm960_vm2, %v2849_v24  ;;  %v3146_v24 = vrot.slane %v3842_v14, 2 }
 0x23a   : > { %3953 = vmatmul.msk.f32.gmra.mxu0 %vm960_vm2, %v3143_v17 }
 0x23b   : > { %v1561_v51 = vpop.f32.mrf.mxu2 }
 0x23c   : > { %v1856_v45 = vpop.f32.mrf.mxu3  ;;  %v1609_v42 = vadd.f32 %v1561_v51, %v1299_v16  ;;  %v1301_v19 = vpop.f32.mrf.mxu1  ;;  %v4051_v51 = vld [vmem:[%s4537_s25 + $0x208] sm:$0x3] }
 0x23d   : > { %v1302_v57 = vadd.f32 %v1301_v19, %v5985_v31  ;;  %v3845_v31 = vld [vmem:[%s4537_s25 + $0x390] sm:$0xff] }
 0x23e   : > { %v1904_v4 = vadd.f32 %v1856_v45, %v1609_v42  ;;  %v2250_v45 = vrot.slane %v4051_v51, 2  ;;  %v2857_v0 = vrot.slane %v3845_v31, 1 }
 0x23f   : > { %3804 = vmatmul.msk.f32.gmra.mxu1 %vm960_vm2, %v2246_v5  ;;  %v2169_v11 = vpop.f32.mrf.mxu0 }
 0x240   : > { %v5467_v10 = vadd.f32 %v2166_v7, %v1904_v4  ;;  %3886 = vmatmul.msk.f32.gmra.mxu2 %vm960_vm2, %v3840_v55  ;;  %v3147_v55 = vrot.slane %v3843_v56, 2  ;;  %v2854_v7 = vsel %vm877_vm1, %v2852_v48, %v2853_v21 }
 0x241   : > { %3920 = vmatmul.msk.f32.gmra.mxu3 %vm960_vm2, %v2851_v32  ;;  %v3149_v32 = vrot.slane %v3844_v26, 2  ;;  %v3151_v26 = vrot.slane %v3845_v31, 2 }
 0x242   : > { %3954 = vmatmul.msk.f32.gmra.mxu0 %vm960_vm2, %v3145_v29  ;;  %v3148_v49 = vsel %vm1322_vm3, %v3146_v24, %v3147_v55  ;;  %v4052_v24 = vld [vmem:[%s4537_s25 + $0x240] sm:$0xff] }
 0x243   : > { %v1564_v12 = vpop.f32.mrf.mxu2  ;;  %v3150_v3 = vsel %vm1322_vm3, %v3147_v55, %v3149_v32  ;;  %v4054_v32 = vld [vmem:[%s4537_s25 + $0x220] sm:$0x3] }
 0x244   : > { %v1859_v18 = vpop.f32.mrf.mxu3  ;;  %v1610_v28 = vadd.f32 %v1564_v12, %v1302_v57  ;;  %v1304_v23 = vpop.f32.mrf.mxu1  ;;  %v3846_v57 = vld [vmem:[%s4537_s25 + $0x398] sm:$0xff] }
 0x246   : > { %v1905_v17 = vadd.f32 %v1859_v18, %v1610_v28  ;;  %v5987_v18 = vld [vmem:[#allocation17_spill] sm:$0xff]  ;;  %v2262_v28 = vrot.slane %v4052_v24, 2  ;;  %v3848_v24 = vld [vmem:[%s4537_s25 + $0x3a8] sm:$0xff] }
 0x247   : > { %3805 = vmatmul.msk.f32.gmra.mxu1 %vm960_vm2, %v5414_v60  ;;  %v2172_v22 = vpop.f32.mrf.mxu0  ;;  %v5986_v60 = vld [vmem:[#allocation15_spill] sm:$0xff]  ;;  %v2862_v37 = vrot.slane %v3848_v24, 1 }
 0x248   : > { %v5488_v16 = vadd.f32 %v2169_v11, %v1905_v17  ;;  %3887 = vmatmul.msk.f32.gmra.mxu2 %vm960_vm2, %v3842_v14  ;;  %v1305_v42 = vadd.f32 %v1304_v23, %v5986_v60  ;;  %v2251_v14 = vsel %vm1322_vm3, %v2248_v27, %v2250_v45  ;;  %v2856_v11 = vsel %vm877_vm1, %v2853_v21, %v2855_v41  ;;  %v5511_v23 = vld [vmem:[%s4537_s25 + $0x248] sm:$0xff]  ;;  %v3847_v41 = vld [vmem:[%s4537_s25 + $0x3a0] sm:$0x3] }
 0x249   : > { %3921 = vmatmul.msk.f32.gmra.mxu3 %vm960_vm2, %v2854_v7  ;;  %v2858_v27 = vrot.slane %v3846_v57, 1  ;;  %v2263_v7 = vrot.slane %v5511_v23, 2 }
 0x24a   : > { %3955 = vmatmul.msk.f32.gmra.mxu0 %vm960_vm2, %v3148_v49 }
 0x24b   : > { %v1567_v19 = vpop.f32.mrf.mxu2  ;;  %v2859_v51 = vsel %vm877_vm1, %v2857_v0, %v2858_v27 }
 0x24c   : > { %v1862_v5 = vpop.f32.mrf.mxu3  ;;  %v1611_v4 = vadd.f32 %v1567_v19, %v1305_v42  ;;  %v1307_v29 = vpop.f32.mrf.mxu1  ;;  %v5522_v19 = vsel %vm1322_vm3, %v2262_v28, %v2263_v7  ;;  %v3849_v28 = vld [vmem:[%s4537_s25 + $0x3b0] sm:$0xff] }
 0x24d   : > { %v1308_v21 = vadd.f32 %v1307_v29, %v5987_v18  ;;  %v2860_v29 = vrot.slane %v3847_v41, 1 }
 0x24e   : > { %v1906_v48 = vadd.f32 %v1862_v5, %v1611_v4  ;;  %v2255_v4 = vrot.slane %v4054_v32, 2 }
 0x24f   : > { %3806 = vmatmul.msk.f32.gmra.mxu1 %vm960_vm2, %v2251_v14  ;;  %v2175_v6 = vpop.f32.mrf.mxu0 }
 0x250   : > { %v5503_v12 = vadd.f32 %v2172_v22, %v1906_v48  ;;  %3888 = vmatmul.msk.f32.gmra.mxu2 %vm960_vm2, %v3843_v56  ;;  %v3152_v56 = vrot.slane %v3846_v57, 2 }
 0x251   : > { %3922 = vmatmul.msk.f32.gmra.mxu3 %vm960_vm2, %v2856_v11 }
 0x252   : > { %3956 = vmatmul.msk.f32.gmra.mxu0 %vm960_vm2, %v3150_v3  ;;  %v3153_v42 = vsel %vm1322_vm3, %v3151_v26, %v3152_v56  ;;  %v3154_v3 = vrot.slane %v3847_v41, 2 }
 0x253   : > { %v1570_v55 = vpop.f32.mrf.mxu2 }
 0x254   : > { %v1865_v17 = vpop.f32.mrf.mxu3  ;;  %v1612_v22 = vadd.f32 %v1570_v55, %v1308_v21  ;;  %v1310_v49 = vpop.f32.mrf.mxu1 }
 0x256   : > { %v1907_v45 = vadd.f32 %v1865_v17, %v1612_v22  ;;  %v3155_v17 = vsel %vm1322_vm3, %v3152_v56, %v3154_v3  ;;  %v5989_v22 = vld [vmem:[#allocation21_spill] sm:$0xff] }
 0x257   : > { %3807 = vmatmul.msk.f32.gmra.mxu1 %vm960_vm2, %v5450_v2  ;;  %v2178_v60 = vpop.f32.mrf.mxu0  ;;  %v5988_v2 = vld [vmem:[#allocation19_spill] sm:$0xff] }
 0x258   : > { %v5524_v5 = vadd.f32 %v2175_v6, %v1907_v45  ;;  %3889 = vmatmul.msk.f32.gmra.mxu2 %vm960_vm2, %v3845_v31  ;;  %v1311_v14 = vadd.f32 %v1310_v49, %v5988_v2  ;;  %v2256_v31 = vsel %vm1322_vm3, %v2253_v8, %v2255_v4  ;;  %v2861_v6 = vsel %vm877_vm1, %v2858_v27, %v2860_v29  ;;  %v4055_v49 = vld [vmem:[%s4537_s25 + $0x258] sm:$0xff]  ;;  %v5547_v45 = vld [vmem:[%s4537_s25 + $0x260] sm:$0xff] }
 0x259   : > { %3923 = vmatmul.msk.f32.gmra.mxu3 %vm960_vm2, %v2859_v51  ;;  %v2863_v8 = vrot.slane %v3849_v28, 1  ;;  %v2267_v51 = vrot.slane %v4055_v49, 2  ;;  %v2268_v41 = vrot.slane %v5547_v45, 2 }
 0x25a   : > { %3957 = vmatmul.msk.f32.gmra.mxu0 %vm960_vm2, %v3153_v42  ;;  %v3156_v42 = vrot.slane %v3848_v24, 2 }
 0x25b   : > { %v1573_v11 = vpop.f32.mrf.mxu2  ;;  %v2864_v29 = vsel %vm877_vm1, %v2862_v37, %v2863_v8  ;;  %v5558_v3 = vsel %vm1322_vm3, %v2267_v51, %v2268_v41 }
 0x25c   : > { %v1868_v48 = vpop.f32.mrf.mxu3  ;;  %v1613_v0 = vadd.f32 %v1573_v11, %v1311_v14  ;;  %v1313_v18 = vpop.f32.mrf.mxu1  ;;  %v3850_v14 = vld [vmem:[%s4537_s25 + $0x3b8] sm:$0x3] }
 0x25d   : > { %v1314_v27 = vadd.f32 %v1313_v18, %v5989_v22  ;;  %v4057_v18 = vld [vmem:[%s4537_s25 + $0x238] sm:$0x3]  ;;  %v3159_v22 = vrot.slane %v3850_v14, 2 }
 0x25e   : > { %v1908_v21 = vadd.f32 %v1868_v48, %v1613_v0 }
 0x25f   : > { %3808 = vmatmul.msk.f32.gmra.mxu1 %vm960_vm2, %v2256_v31  ;;  %v2181_v55 = vpop.f32.mrf.mxu0  ;;  %v2260_v31 = vrot.slane %v4057_v18, 2 }
 0x260   : > { %v5539_v26 = vadd.f32 %v2178_v60, %v1908_v21  ;;  %3890 = vmatmul.msk.f32.gmra.mxu2 %vm960_vm2, %v3846_v57  ;;  %v3157_v57 = vrot.slane %v3849_v28, 2 }
 0x261   : > { %3924 = vmatmul.msk.f32.gmra.mxu3 %vm960_vm2, %v2861_v6  ;;  %v2865_v6 = vrot.slane %v3850_v14, 1 }
 0x262   : > { %3958 = vmatmul.msk.f32.gmra.mxu0 %vm960_vm2, %v3155_v17  ;;  %v3158_v48 = vsel %vm1322_vm3, %v3156_v42, %v3157_v57 }
 0x263   : > { %v1576_v56 = vpop.f32.mrf.mxu2 }
 0x264   : > { %v1871_v60 = vpop.f32.mrf.mxu3  ;;  %v1614_v32 = vadd.f32 %v1576_v56, %v1314_v27  ;;  %v1316_v4 = vpop.f32.mrf.mxu1  ;;  %v3851_v56 = vld [vmem:[%s4537_s25 + $0x3c0] sm:$0xff] }
 0x265   : > { %v2867_v47 = vrot.slane %v3851_v56, 1 }
 0x266   : > { %v1909_v2 = vadd.f32 %v1871_v60, %v1614_v32  ;;  %v3852_v60 = vld [vmem:[%s4537_s25 + $0x3c8] sm:$0xff]  ;;  %v3160_v32 = vsel %vm1322_vm3, %v3157_v57, %v3159_v22 }
 0x267   : > { %3809 = vmatmul.msk.f32.gmra.mxu1 %vm960_vm2, %v5486_v58  ;;  %v2184_v11 = vpop.f32.mrf.mxu0  ;;  %v5990_v58 = vld [vmem:[#allocation23_spill] sm:$0xff] }
 0x268   : > { %v5560_v0 = vadd.f32 %v2181_v55, %v1909_v2  ;;  %3891 = vmatmul.msk.f32.gmra.mxu2 %vm960_vm2, %v3848_v24  ;;  %v1317_v21 = vadd.f32 %v1316_v4, %v5990_v58  ;;  %v2261_v24 = vsel %vm1322_vm3, %v2258_v33, %v2260_v31  ;;  %v2866_v55 = vsel %vm877_vm1, %v2863_v8, %v2865_v6  ;;  %v4058_v2 = vld [vmem:[%s4537_s25 + $0x270] sm:$0xff] }
 0x269   : > { %3925 = vmatmul.msk.f32.gmra.mxu3 %vm960_vm2, %v2864_v29  ;;  %v2868_v33 = vrot.slane %v3852_v60, 1  ;;  %v5991_v29 = vld [vmem:[#allocation25_spill] sm:$0xff]  ;;  %v2272_v14 = vrot.slane %v4058_v2, 2  ;;  %v3161_v31 = vrot.slane %v3851_v56, 2 }
 0x26a   : > { %3959 = vmatmul.msk.f32.gmra.mxu0 %vm960_vm2, %v3158_v48  ;;  %v5583_v48 = vld [vmem:[%s4537_s25 + $0x278] sm:$0xff] }
 0x26b   : > { %v1579_v17 = vpop.f32.mrf.mxu2  ;;  %v2273_v18 = vrot.slane %v5583_v48, 2 }
 0x26c   : > { %v1874_v37 = vpop.f32.mrf.mxu3  ;;  %v1615_v27 = vadd.f32 %v1579_v17, %v1317_v21  ;;  %v1319_v49 = vpop.f32.mrf.mxu1  ;;  %v2869_v21 = vsel %vm877_vm1, %v2867_v47, %v2868_v33 }
 0x26d   : > { %v1320_v8 = vadd.f32 %v1319_v49, %v5991_v29  ;;  %v5594_v49 = vsel %vm1322_vm3, %v2272_v14, %v2273_v18 }
 0x26e   : > { %v1910_v51 = vadd.f32 %v1874_v37, %v1615_v27  ;;  %v3853_v37 = vld [vmem:[%s4537_s25 + $0x3d0] sm:$0x3] }
 0x26f   : > { %3810 = vmatmul.msk.f32.gmra.mxu1 %vm960_vm2, %v2261_v24  ;;  %v2187_v42 = vpop.f32.mrf.mxu0 }
 0x270   : > { %v5575_v4 = vadd.f32 %v2184_v11, %v1910_v51  ;;  %3892 = vmatmul.msk.f32.gmra.mxu2 %vm960_vm2, %v3849_v28  ;;  %v3162_v28 = vrot.slane %v3852_v60, 2 }
 0x271   : > { %3926 = vmatmul.msk.f32.gmra.mxu3 %vm960_vm2, %v2866_v55  ;;  %v4060_v55 = vld [vmem:[%s4537_s25 + $0x250] sm:$0x3] }
 0x272   : > { %3960 = vmatmul.msk.f32.gmra.mxu0 %vm960_vm2, %v3160_v32  ;;  %v3163_v27 = vsel %vm1322_vm3, %v3161_v31, %v3162_v28  ;;  %v2265_v51 = vrot.slane %v4060_v55, 2  ;;  %v3855_v31 = vld [vmem:[%s4537_s25 + $0x3e0] sm:$0xff]  ;;  %v5624_v55 = vld [vmem:[%s4537_s25 + $0x290] sm:$0xff] }
 0x273   : > { %v1582_v57 = vpop.f32.mrf.mxu2 }
 0x274   : > { %v1877_v11 = vpop.f32.mrf.mxu3  ;;  %v1616_v6 = vadd.f32 %v1582_v57, %v1320_v8  ;;  %v2388_v58 = vpop.f32.mrf.mxu1  ;;  %v3164_v8 = vrot.slane %v3853_v37, 2 }
 0x275   : > { %v2484_v32 = vadd.f32 %v2388_v58, %v5098_v15  ;;  %v5611_v15 = vld [vmem:[%s5942_s2] ss:$0 sm:$0xff] }
 0x276   : > { %v1911_v17 = vadd.f32 %v1877_v11, %v1616_v6  ;;  %v3854_v11 = vld [vmem:[%s4537_s25 + $0x3d8] sm:$0xff]  ;;  %v3165_v23 = vsel %vm1322_vm3, %v3162_v28, %v3164_v8  ;;  %v2278_v28 = vrot.slane %v5624_v55, 2  ;;  %v3856_v8 = vld [vmem:[%s4537_s25 + $0x3e8] sm:$0x3] }
 0x277   : > { %3811 = vmatmul.msk.f32.gmra.mxu1 %vm960_vm2, %v5522_v19  ;;  %v3287_v22 = vpop.f32.mrf.mxu0  ;;  %v2870_v19 = vrot.slane %v3853_v37, 1  ;;  %v4061_v37 = vld [vmem:[%s4537_s25 + $0x288] sm:$0xff] }
 0x278   : > { %v5596_v24 = vadd.f32 %v2187_v42, %v1911_v17  ;;  %3893 = vmatmul.msk.f32.gmra.mxu2 %vm960_vm2, %v3851_v56  ;;  %v2266_v56 = vsel %vm1322_vm3, %v2263_v7, %v2265_v51  ;;  %v2872_v7 = vrot.slane %v3854_v11, 1 }
 0x279   : > { %3927 = vmatmul.msk.f32.gmra.mxu3 %vm960_vm2, %v2869_v21  ;;  %v2871_v14 = vsel %vm877_vm1, %v2868_v33, %v2870_v19  ;;  %v2873_v33 = vrot.slane %v3855_v31, 1  ;;  %v3167_v19 = vrot.slane %v3855_v31, 2 }
 0x27a   : > { %3961 = vmatmul.msk.f32.gmra.mxu0 %vm960_vm2, %v3163_v27  ;;  %v2277_v27 = vrot.slane %v4061_v37, 2  ;;  %v3169_v37 = vrot.slane %v3856_v8, 2 }
 0x27b   : > { %v2683_v47 = vpop.f32.mrf.mxu2 }
 0x27c   : > { %v2993_v29 = vpop.f32.mrf.mxu3  ;;  %v2779_v2 = vadd.f32 %v2683_v47, %v2484_v32  ;;  %v2391_v42 = vpop.f32.mrf.mxu1  ;;  %v2874_v47 = vsel %vm877_vm1, %v2872_v7, %v2873_v33 }
 0x27d   : > { %v2485_v21 = vadd.f32 %v2391_v42, %v5112_v34 }
 0x27e   : > { %v3089_v57 = vadd.f32 %v2993_v29, %v2779_v2 }
 0x27f   : > { %3812 = vmatmul.msk.f32.gmra.mxu1 %vm960_vm2, %v2266_v56  ;;  %v3290_v6 = vpop.f32.mrf.mxu0  ;;  %v5638_v56 = vsel %vm1322_vm3, %v2277_v27, %v2278_v28 }
 0x280   : > { %v3383_v58 = vadd.f32 %v3287_v22, %v3089_v57  ;;  %3894 = vmatmul.msk.f32.gmra.mxu2 %vm960_vm2, %v3852_v60  ;;  %v3166_v60 = vrot.slane %v3854_v11, 2  ;;  %v4063_v57 = vld [vmem:[%s4537_s25 + $0x268] sm:$0x3] }
 0x281   : > { %3928 = vmatmul.msk.f32.gmra.mxu3 %vm960_vm2, %v2871_v14 }
 0x282   : > { %v3419_v17 = vadd.f32 %v5611_v15, %v3383_v58  ;;  %3962 = vmatmul.msk.f32.gmra.mxu0 %vm960_vm2, %v3165_v23  ;;  %v3168_v42 = vsel %vm1322_vm3, %v3166_v60, %v3167_v19  ;;  %v2270_v23 = vrot.slane %v4063_v57, 2  ;;  %v2875_v58 = vrot.slane %v3856_v8, 1  ;;  %v3858_v60 = vld [vmem:[%s4537_s25 + $0x3f8] sm:$0xff]  ;;  %v4064_v8 = vld [vmem:[%s4537_s25 + $0x2a0] sm:$0xff] }
 0x283   : > { %v2686_v22 = vpop.f32.mrf.mxu2 }
 0x284   : > { %v2996_v51 = vpop.f32.mrf.mxu3  ;;  %3451 = vst [vmem:[%s5627_s11] sm:$0xff] %v3419_v17  ;;  %v2780_v34 = vadd.f32 %v2686_v22, %v2485_v21  ;;  %v2394_v32 = vpop.f32.mrf.mxu1  ;;  %v2876_v22 = vsel %vm877_vm1, %v2873_v33, %v2875_v58 }
 0x286   : > { %v3090_v29 = vadd.f32 %v2996_v51, %v2780_v34 }
 0x287   : > { %3813 = vmatmul.msk.f32.gmra.mxu1 %vm960_vm2, %v5558_v3  ;;  %v3293_v2 = vpop.f32.mrf.mxu0  ;;  %v2486_v3 = vadd.f32 %v2394_v32, %v5124_v63  ;;  %v3857_v63 = vld [vmem:[%s4537_s25 + $0x3f0] sm:$0xff]  ;;  %v3170_v32 = vsel %vm1322_vm3, %v3167_v19, %v3169_v37 }
 0x288   : > { %v3384_v14 = vadd.f32 %v3290_v6, %v3090_v29  ;;  %3895 = vmatmul.msk.f32.gmra.mxu2 %vm960_vm2, %v3854_v11  ;;  %v2271_v11 = vsel %vm1322_vm3, %v2268_v41, %v2270_v23  ;;  %v2877_v45 = vrot.slane %v3857_v63, 1  ;;  %v2878_v41 = vrot.slane %v3858_v60, 1 }
 0x289   : > { %3929 = vmatmul.msk.f32.gmra.mxu3 %vm960_vm2, %v2874_v47  ;;  %v3172_v23 = vrot.slane %v3858_v60, 2 }
 0x28a   : > { %v3420_v7 = vadd.f32 %v5611_v15, %v3384_v14  ;;  %3963 = vmatmul.msk.f32.gmra.mxu0 %vm960_vm2, %v3168_v42  ;;  %v2282_v42 = vrot.slane %v4064_v8, 2  ;;  %v5662_v14 = vld [vmem:[%s4537_s25 + $0x2a8] sm:$0xff] }
 0x28b   : > { %v2689_v21 = vpop.f32.mrf.mxu2  ;;  %v2283_v19 = vrot.slane %v5662_v14, 2 }
 0x28c   : > { %v2999_v17 = vpop.f32.mrf.mxu3  ;;  %3452 = vst [vmem:[%s5627_s11 + $0x8] sm:$0xff] %v3420_v7  ;;  %v2781_v6 = vadd.f32 %v2689_v21, %v2486_v3  ;;  %v2397_v27 = vpop.f32.mrf.mxu1  ;;  %v3859_v21 = vld [vmem:[%s4537_s25 + $0x400] sm:$0x3] }
 0x28d   : > { %v2487_v29 = vadd.f32 %v2397_v27, %v5138_v40  ;;  %v2879_v40 = vsel %vm877_vm1, %v2877_v45, %v2878_v41 }
 0x28e   : > { %v3091_v51 = vadd.f32 %v2999_v17, %v2781_v6  ;;  %v5674_v6 = vsel %vm1322_vm3, %v2282_v42, %v2283_v19 }
 0x28f   : > { %3814 = vmatmul.msk.f32.gmra.mxu1 %vm960_vm2, %v2271_v11  ;;  %v3296_v34 = vpop.f32.mrf.mxu0  ;;  %v4066_v11 = vld [vmem:[%s4537_s25 + $0x280] sm:$0x3] }
 0x290   : > { %v3385_v47 = vadd.f32 %v3293_v2, %v3091_v51  ;;  %3896 = vmatmul.msk.f32.gmra.mxu2 %vm960_vm2, %v3855_v31  ;;  %v3171_v31 = vrot.slane %v3857_v63, 2  ;;  %v2880_v51 = vrot.slane %v3859_v21, 1 }
 0x291   : > { %3930 = vmatmul.msk.f32.gmra.mxu3 %vm960_vm2, %v2876_v22  ;;  %v2275_v22 = vrot.slane %v4066_v11, 2 }
 0x292   : > { %v3421_v33 = vadd.f32 %v5611_v15, %v3385_v47  ;;  %3964 = vmatmul.msk.f32.gmra.mxu0 %vm960_vm2, %v3170_v32  ;;  %v3173_v37 = vsel %vm1322_vm3, %v3171_v31, %v3172_v23  ;;  %v2881_v8 = vsel %vm877_vm1, %v2878_v41, %v2880_v51 }
 0x293   : > { %v2692_v2 = vpop.f32.mrf.mxu2 }
 0x294   : > { %v3002_v57 = vpop.f32.mrf.mxu3  ;;  %3453 = vst [vmem:[%s5627_s11 + $0x10] sm:$0xff] %v3421_v33  ;;  %v2782_v58 = vadd.f32 %v2692_v2, %v2487_v29  ;;  %v2400_v3 = vpop.f32.mrf.mxu1  ;;  %v3174_v29 = vrot.slane %v3859_v21, 2  ;;  %v3861_v2 = vld [vmem:[%s4537_s25 + $0x410] sm:$0xff]  ;;  %v5698_v21 = vld [vmem:[%s4537_s25 + $0x2c0] sm:$0xff] }
 0x296   : > { %v3092_v7 = vadd.f32 %v3002_v57, %v2782_v58  ;;  %v3175_v31 = vsel %vm1322_vm3, %v3172_v23, %v3174_v29  ;;  %v2288_v23 = vrot.slane %v5698_v21, 2 }
 0x297   : > { %3815 = vmatmul.msk.f32.gmra.mxu1 %vm960_vm2, %v5594_v49  ;;  %v3299_v17 = vpop.f32.mrf.mxu0  ;;  %v2488_v49 = vadd.f32 %v2400_v3, %v5150_v53  ;;  %v3860_v53 = vld [vmem:[%s4537_s25 + $0x408] sm:$0xff] }
 0x298   : > { %v3386_v27 = vadd.f32 %v3296_v34, %v3092_v7  ;;  %3897 = vmatmul.msk.f32.gmra.mxu2 %vm960_vm2, %v3857_v63  ;;  %v2276_v63 = vsel %vm1322_vm3, %v2273_v18, %v2275_v22  ;;  %v2882_v48 = vrot.slane %v3860_v53, 1  ;;  %v2883_v18 = vrot.slane %v3861_v2, 1 }
 0x299   : > { %3931 = vmatmul.msk.f32.gmra.mxu3 %vm960_vm2, %v2879_v40  ;;  %v4067_v40 = vld [vmem:[%s4537_s25 + $0x2b8] sm:$0xff] }
 0x29a   : > { %v3422_v32 = vadd.f32 %v5611_v15, %v3386_v27  ;;  %3965 = vmatmul.msk.f32.gmra.mxu0 %vm960_vm2, %v3173_v37  ;;  %v2287_v7 = vrot.slane %v4067_v40, 2  ;;  %v3177_v27 = vrot.slane %v3861_v2, 2  ;;  %v3864_v40 = vld [vmem:[%s4537_s25 + $0x428] sm:$0xff] }
 0x29b   : > { %v2695_v47 = vpop.f32.mrf.mxu2 }
 0x29c   : > { %v3005_v45 = vpop.f32.mrf.mxu3  ;;  %3454 = vst [vmem:[%s5627_s11 + $0x18] sm:$0xff] %v3422_v32  ;;  %v2783_v34 = vadd.f32 %v2695_v47, %v2488_v49  ;;  %v2403_v33 = vpop.f32.mrf.mxu1  ;;  %v3862_v49 = vld [vmem:[%s4537_s25 + $0x418] sm:$0x3] }
 0x29d   : > { %v2489_v3 = vadd.f32 %v2403_v33, %v5164_v52  ;;  %v2884_v52 = vsel %vm877_vm1, %v2882_v48, %v2883_v18 }
 0x29e   : > { %v3093_v42 = vadd.f32 %v3005_v45, %v2783_v34  ;;  %v5710_v45 = vsel %vm1322_vm3, %v2287_v7, %v2288_v23  ;;  %v4069_v34 = vld [vmem:[%s4537_s25 + $0x298] sm:$0x3] }
 0x29f   : > { %3816 = vmatmul.msk.f32.gmra.mxu1 %vm960_vm2, %v2276_v63  ;;  %v3302_v57 = vpop.f32.mrf.mxu0  ;;  %v2280_v33 = vrot.slane %v4069_v34, 2  ;;  %v2885_v63 = vrot.slane %v3862_v49, 1 }
 0x2a0   : > { %v3387_v58 = vadd.f32 %v3299_v17, %v3093_v42  ;;  %3898 = vmatmul.msk.f32.gmra.mxu2 %vm960_vm2, %v3858_v60  ;;  %v3176_v60 = vrot.slane %v3860_v53, 2 }
 0x2a1   : > { %3932 = vmatmul.msk.f32.gmra.mxu3 %vm960_vm2, %v2881_v8 }
 0x2a2   : > { %v3423_v41 = vadd.f32 %v5611_v15, %v3387_v58  ;;  %3966 = vmatmul.msk.f32.gmra.mxu0 %vm960_vm2, %v3175_v31  ;;  %v3178_v47 = vsel %vm1322_vm3, %v3176_v60, %v3177_v27  ;;  %v3179_v58 = vrot.slane %v3862_v49, 2 }
 0x2a3   : > { %v2698_v17 = vpop.f32.mrf.mxu2 }
 0x2a4   : > { %v3008_v37 = vpop.f32.mrf.mxu3  ;;  %3455 = vst [vmem:[%s5627_s11 + $0x20] sm:$0xff] %v3423_v41  ;;  %v2784_v11 = vadd.f32 %v2698_v17, %v2489_v3  ;;  %v2406_v22 = vpop.f32.mrf.mxu1  ;;  %v2886_v3 = vsel %vm877_vm1, %v2883_v18, %v2885_v63  ;;  %v3180_v17 = vsel %vm1322_vm3, %v3177_v27, %v3179_v58 }
 0x2a6   : > { %v3094_v51 = vadd.f32 %v3008_v37, %v2784_v11  ;;  %v4070_v11 = vld [vmem:[%s4537_s25 + $0x2d0] sm:$0xff] }
 0x2a7   : > { %3817 = vmatmul.msk.f32.gmra.mxu1 %vm960_vm2, %v5638_v56  ;;  %v3305_v32 = vpop.f32.mrf.mxu0  ;;  %v2490_v56 = vadd.f32 %v2406_v22, %v5176_v59  ;;  %v3863_v59 = vld [vmem:[%s4537_s25 + $0x420] sm:$0xff]  ;;  %v2292_v22 = vrot.slane %v4070_v11, 2 }
 0x2a8   : > { %v3388_v29 = vadd.f32 %v3302_v57, %v3094_v51  ;;  %3899 = vmatmul.msk.f32.gmra.mxu2 %vm960_vm2, %v3860_v53  ;;  %v2281_v53 = vsel %vm1322_vm3, %v2278_v28, %v2280_v33  ;;  %v2887_v55 = vrot.slane %v3863_v59, 1  ;;  %v2888_v28 = vrot.slane %v3864_v40, 1  ;;  %v3865_v33 = vld [vmem:[%s4537_s25 + $0x430] sm:$0x3] }
 0x2a9   : > { %3933 = vmatmul.msk.f32.gmra.mxu3 %vm960_vm2, %v2884_v52  ;;  %v5734_v52 = vld [vmem:[%s4537_s25 + $0x2d8] sm:$0xff] }
 0x2aa   : > { %v3424_v8 = vadd.f32 %v5611_v15, %v3388_v29  ;;  %3967 = vmatmul.msk.f32.gmra.mxu0 %vm960_vm2, %v3178_v47  ;;  %v2293_v27 = vrot.slane %v5734_v52, 2 }
 0x2ab   : > { %v2701_v42 = vpop.f32.mrf.mxu2 }
 0x2ac   : > { %v3011_v31 = vpop.f32.mrf.mxu3  ;;  %3456 = vst [vmem:[%s5627_s11 + $0x28] sm:$0xff] %v3424_v8  ;;  %v2785_v57 = vadd.f32 %v2701_v42, %v2490_v56  ;;  %v2409_v48 = vpop.f32.mrf.mxu1  ;;  %v5746_v8 = vsel %vm1322_vm3, %v2292_v22, %v2293_v27 }
 0x2ad   : > { %v2491_v60 = vadd.f32 %v2409_v48, %v5190_v20  ;;  %v2889_v20 = vsel %vm877_vm1, %v2887_v55, %v2888_v28 }
 0x2ae   : > { %v3095_v41 = vadd.f32 %v3011_v31, %v2785_v57  ;;  %v4072_v31 = vld [vmem:[%s4537_s25 + $0x2b0] sm:$0x3]  ;;  %v2890_v57 = vrot.slane %v3865_v33, 1 }
 0x2af   : > { %3818 = vmatmul.msk.f32.gmra.mxu1 %vm960_vm2, %v2281_v53  ;;  %v3308_v7 = vpop.f32.mrf.mxu0  ;;  %v2285_v58 = vrot.slane %v4072_v31, 2 }
 0x2b0   : > { %v3389_v37 = vadd.f32 %v3305_v32, %v3095_v41  ;;  %3900 = vmatmul.msk.f32.gmra.mxu2 %vm960_vm2, %v3861_v2  ;;  %v3181_v2 = vrot.slane %v3863_v59, 2  ;;  %v3182_v32 = vrot.slane %v3864_v40, 2  ;;  %v3184_v41 = vrot.slane %v3865_v33, 2 }
 0x2b1   : > { %3934 = vmatmul.msk.f32.gmra.mxu3 %vm960_vm2, %v2886_v3 }
 0x2b2   : > { %v3425_v18 = vadd.f32 %v5611_v15, %v3389_v37  ;;  %3968 = vmatmul.msk.f32.gmra.mxu0 %vm960_vm2, %v3180_v17  ;;  %v3183_v56 = vsel %vm1322_vm3, %v3181_v2, %v3182_v32  ;;  %v2891_v37 = vsel %vm877_vm1, %v2888_v28, %v2890_v57  ;;  %v3185_v11 = vsel %vm1322_vm3, %v3182_v32, %v3184_v41 }
 0x2b3   : > { %v2704_v51 = vpop.f32.mrf.mxu2 }
 0x2b4   : > { %v3014_v49 = vpop.f32.mrf.mxu3  ;;  %3457 = vst [vmem:[%s5627_s11 + $0x30] sm:$0xff] %v3425_v18  ;;  %v2786_v47 = vadd.f32 %v2704_v51, %v2491_v60  ;;  %v2412_v29 = vpop.f32.mrf.mxu1  ;;  %v3867_v60 = vld [vmem:[%s4537_s25 + $0x440] sm:$0xff] }
 0x2b6   : > { %v3096_v34 = vadd.f32 %v3014_v49, %v2786_v47  ;;  %v4073_v49 = vld [vmem:[%s4537_s25 + $0x2e8] sm:$0xff]  ;;  %v5770_v47 = vld [vmem:[%s4537_s25 + $0x2f0] sm:$0xff] }
 0x2b7   : > { %3819 = vmatmul.msk.f32.gmra.mxu1 %vm960_vm2, %v5674_v6  ;;  %v3311_v63 = vpop.f32.mrf.mxu0  ;;  %v2492_v6 = vadd.f32 %v2412_v29, %v5202_v62  ;;  %v3866_v62 = vld [vmem:[%s4537_s25 + $0x438] sm:$0xff]  ;;  %v2297_v2 = vrot.slane %v4073_v49, 2  ;;  %v2298_v32 = vrot.slane %v5770_v47, 2 }
 0x2b8   : > { %v3390_v42 = vadd.f32 %v3308_v7, %v3096_v34  ;;  %3901 = vmatmul.msk.f32.gmra.mxu2 %vm960_vm2, %v3863_v59  ;;  %v2286_v59 = vsel %vm1322_vm3, %v2283_v19, %v2285_v58  ;;  %v2892_v14 = vrot.slane %v3866_v62, 1  ;;  %v2893_v19 = vrot.slane %v3867_v60, 1 }
 0x2b9   : > { %3935 = vmatmul.msk.f32.gmra.mxu3 %vm960_vm2, %v2889_v20  ;;  %v3187_v34 = vrot.slane %v3867_v60, 2  ;;  %v5782_v57 = vsel %vm1322_vm3, %v2297_v2, %v2298_v32 }
 0x2ba   : > { %v3426_v48 = vadd.f32 %v5611_v15, %v3390_v42  ;;  %3969 = vmatmul.msk.f32.gmra.mxu0 %vm960_vm2, %v3183_v56  ;;  %v3868_v42 = vld [vmem:[%s4537_s25 + $0x448] sm:$0x3] }
 0x2bb   : > { %v2707_v53 = vpop.f32.mrf.mxu2 }
 0x2bc   : > { %v3017_v3 = vpop.f32.mrf.mxu3  ;;  %3458 = vst [vmem:[%s5627_s11 + $0x38] sm:$0xff] %v3426_v48  ;;  %v2787_v7 = vadd.f32 %v2707_v53, %v2492_v6  ;;  %v2415_v17 = vpop.f32.mrf.mxu1  ;;  %v4075_v48 = vld [vmem:[%s4537_s25 + $0x2c8] sm:$0x3] }
 0x2bd   : > { %v2493_v51 = vadd.f32 %v2415_v17, %v5216_v35  ;;  %v2894_v35 = vsel %vm877_vm1, %v2892_v14, %v2893_v19  ;;  %v2290_v53 = vrot.slane %v4075_v48, 2  ;;  %v3870_v14 = vld [vmem:[%s4537_s25 + $0x458] sm:$0xff] }
 0x2be   : > { %v3097_v55 = vadd.f32 %v3017_v3, %v2787_v7  ;;  %v2895_v3 = vrot.slane %v3868_v42, 1  ;;  %v2898_v49 = vrot.slane %v3870_v14, 1 }
 0x2bf   : > { %3820 = vmatmul.msk.f32.gmra.mxu1 %vm960_vm2, %v2286_v59  ;;  %v3314_v18 = vpop.f32.mrf.mxu0  ;;  %v3189_v59 = vrot.slane %v3868_v42, 2 }
 0x2c0   : > { %v3391_v22 = vadd.f32 %v3311_v63, %v3097_v55  ;;  %3902 = vmatmul.msk.f32.gmra.mxu2 %vm960_vm2, %v3864_v40  ;;  %v3186_v40 = vrot.slane %v3866_v62, 2 }
 0x2c1   : > { %3936 = vmatmul.msk.f32.gmra.mxu3 %vm960_vm2, %v2891_v37 }
 0x2c2   : > { %v3427_v28 = vadd.f32 %v5611_v15, %v3391_v22  ;;  %3970 = vmatmul.msk.f32.gmra.mxu0 %vm960_vm2, %v3185_v11  ;;  %v3188_v58 = vsel %vm1322_vm3, %v3186_v40, %v3187_v34  ;;  %v3869_v22 = vld [vmem:[%s4537_s25 + $0x450] sm:$0xff]  ;;  %v3192_v40 = vrot.slane %v3870_v14, 2 }
 0x2c3   : > { %v2710_v29 = vpop.f32.mrf.mxu2  ;;  %v2897_v21 = vrot.slane %v3869_v22, 1 }
 0x2c4   : > { %v3020_v20 = vpop.f32.mrf.mxu3  ;;  %3459 = vst [vmem:[%s5627_s11 + $0x40] sm:$0xff] %v3427_v28  ;;  %v2788_v33 = vadd.f32 %v2710_v29, %v2493_v51  ;;  %v2418_v63 = vpop.f32.mrf.mxu1  ;;  %v3190_v51 = vsel %vm1322_vm3, %v3187_v34, %v3189_v59 }
 0x2c6   : > { %v3098_v56 = vadd.f32 %v3020_v20, %v2788_v33  ;;  %v3191_v20 = vrot.slane %v3869_v22, 2 }
 0x2c7   : > { %3821 = vmatmul.msk.f32.gmra.mxu1 %vm960_vm2, %v5710_v45  ;;  %v3317_v31 = vpop.f32.mrf.mxu0  ;;  %v2494_v45 = vadd.f32 %v2418_v63, %v5228_v25 }
 0x2c8   : > { %v3392_v6 = vadd.f32 %v3314_v18, %v3098_v56  ;;  %3903 = vmatmul.msk.f32.gmra.mxu2 %vm960_vm2, %v3866_v62  ;;  %v2291_v62 = vsel %vm1322_vm3, %v2288_v23, %v2290_v53  ;;  %v2896_v18 = vsel %vm877_vm1, %v2893_v19, %v2895_v3  ;;  %v3193_v56 = vsel %vm1322_vm3, %v3191_v20, %v3192_v40 }
 0x2c9   : > { %3937 = vmatmul.msk.f32.gmra.mxu3 %vm960_vm2, %v2894_v35  ;;  %v3871_v35 = vld [vmem:[%s4537_s25 + $0x460] sm:$0x3] }
 0x2ca   : > { %v3428_v41 = vadd.f32 %v5611_v15, %v3392_v6  ;;  %3971 = vmatmul.msk.f32.gmra.mxu0 %vm960_vm2, %v3188_v58  ;;  %v2900_v6 = vrot.slane %v3871_v35, 1 }
 0x2cb   : > { %v2713_v7 = vpop.f32.mrf.mxu2 }
 0x2cc   : > { %v3023_v17 = vpop.f32.mrf.mxu3  ;;  %3460 = vst [vmem:[%s5627_s11 + $0x48] sm:$0xff] %v3428_v41  ;;  %v2789_v37 = vadd.f32 %v2713_v7, %v2494_v45  ;;  %v2421_v55 = vpop.f32.mrf.mxu1  ;;  %v3194_v45 = vrot.slane %v3871_v35, 2  ;;  %v2901_v59 = vsel %vm877_vm1, %v2898_v49, %v2900_v6 }
 0x2cd   : > { %v2495_v23 = vadd.f32 %v2421_v55, %v5249_v44  ;;  %v3872_v55 = vld [vmem:[%s4537_s25 + $0x468] sm:$0xff] }
 0x2ce   : > { %v3099_v11 = vadd.f32 %v3023_v17, %v2789_v37  ;;  %v2902_v52 = vrot.slane %v3872_v55, 1 }
 0x2cf   : > { %3822 = vmatmul.msk.f32.gmra.mxu1 %vm960_vm2, %v2291_v62  ;;  %v3320_v25 = vpop.f32.mrf.mxu0  ;;  %v3873_v62 = vld [vmem:[%s4537_s25 + $0x470] sm:$0xff] }
 0x2d0   : > { %v3393_v28 = vadd.f32 %v3317_v31, %v3099_v11  ;;  %3904 = vmatmul.msk.f32.gmra.mxu2 %vm960_vm2, %v3867_v60  ;;  %v2899_v60 = vsel %vm877_vm1, %v2897_v21, %v2898_v49  ;;  %v4076_v31 = vld [vmem:[%s4537_s25 + $0x2e0] sm:$0x3]  ;;  %v3196_v21 = vrot.slane %v3872_v55, 2  ;;  %v3197_v49 = vrot.slane %v3873_v62, 2 }
 0x2d1   : > { %3938 = vmatmul.msk.f32.gmra.mxu3 %vm960_vm2, %v2896_v18  ;;  %v2295_v58 = vrot.slane %v4076_v31, 2  ;;  %v3195_v18 = vsel %vm1322_vm3, %v3192_v40, %v3194_v45 }
 0x2d2   : > { %v3429_v19 = vadd.f32 %v5611_v15, %v3393_v28  ;;  %3972 = vmatmul.msk.f32.gmra.mxu0 %vm960_vm2, %v3190_v51  ;;  %v3198_v20 = vsel %vm1322_vm3, %v3196_v21, %v3197_v49 }
 0x2d3   : > { %v2716_v2 = vpop.f32.mrf.mxu2  ;;  %v2296_v17 = vsel %vm1322_vm3, %v2293_v27, %v2295_v58 }
 0x2d4   : > { %v3026_v29 = vpop.f32.mrf.mxu3  ;;  %3461 = vst [vmem:[%s5627_s11 + $0x50] sm:$0xff] %v3429_v19  ;;  %v2790_v34 = vadd.f32 %v2716_v2, %v2495_v23  ;;  %v2424_v33 = vpop.f32.mrf.mxu1 }
 0x2d5   : > { %v2496_v48 = vadd.f32 %v2424_v33, %v5261_v36 }
 0x2d6   : > { %v3100_v63 = vadd.f32 %v3026_v29, %v2790_v34  ;;  %v3874_v29 = vld [vmem:[%s4537_s25 + $0x478] sm:$0x3] }
 0x2d7   : > { %3823 = vmatmul.msk.f32.gmra.mxu1 %vm960_vm2, %v5746_v8  ;;  %v3323_v44 = vpop.f32.mrf.mxu0  ;;  %v4077_v34 = vld [vmem:[%s4537_s25 + $0x2f8] sm:$0x3]  ;;  %s3497_s25 = sshll.u32 %s5627_s11, 4  ;;  %s3498_s25 = int_to_ptr.vmem [resolvable:$true] %s3497_s25 }
 0x2d8   : > { %v3394_v42 = vadd.f32 %v3320_v25, %v3100_v63  ;;  %3905 = vmatmul.msk.f32.gmra.mxu2 %vm960_vm2, %v3869_v22  ;;  %v2903_v22 = vrot.slane %v3873_v62, 1  ;;  %v2300_v33 = vrot.slane %v4077_v34, 2 }
 0x2d9   : > { %3939 = vmatmul.msk.f32.gmra.mxu3 %vm960_vm2, %v2899_v60  ;;  %v2905_v60 = vrot.slane %v3874_v29, 1 }
 0x2da   : > { %v3430_v53 = vadd.f32 %v5611_v15, %v3394_v42  ;;  %3973 = vmatmul.msk.f32.gmra.mxu0 %vm960_vm2, %v3193_v56  ;;  %v2301_v58 = vsel %vm1322_vm3, %v2298_v32, %v2300_v33 }
 0x2db   : > { %v2719_v8 = vpop.f32.mrf.mxu2  ;;  %v2906_v6 = vsel %vm877_vm1, %v2903_v22, %v2905_v60 }
 0x2dc   : > { %v3029_v3 = vpop.f32.mrf.mxu3  ;;  %3462 = vst [vmem:[%s5627_s11 + $0x58] sm:$0xff] %v3430_v53  ;;  %v2791_v41 = vadd.f32 %v2719_v8, %v2496_v48  ;;  %v2427_v7 = vpop.f32.mrf.mxu1 }
 0x2dd   : > { %v2497_v27 = vadd.f32 %v2427_v7, %v5282_v50 }
 0x2de   : > { %v3101_v37 = vadd.f32 %v3029_v3, %v2791_v41 }
 0x2df   : > { %3824 = vmatmul.msk.f32.gmra.mxu1 %vm960_vm2, %v2296_v17  ;;  %v3326_v36 = vpop.f32.mrf.mxu0 }
 0x2e0   : > { %v3395_v11 = vadd.f32 %v3323_v44, %v3101_v37  ;;  %3906 = vmatmul.msk.f32.gmra.mxu2 %vm960_vm2, %v3870_v14  ;;  %v2904_v14 = vsel %vm877_vm1, %v2902_v52, %v2903_v22 }
 0x2e1   : > { %3940 = vmatmul.msk.f32.gmra.mxu3 %vm960_vm2, %v2901_v59 }
 0x2e2   : > { %v3431_v25 = vadd.f32 %v5611_v15, %v3395_v11  ;;  %3974 = vmatmul.msk.f32.gmra.mxu0 %vm960_vm2, %v3195_v18 }
 0x2e3   : > { %v2722_v51 = vpop.f32.mrf.mxu2 }
 0x2e4   : > { %v3032_v28 = vpop.f32.mrf.mxu3  ;;  %3463 = vst [vmem:[%s5627_s11 + $0x60] sm:$0xff] %v3431_v25  ;;  %v2792_v23 = vadd.f32 %v2722_v51, %v2497_v27  ;;  %v2430_v19 = vpop.f32.mrf.mxu1 }
 0x2e5   : > { %v2498_v63 = vadd.f32 %v2430_v19, %v5296_v1 }
 0x2e6   : > { %v3102_v2 = vadd.f32 %v3032_v28, %v2792_v23 }
 0x2e7   : > { %3825 = vmatmul.msk.f32.gmra.mxu1 %vm960_vm2, %v5782_v57  ;;  %v3329_v50 = vpop.f32.mrf.mxu0  ;;  %v3199_v57 = vrot.slane %v3874_v29, 2 }
 0x2e8   : > { %v3396_v40 = vadd.f32 %v3326_v36, %v3102_v2  ;;  %3907 = vmatmul.msk.f32.gmra.mxu2 %vm960_vm2, %v3872_v55 }
 0x2e9   : > { %3941 = vmatmul.msk.f32.gmra.mxu3 %vm960_vm2, %v2904_v14  ;;  %v3200_v53 = vsel %vm1322_vm3, %v3197_v49, %v3199_v57 }
 0x2ea   : > { %v3432_v35 = vadd.f32 %v5611_v15, %v3396_v40  ;;  %3975 = vmatmul.msk.f32.gmra.mxu0 %vm960_vm2, %v3198_v20 }
 0x2eb   : > { %v2725_v44 = vpop.f32.mrf.mxu2 }
 0x2ec   : > { %v3035_v56 = vpop.f32.mrf.mxu3  ;;  %3464 = vst [vmem:[%s5627_s11 + $0x68] sm:$0xff] %v3432_v35  ;;  %v2793_v42 = vadd.f32 %v2725_v44, %v2498_v63  ;;  %v2433_v31 = vpop.f32.mrf.mxu1 }
 0x2ed   : > { %v2499_v3 = vadd.f32 %v2433_v31, %v5314_v9 }
 0x2ee   : > { %v3103_v48 = vadd.f32 %v3035_v56, %v2793_v42 }
 0x2ef   : > { %3826 = vmatmul.msk.f32.gmra.mxu1 %vm960_vm2, %v2301_v58  ;;  %v3332_v1 = vpop.f32.mrf.mxu0 }
 0x2f0   : > { %v3397_v8 = vadd.f32 %v3329_v50, %v3103_v48  ;;  %3908 = vmatmul.msk.f32.gmra.mxu2 %vm960_vm2, %v3873_v62 }
 0x2f1   : > { %3942 = vmatmul.msk.f32.gmra.mxu3 %vm960_vm2, %v2906_v6 }
 0x2f2   : > { %v3433_v47 = vadd.f32 %v5611_v15, %v3397_v8  ;;  %3976 = vmatmul.msk.f32.gmra.mxu0 %vm960_vm2, %v3200_v53 }
 0x2f3   : > { %v2728_v32 = vpop.f32.mrf.mxu2 }
 0x2f4   : > { %v3038_v45 = vpop.f32.mrf.mxu3  ;;  %3465 = vst [vmem:[%s5627_s11 + $0x70] sm:$0xff] %v3433_v47  ;;  %v2794_v41 = vadd.f32 %v2728_v32, %v2499_v3  ;;  %v2436_v7 = vpop.f32.mrf.mxu1 }
 0x2f5   : > { %v2500_v55 = vadd.f32 %v2436_v7, %v5329_v13 }
 0x2f6   : > { %v3104_v17 = vadd.f32 %v3038_v45, %v2794_v41 }
 0x2f7   : > { %v3335_v59 = vpop.f32.mrf.mxu0 }
 0x2f8   : > { %v3398_v37 = vadd.f32 %v3332_v1, %v3104_v17 }
 0x2fa   : > { %v3434_v62 = vadd.f32 %v5611_v15, %v3398_v37 }
 0x2fb   : > { %v2731_v36 = vpop.f32.mrf.mxu2 }
 0x2fc   : > { %v3041_v18 = vpop.f32.mrf.mxu3  ;;  %3466 = vst [vmem:[%s5627_s11 + $0x78] sm:$0xff] %v3434_v62  ;;  %v2795_v9 = vadd.f32 %v2731_v36, %v2500_v55  ;;  %v2439_v11 = vpop.f32.mrf.mxu1 }
 0x2fd   : > { %v2501_v25 = vadd.f32 %v2439_v11, %v5347_v39 }
 0x2fe   : > { %v3105_v52 = vadd.f32 %v3041_v18, %v2795_v9 }
 0x2ff   : > { %v3338_v22 = vpop.f32.mrf.mxu0 }
 0x300   : > { %v3399_v27 = vadd.f32 %v3335_v59, %v3105_v52 }
 0x302   : > { %v3435_v51 = vadd.f32 %v5611_v15, %v3399_v27 }
 0x303   : > { %v2734_v28 = vpop.f32.mrf.mxu2 }
 0x304   : > { %v3044_v21 = vpop.f32.mrf.mxu3  ;;  %3467 = vst [vmem:[%s5627_s11 + $0x80] sm:$0xff] %v3435_v51  ;;  %v2796_v49 = vadd.f32 %v2734_v28, %v2501_v25  ;;  %v2442_v13 = vpop.f32.mrf.mxu1 }
 0x305   : > { %v2502_v2 = vadd.f32 %v2442_v13, %v5362_v30 }
 0x306   : > { %v3106_v23 = vadd.f32 %v3044_v21, %v2796_v49 }
 0x307   : > { %v3341_v19 = vpop.f32.mrf.mxu0 }
 0x308   : > { %v3400_v14 = vadd.f32 %v3338_v22, %v3106_v23 }
 0x30a   : > { %v3436_v29 = vadd.f32 %v5611_v15, %v3400_v14 }
 0x30b   : > { %v2737_v50 = vpop.f32.mrf.mxu2 }
 0x30c   : > { %v3047_v20 = vpop.f32.mrf.mxu3  ;;  %3468 = vst [vmem:[%s5627_s11 + $0x88] sm:$0xff] %v3436_v29  ;;  %v2797_v40 = vadd.f32 %v2737_v50, %v2502_v2  ;;  %v2445_v39 = vpop.f32.mrf.mxu1 }
 0x30d   : > { %v2503_v63 = vadd.f32 %v2445_v39, %v5380_v54 }
 0x30e   : > { %v3107_v34 = vadd.f32 %v3047_v20, %v2797_v40 }
 0x30f   : > { %v3344_v33 = vpop.f32.mrf.mxu0 }
 0x310   : > { %v3401_v60 = vadd.f32 %v3341_v19, %v3107_v34 }
 0x312   : > { %v3437_v35 = vadd.f32 %v5611_v15, %v3401_v60 }
 0x313   : > { %v2740_v44 = vpop.f32.mrf.mxu2 }
 0x314   : > { %v3050_v56 = vpop.f32.mrf.mxu3  ;;  %3469 = vst [vmem:[%s5627_s11 + $0x90] sm:$0xff] %v3437_v35  ;;  %v2798_v57 = vadd.f32 %v2740_v44, %v2503_v63  ;;  %v2448_v30 = vpop.f32.mrf.mxu1 }
 0x315   : > { %v2504_v6 = vadd.f32 %v2448_v30, %v5395_v61 }
 0x316   : > { %v3108_v42 = vadd.f32 %v3050_v56, %v2798_v57 }
 0x317   : > { %v3347_v31 = vpop.f32.mrf.mxu0 }
 0x318   : > { %v3402_v58 = vadd.f32 %v3344_v33, %v3108_v42 }
 0x31a   : > { %v3438_v48 = vadd.f32 %v5611_v15, %v3402_v58 }
 0x31b   : > { %v2743_v1 = vpop.f32.mrf.mxu2 }
 0x31c   : > { %v3053_v53 = vpop.f32.mrf.mxu3  ;;  %3470 = vst [vmem:[%s5627_s11 + $0x98] sm:$0xff] %v3438_v48  ;;  %v2799_v8 = vadd.f32 %v2743_v1, %v2504_v6  ;;  %v2451_v54 = vpop.f32.mrf.mxu1 }
 0x31d   : > { %v2505_v45 = vadd.f32 %v2451_v54, %v5416_v43 }
 0x31e   : > { %v3109_v3 = vadd.f32 %v3053_v53, %v2799_v8 }
 0x31f   : > { %v3350_v47 = vpop.f32.mrf.mxu0 }
 0x320   : > { %v3403_v32 = vadd.f32 %v3347_v31, %v3109_v3 }
 0x322   : > { %v3439_v41 = vadd.f32 %v5611_v15, %v3403_v32 }
 0x323   : > { %v2746_v7 = vpop.f32.mrf.mxu2 }
 0x324   : > { %v3056_v17 = vpop.f32.mrf.mxu3  ;;  %3471 = vst [vmem:[%s5627_s11 + $0xa0] sm:$0xff] %v3439_v41  ;;  %v2800_v59 = vadd.f32 %v2746_v7, %v2505_v45  ;;  %v2454_v61 = vpop.f32.mrf.mxu1 }
 0x325   : > { %v2506_v36 = vadd.f32 %v2454_v61, %v5431_v46 }
 0x326   : > { %v3110_v37 = vadd.f32 %v3056_v17, %v2800_v59 }
 0x327   : > { %v3353_v55 = vpop.f32.mrf.mxu0 }
 0x328   : > { %v3404_v62 = vadd.f32 %v3350_v47, %v3110_v37 }
 0x32a   : > { %v3440_v18 = vadd.f32 %v5611_v15, %v3404_v62 }
 0x32b   : > { %v2749_v9 = vpop.f32.mrf.mxu2 }
 0x32c   : > { %v3059_v11 = vpop.f32.mrf.mxu3  ;;  %3472 = vst [vmem:[%s5627_s11 + $0xa8] sm:$0xff] %v3440_v18  ;;  %v2801_v52 = vadd.f32 %v2749_v9, %v2506_v36  ;;  %v2457_v43 = vpop.f32.mrf.mxu1 }
 0x32d   : > { %v2507_v51 = vadd.f32 %v2457_v43, %v5452_v38 }
 0x32e   : > { %v3111_v22 = vadd.f32 %v3059_v11, %v2801_v52 }
 0x32f   : > { %v3356_v27 = vpop.f32.mrf.mxu0 }
 0x330   : > { %v3405_v25 = vadd.f32 %v3353_v55, %v3111_v22 }
 0x332   : > { %v3441_v28 = vadd.f32 %v5611_v15, %v3405_v25 }
 0x333   : > { %v2752_v21 = vpop.f32.mrf.mxu2 }
 0x334   : > { %v3062_v49 = vpop.f32.mrf.mxu3  ;;  %3473 = vst [vmem:[%s5627_s11 + $0xb0] sm:$0xff] %v3441_v28  ;;  %v2802_v13 = vadd.f32 %v2752_v21, %v2507_v51  ;;  %v2460_v46 = vpop.f32.mrf.mxu1 }
 0x335   : > { %v2508_v2 = vadd.f32 %v2460_v46, %v5467_v10 }
 0x336   : > { %v3112_v23 = vadd.f32 %v3062_v49, %v2802_v13 }
 0x337   : > { %v3359_v19 = vpop.f32.mrf.mxu0 }
 0x338   : > { %v3406_v14 = vadd.f32 %v3356_v27, %v3112_v23 }
 0x33a   : > { %v3442_v29 = vadd.f32 %v5611_v15, %v3406_v14 }
 0x33b   : > { %v2755_v50 = vpop.f32.mrf.mxu2 }
 0x33c   : > { %v3065_v20 = vpop.f32.mrf.mxu3  ;;  %3474 = vst [vmem:[%s5627_s11 + $0xb8] sm:$0xff] %v3442_v29  ;;  %v2803_v40 = vadd.f32 %v2755_v50, %v2508_v2  ;;  %v2463_v38 = vpop.f32.mrf.mxu1 }
 0x33d   : > { %v2509_v60 = vadd.f32 %v2463_v38, %v5488_v16 }
 0x33e   : > { %v3113_v39 = vadd.f32 %v3065_v20, %v2803_v40 }
 0x33f   : > { %v3362_v34 = vpop.f32.mrf.mxu0 }
 0x340   : > { %v3407_v33 = vadd.f32 %v3359_v19, %v3113_v39 }
 0x342   : > { %v3443_v63 = vadd.f32 %v5611_v15, %v3407_v33 }
 0x343   : > { %v2758_v35 = vpop.f32.mrf.mxu2 }
 0x344   : > { %v3068_v44 = vpop.f32.mrf.mxu3  ;;  %3475 = vst [vmem:[%s5627_s11 + $0xc0] sm:$0xff] %v3443_v63  ;;  %v2804_v56 = vadd.f32 %v2758_v35, %v2509_v60  ;;  %v2466_v10 = vpop.f32.mrf.mxu1 }
 0x345   : > { %v2510_v31 = vadd.f32 %v2466_v10, %v5503_v12 }
 0x346   : > { %v3114_v57 = vadd.f32 %v3068_v44, %v2804_v56 }
 0x347   : > { %v3365_v30 = vpop.f32.mrf.mxu0 }
 0x348   : > { %v3408_v42 = vadd.f32 %v3362_v34, %v3114_v57 }
 0x34a   : > { %v3444_v58 = vadd.f32 %v5611_v15, %v3408_v42 }
 0x34b   : > { %v2761_v6 = vpop.f32.mrf.mxu2 }
 0x34c   : > { %v3071_v48 = vpop.f32.mrf.mxu3  ;;  %3476 = vst [vmem:[%s5627_s11 + $0xc8] sm:$0xff] %v3444_v58  ;;  %v2805_v1 = vadd.f32 %v2761_v6, %v2510_v31  ;;  %v2469_v16 = vpop.f32.mrf.mxu1 }
 0x34d   : > { %v2511_v3 = vadd.f32 %v2469_v16, %v5524_v5 }
 0x34e   : > { %v3115_v53 = vadd.f32 %v3071_v48, %v2805_v1 }
 0x34f   : > { %v3368_v8 = vpop.f32.mrf.mxu0 }
 0x350   : > { %v3409_v54 = vadd.f32 %v3365_v30, %v3115_v53 }
 0x352   : > { %v3445_v47 = vadd.f32 %v5611_v15, %v3409_v54 }
 0x353   : > { %v2764_v32 = vpop.f32.mrf.mxu2 }
 0x354   : > { %v3074_v45 = vpop.f32.mrf.mxu3  ;;  %3477 = vst [vmem:[%s5627_s11 + $0xd0] sm:$0xff] %v3445_v47  ;;  %v2806_v41 = vadd.f32 %v2764_v32, %v2511_v3  ;;  %v2472_v12 = vpop.f32.mrf.mxu1 }
 0x355   : > { %v2512_v61 = vadd.f32 %v2472_v12, %v5539_v26 }
 0x356   : > { %v3116_v7 = vadd.f32 %v3074_v45, %v2806_v41 }
 0x357   : > { %v3371_v17 = vpop.f32.mrf.mxu0 }
 0x358   : > { %v3410_v59 = vadd.f32 %v3368_v8, %v3116_v7 }
 0x35a   : > { %v3446_v37 = vadd.f32 %v5611_v15, %v3410_v59 }
 0x35b   : > { %v2767_v55 = vpop.f32.mrf.mxu2 }
 0x35c   : > { %v3077_v62 = vpop.f32.mrf.mxu3  ;;  %3478 = vst [vmem:[%s5627_s11 + $0xd8] sm:$0xff] %v3446_v37  ;;  %v2807_v36 = vadd.f32 %v2767_v55, %v2512_v61  ;;  %v2475_v5 = vpop.f32.mrf.mxu1 }
 0x35d   : > { %v2513_v52 = vadd.f32 %v2475_v5, %v5560_v0 }
 0x35e   : > { %v3117_v18 = vadd.f32 %v3077_v62, %v2807_v36 }
 0x35f   : > { %v3374_v11 = vpop.f32.mrf.mxu0 }
 0x360   : > { %v3411_v9 = vadd.f32 %v3371_v17, %v3117_v18 }
 0x362   : > { %v3447_v43 = vadd.f32 %v5611_v15, %v3411_v9 }
 0x363   : > { %v2770_v22 = vpop.f32.mrf.mxu2 }
 0x364   : > { %v3080_v27 = vpop.f32.mrf.mxu3  ;;  %3479 = vst [vmem:[%s5627_s11 + $0xe0] sm:$0xff] %v3447_v43  ;;  %v2808_v26 = vadd.f32 %v2770_v22, %v2513_v52  ;;  %v2478_v25 = vpop.f32.mrf.mxu1 }
 0x365   : > { %v2514_v21 = vadd.f32 %v2478_v25, %v5575_v4 }
 0x366   : > { %v3118_v51 = vadd.f32 %v3080_v27, %v2808_v26 }
 0x367   : > { %v3377_v13 = vpop.f32.mrf.mxu0 }
 0x368   : > { %v3412_v28 = vadd.f32 %v3374_v11, %v3118_v51 }
 0x36a   : > { %v3448_v49 = vadd.f32 %v5611_v15, %v3412_v28 }
 0x36b   : > { %v2773_v46 = vpop.f32.mrf.mxu2 }
 0x36c   : > { %v3083_v23 = vpop.f32.mrf.mxu3  ;;  %3480 = vst [vmem:[%s5627_s11 + $0xe8] sm:$0xff] %v3448_v49  ;;  %v2809_v0 = vadd.f32 %v2773_v46, %v2514_v21  ;;  %v2481_v14 = vpop.f32.mrf.mxu1 }
 0x36d   : > { %v2515_v29 = vadd.f32 %v2481_v14, %v5596_v24 }
 0x36e   : > { %v3119_v19 = vadd.f32 %v3083_v23, %v2809_v0 }
 0x36f   : > { %v3380_v38 = vpop.f32.mrf.mxu0 }
 0x370   : > { %v3413_v2 = vadd.f32 %v3377_v13, %v3119_v19 }
 0x372   : > { %v3449_v4 = vadd.f32 %v5611_v15, %v3413_v2 }
 0x373   : > { %v2776_v50 = vpop.f32.mrf.mxu2 }
 0x374   : > { %v3086_v20 = vpop.f32.mrf.mxu3  ;;  %3481 = vst [vmem:[%s5627_s11 + $0xf0] sm:$0xff] %v3449_v4  ;;  %v2810_v40 = vadd.f32 %v2776_v50, %v2515_v29 }
 0x376   : > { %v3120_v39 = vadd.f32 %v3086_v20, %v2810_v40 }
 0x378   : > { %v3414_v34 = vadd.f32 %v3380_v38, %v3120_v39 }
 0x37a   : > { %v3450_v24 = vadd.f32 %v5611_v15, %v3414_v34 }
 0x37c   : > { %3482 = vst [vmem:[%s5627_s11 + $0xf8] sm:$0xff] %v3450_v24 }
 0x37d   : > { %4105 = shalt.err (!%p4102_p5)
}
 0x37e   : > { %s4142_s6 = smov 128   ;;  %s4143_s8 = smov 8  }
 0x37f   : > { %3991 = dma.vmem_to_hbm [thread:$0]  (%p4202_p6), %s3498_s25, 4096, %s3500_s26, %s3484_s16, %s4142_s6, %s4142_s6, %s4143_s8  }
 0x380 PF: > { %s3514_s9 = sand.u32 1, %s4128_s12   ;;  %p3994_p7 = pnand %p3570_p9, %p4206_p8 }
 0x381   : > { %s3515_s10 = scalar_lea.sflag [#allocation4], %s3514_s9 }
 0x382   : > { %p3995_p10 = pneg %p3994_p7 }
 0x384   : > { %4123 = dma.done.wait (%p3995_p10), %s3515_s10, 4096  }
 0x385   : > { %4125 = vsyncadd (%p3995_p10), %s3515_s10, 4294963200  ;;  %p13_p11 = scmp.ge.s32.totalorder %s4187_s18, 4   ;;  %s5992_s12 = smov %s4132_s13 }
 0x386   : > { %s5993_s13 = smov %s4136_s14  ;;  %s5994_s14 = smov %s4200_s21 }
 0x387   : > { %s5995_s15 = smov %s4187_s18  ;;  %15 = sbr.rel (!%p13_p11) target bundleno = 3 (0x3), region = 120 }
 0x38c   :  { %3521 = vsyncpa [#allocation4], 1 }
 0x38d   :  { %3523 = vsyncpa [#allocation4 + $0x1], 1 }

</bundles_post_ra>
